<compile_context>
chip_gen: v7x
topology: tpu7x:2x2x1
jax: 0.10.0
libtpu: 0.0.40
codegen_flags: <defaults>
</compile_context>

<pallas_src>
import functools

import jax
import jax.numpy as jnp
import numpy as np
from jax import lax
from jax.experimental import pallas as pl
from jax.experimental.pallas import tpu as pltpu


def _round_up(x, m):
    return (x + m - 1) // m * m


def _t_antisym_resnet_kernel(x_ref, w_ref, b_ref, o_ref, state_ref,
                             *, depth, h, use_tanh, mxu_dtype):
    """Grid = (n_tiles,): all `depth` residual layers fused per N-tile.

    x_ref     : (D, TN)        VMEM -- pipelined input tile
    w_ref     : (depth, D, D)  VMEM -- folded per-layer operators (mxu_dtype), resident
    b_ref     : (depth, D, 1)  VMEM -- per-layer biases (f32), resident
    o_ref     : (D, TN)        VMEM -- output tile
    state_ref : (D, TN)        VMEM scratch (f32) -- running residual state
    """
    # Initialize the running state in f32 (inputs may be bf16; keep accumulation exact-ish).
    state_ref[...] = x_ref[...].astype(jnp.float32)

    def layer(d, carry):
        state = state_ref[...]                                          # (D, TN) f32
        # One full-width MXU pass: z = B_d @ x  (bf16 operands, f32 accumulation).
        z = jnp.dot(w_ref[d], state.astype(mxu_dtype),
                    preferred_element_type=jnp.float32)                 # (D, TN) f32
        z = z + b_ref[d]                                                # (D, 1) lane-broadcast
        if use_tanh:
            z = jnp.tanh(z)                                             # EUP, f32 (v5e-safe)
        state_ref[...] = state + h * z                                  # residual update (f32)
        return carry

    lax.fori_loop(0, depth, layer, 0, unroll=True)

    o_ref[...] = state_ref[...].astype(o_ref.dtype)


def t_antisymmetric_resnet(x, W, b, M, *, h=1.0, gamma=1e-4, use_tanh=True,
                           tn=2048, mxu_dtype=jnp.bfloat16):
    """Forward pass of tAntisymmetricResNet.

    x : (width, N, dim3)            input tensor (tnn convention: features, samples, tubes)
    W : (depth, width, width, dim3) per-layer t-product weights
    b : (depth, width, dim3)        per-layer biases
    M : (dim3, dim3)                invertible mode-3 transform matrix
    """
    depth, width, _, dim3 = W.shape
    N = x.shape[1]
    D = dim3 * width
    dtype = x.dtype

    Minv = jnp.linalg.inv(M)
    hp = jax.lax.Precision.HIGHEST

    # ---- parameter setup (data-independent glue) ---------------------------------------
    # Transform-domain antisymmetric weights: Ahat_k = What_k - What_k^T - gamma*I.
    What = jnp.einsum('kl,dabl->dkab', M, W, precision=hp)            # (depth, dim3, w, w)
    Ahat = What - jnp.swapaxes(What, -1, -2) - gamma * jnp.eye(width, dtype=W.dtype)

    # Fold (Minv (x) I) . blockdiag(Ahat) . (M (x) I) into one dense operator per layer:
    #   B_d[(l,a),(m,b)] = sum_k Minv[l,k] * Ahat[d,k,a,b] * M[k,m]
    Bop = jnp.einsum('lk,dkab,km->dlamb', Minv, Ahat, M, precision=hp)
    Bop = Bop.reshape(depth, D, D).astype(mxu_dtype)                  # bf16 MXU operand

    # Flat bias: b_flat[d, l*width + a] = b[d, a, l]
    b_flat = jnp.transpose(b, (0, 2, 1)).reshape(depth, D, 1).astype(jnp.float32)

    # Flat state: x_flat[m*width + a, n] = x[a, n, m]
    x_flat = jnp.transpose(x, (2, 0, 1)).reshape(D, N)

    # ---- batch (lane) tiling ------------------------------------------------------------
    N_pad = _round_up(max(N, 128), 128)
    tn_eff = min(_round_up(tn, 128), N_pad)
    # v7x megacore: keep >= 2 parallel N-tiles when the batch allows it (one tile would
    # idle a TensorCore); harmless on single-TC v5e/v6e.
    if N_pad // tn_eff < 2 and N_pad >= 256:
        tn_eff = _round_up((N_pad + 1) // 2, 128)
    N_pad = _round_up(N_pad, tn_eff)
    n_tiles = N_pad // tn_eff
    if N_pad != N:
        x_flat = jnp.pad(x_flat, ((0, 0), (0, N_pad - N)))

    # ---- cost / VMEM sizing -------------------------------------------------------------
    flops = 2 * depth * D * D * N_pad
    transcendentals = depth * D * N_pad if use_tanh else 0
    bytes_accessed = (x_flat.size * x_flat.dtype.itemsize            # read x once
                      + D * N_pad * jnp.dtype(dtype).itemsize        # write out once
                      + Bop.size * Bop.dtype.itemsize                # resident operators
                      + b_flat.size * b_flat.dtype.itemsize)
    cost = pl.CostEstimate(flops=int(flops),
                           transcendentals=int(transcendentals),
                           bytes_accessed=int(bytes_accessed))

    x_bytes = D * tn_eff * x_flat.dtype.itemsize
    o_bytes = D * tn_eff * jnp.dtype(dtype).itemsize
    s_bytes = D * tn_eff * 4
    w_bytes = depth * D * D * jnp.dtype(mxu_dtype).itemsize
    bb_bytes = depth * D * 4
    # Double-buffered in/out tiles + f32 state scratch + (possibly double-buffered)
    # resident operators/biases, with headroom; capped to stay v7x-safe (64 MiB/core).
    # NOTE: for very large depth*D*D (e.g. D >~ 1024, depth >~ 16) full weight residency
    # would not fit -- fall back to streaming Bop per layer in that regime.
    vmem_limit = int(min(48 * 1024 * 1024,
                         max(16 * 1024 * 1024,
                             2 * (x_bytes + o_bytes) + s_bytes
                             + 2 * (w_bytes + bb_bytes) + (4 << 20))))

    kernel = functools.partial(_t_antisym_resnet_kernel,
                               depth=depth, h=float(h), use_tanh=use_tanh,
                               mxu_dtype=mxu_dtype)

    out_flat = pl.pallas_call(
        kernel,
        out_shape=jax.ShapeDtypeStruct((D, N_pad), dtype),
        grid_spec=pltpu.PrefetchScalarGridSpec(
            num_scalar_prefetch=0,
            grid=(n_tiles,),                                          # depth fused in-kernel
            in_specs=[
                pl.BlockSpec((D, tn_eff), lambda n: (0, n)),          # pipelined x tile
                pl.BlockSpec((depth, D, D), lambda n: (0, 0, 0)),     # resident operators
                pl.BlockSpec((depth, D, 1), lambda n: (0, 0, 0)),     # resident biases
            ],
            out_specs=pl.BlockSpec((D, tn_eff), lambda n: (0, n)),
            scratch_shapes=[pltpu.VMEM((D, tn_eff), jnp.float32)],    # f32 running state
        ),
        compiler_params=pltpu.CompilerParams(
            dimension_semantics=("parallel",),
            vmem_limit_bytes=vmem_limit),
        cost_estimate=cost,
    )(x_flat, Bop, b_flat)

    out_flat = out_flat[:, :N]
    return jnp.transpose(out_flat.reshape(dim3, width, N), (1, 2, 0))


# ------------------------------- pure-JAX reference ------------------------------------
def ref_forward(x, W, b, M, *, h, gamma, use_tanh):
    Minv = jnp.linalg.inv(M)
    depth, width, _, dim3 = W.shape
    eye = jnp.eye(width, dtype=x.dtype)
    hp = jax.lax.Precision.HIGHEST
    for d in range(depth):
        What = jnp.einsum('kl,abl->abk', M, W[d], precision=hp)
        Ahat = What - jnp.transpose(What, (1, 0, 2)) - gamma * eye[:, :, None]
        xhat = jnp.einsum('kl,anl->ank', M, x, precision=hp)
        zhat = jnp.einsum('abk,bnk->ank', Ahat, xhat, precision=hp)
        z = jnp.einsum('lk,ank->anl', Minv, zhat, precision=hp)
        z = z + b[d][:, None, :]
        if use_tanh:
            z = jnp.tanh(z)
        x = x + h * z
    return x


if __name__ == "__main__":
    # Small deterministic problem: width=16 features, dim3=8 tubes -> D = 128 (one MXU tile),
    # N=1024 samples (lane-dense, split into 2 parallel tiles of 512), depth=4 layers.
    width, dim3, N, depth = 16, 8, 1024, 4
    h, gamma = 0.1, 1e-4

    key = jax.random.PRNGKey(0)
    kx, kw, kb = jax.random.split(key, 3)
    x = jax.random.normal(kx, (width, N, dim3), dtype=jnp.float32)
    W = 0.3 * jax.random.normal(kw, (depth, width, width, dim3),
                                dtype=jnp.float32) / np.sqrt(width)
    b = 0.1 * jax.random.normal(kb, (depth, width, dim3), dtype=jnp.float32)

    # Orthonormal DCT-II matrix as the mode-3 transform M (standard choice in tnn).
    n = np.arange(dim3)
    Mnp = np.cos(np.pi * (n[None, :] + 0.5) * n[:, None] / dim3) * np.sqrt(2.0 / dim3)
    Mnp[0, :] /= np.sqrt(2.0)
    M = jnp.asarray(Mnp, dtype=jnp.float32)

    out = t_antisymmetric_resnet(x, W, b, M, h=h, gamma=gamma, use_tanh=True)
    out = jax.block_until_ready(out)

    ref = ref_forward(x, W, b, M, h=h, gamma=gamma, use_tanh=True)
    # Tolerance accounts for bf16 MXU operands (f32 accumulation, f32 residual state).
    np.testing.assert_allclose(np.asarray(out), np.asarray(ref), rtol=2e-2, atol=2e-2)

    print("KERNEL_OK")
</pallas_src>

<mosaic_0001>
module attributes {stable_mosaic.version = 11 : i64} {
  func.func @_t_antisym_resnet_kernel(%arg0: i32, %arg1: memref<128x512xf32, #tpu.memory_space<vmem>>, %arg2: memref<4x128x128xbf16, #tpu.memory_space<vmem>>, %arg3: memref<4x128x1xf32, #tpu.memory_space<vmem>>, %arg4: memref<128x512xf32, #tpu.memory_space<vmem>>, %arg5: memref<128x512xf32, #tpu.memory_space<vmem>>) attributes {dimension_semantics = [#tpu.dimension_semantics<parallel>], iteration_bounds = array<i64: 2>, scalar_prefetch = 0 : i64, scratch_operands = 1 : i64, tpu.core_type = #tpu.core_type<tc>, window_params = [{transform_indices = @transform_0, window_bounds = array<i64: 128, 512>}, {pipeline_mode = #tpu.pipeline_mode<synchronous>, transform_indices = @transform_1, window_bounds = array<i64: 4, 128, 128>}, {pipeline_mode = #tpu.pipeline_mode<synchronous>, transform_indices = @transform_2, window_bounds = array<i64: 4, 128, 1>}, {transform_indices = @transform_3, window_bounds = array<i64: 128, 512>}]} {
    %c0 = arith.constant 0 : index
    %c0_0 = arith.constant 0 : index
    %0 = vector.load %arg1[%c0, %c0_0] : memref<128x512xf32, #tpu.memory_space<vmem>>, vector<128x512xf32>
    %c0_1 = arith.constant 0 : index
    %c0_2 = arith.constant 0 : index
    %1 = vector.load %arg5[%c0_1, %c0_2] : memref<128x512xf32, #tpu.memory_space<vmem>>, vector<128x512xf32>
    tpu.vector_store %arg5[%c0_1, %c0_2], %0 {strides = array<i32>} : memref<128x512xf32, #tpu.memory_space<vmem>>, vector<128x512xf32>,
    %c0_i32 = arith.constant 0 : i32
    %c0_3 = arith.constant 0 : index
    %c0_4 = arith.constant 0 : index
    %2 = vector.load %arg5[%c0_3, %c0_4] : memref<128x512xf32, #tpu.memory_space<vmem>>, vector<128x512xf32>
    %3 = arith.index_cast %c0_i32 : i32 to index
    %c0_5 = arith.constant 0 : index
    %c0_6 = arith.constant 0 : index
    %4 = vector.load %arg2[%3, %c0_5, %c0_6] : memref<4x128x128xbf16, #tpu.memory_space<vmem>>, vector<1x128x128xbf16>
    %5 = vector.shape_cast %4 : vector<1x128x128xbf16> to vector<128x128xbf16>
    %6 = arith.truncf %2 : vector<128x512xf32> to vector<128x512xbf16>
    %cst = arith.constant dense<0.000000e+00> : vector<128x512xf32>
    %7 = tpu.matmul %5, %6, %cst {dimension_numbers = #tpu.dot_dimension_numbers<[1], [0], [0], [1], [0, 0, 1, 1], [], []>} : vector<128x128xbf16>, vector<128x512xbf16>, vector<128x512xf32> -> vector<128x512xf32>
    %8 = arith.index_cast %c0_i32 : i32 to index
    %c0_7 = arith.constant 0 : index
    %c0_8 = arith.constant 0 : index
    %9 = vector.load %arg3[%8, %c0_7, %c0_8] : memref<4x128x1xf32, #tpu.memory_space<vmem>>, vector<1x128x1xf32>
    %10 = vector.shape_cast %9 : vector<1x128x1xf32> to vector<128x1xf32>
    %11 = vector.broadcast %10 : vector<128x1xf32> to vector<128x512xf32>
    %12 = arith.addf %7, %11 : vector<128x512xf32>
    %13 = math.tanh %12 : vector<128x512xf32>
    %cst_9 = arith.constant 1.000000e-01 : f32
    %14 = vector.broadcast %cst_9 : f32 to vector<128x512xf32>
    %15 = arith.mulf %14, %13 : vector<128x512xf32>
    %16 = arith.addf %2, %15 : vector<128x512xf32>
    %c0_10 = arith.constant 0 : index
    %c0_11 = arith.constant 0 : index
    %17 = vector.load %arg5[%c0_10, %c0_11] : memref<128x512xf32, #tpu.memory_space<vmem>>, vector<128x512xf32>
    tpu.vector_store %arg5[%c0_10, %c0_11], %16 {strides = array<i32>} : memref<128x512xf32, #tpu.memory_space<vmem>>, vector<128x512xf32>,
    %c1_i32 = arith.constant 1 : i32
    %c0_12 = arith.constant 0 : index
    %c0_13 = arith.constant 0 : index
    %18 = vector.load %arg5[%c0_12, %c0_13] : memref<128x512xf32, #tpu.memory_space<vmem>>, vector<128x512xf32>
    %19 = arith.index_cast %c1_i32 : i32 to index
    %c0_14 = arith.constant 0 : index
    %c0_15 = arith.constant 0 : index
    %20 = vector.load %arg2[%19, %c0_14, %c0_15] : memref<4x128x128xbf16, #tpu.memory_space<vmem>>, vector<1x128x128xbf16>
    %21 = vector.shape_cast %20 : vector<1x128x128xbf16> to vector<128x128xbf16>
    %22 = arith.truncf %18 : vector<128x512xf32> to vector<128x512xbf16>
    %cst_16 = arith.constant dense<0.000000e+00> : vector<128x512xf32>
    %23 = tpu.matmul %21, %22, %cst_16 {dimension_numbers = #tpu.dot_dimension_numbers<[1], [0], [0], [1], [0, 0, 1, 1], [], []>} : vector<128x128xbf16>, vector<128x512xbf16>, vector<128x512xf32> -> vector<128x512xf32>
    %24 = arith.index_cast %c1_i32 : i32 to index
    %c0_17 = arith.constant 0 : index
    %c0_18 = arith.constant 0 : index
    %25 = vector.load %arg3[%24, %c0_17, %c0_18] : memref<4x128x1xf32, #tpu.memory_space<vmem>>, vector<1x128x1xf32>
    %26 = vector.shape_cast %25 : vector<1x128x1xf32> to vector<128x1xf32>
    %27 = vector.broadcast %26 : vector<128x1xf32> to vector<128x512xf32>
    %28 = arith.addf %23, %27 : vector<128x512xf32>
    %29 = math.tanh %28 : vector<128x512xf32>
    %cst_19 = arith.constant 1.000000e-01 : f32
    %30 = vector.broadcast %cst_19 : f32 to vector<128x512xf32>
    %31 = arith.mulf %30, %29 : vector<128x512xf32>
    %32 = arith.addf %18, %31 : vector<128x512xf32>
    %c0_20 = arith.constant 0 : index
    %c0_21 = arith.constant 0 : index
    %33 = vector.load %arg5[%c0_20, %c0_21] : memref<128x512xf32, #tpu.memory_space<vmem>>, vector<128x512xf32>
    tpu.vector_store %arg5[%c0_20, %c0_21], %32 {strides = array<i32>} : memref<128x512xf32, #tpu.memory_space<vmem>>, vector<128x512xf32>,
    %c2_i32 = arith.constant 2 : i32
    %c0_22 = arith.constant 0 : index
    %c0_23 = arith.constant 0 : index
    %34 = vector.load %arg5[%c0_22, %c0_23] : memref<128x512xf32, #tpu.memory_space<vmem>>, vector<128x512xf32>
    %35 = arith.index_cast %c2_i32 : i32 to index
    %c0_24 = arith.constant 0 : index
    %c0_25 = arith.constant 0 : index
    %36 = vector.load %arg2[%35, %c0_24, %c0_25] : memref<4x128x128xbf16, #tpu.memory_space<vmem>>, vector<1x128x128xbf16>
    %37 = vector.shape_cast %36 : vector<1x128x128xbf16> to vector<128x128xbf16>
    %38 = arith.truncf %34 : vector<128x512xf32> to vector<128x512xbf16>
    %cst_26 = arith.constant dense<0.000000e+00> : vector<128x512xf32>
    %39 = tpu.matmul %37, %38, %cst_26 {dimension_numbers = #tpu.dot_dimension_numbers<[1], [0], [0], [1], [0, 0, 1, 1], [], []>} : vector<128x128xbf16>, vector<128x512xbf16>, vector<128x512xf32> -> vector<128x512xf32>
    %40 = arith.index_cast %c2_i32 : i32 to index
    %c0_27 = arith.constant 0 : index
    %c0_28 = arith.constant 0 : index
    %41 = vector.load %arg3[%40, %c0_27, %c0_28] : memref<4x128x1xf32, #tpu.memory_space<vmem>>, vector<1x128x1xf32>
    %42 = vector.shape_cast %41 : vector<1x128x1xf32> to vector<128x1xf32>
    %43 = vector.broadcast %42 : vector<128x1xf32> to vector<128x512xf32>
    %44 = arith.addf %39, %43 : vector<128x512xf32>
    %45 = math.tanh %44 : vector<128x512xf32>
    %cst_29 = arith.constant 1.000000e-01 : f32
    %46 = vector.broadcast %cst_29 : f32 to vector<128x512xf32>
    %47 = arith.mulf %46, %45 : vector<128x512xf32>
    %48 = arith.addf %34, %47 : vector<128x512xf32>
    %c0_30 = arith.constant 0 : index
    %c0_31 = arith.constant 0 : index
    %49 = vector.load %arg5[%c0_30, %c0_31] : memref<128x512xf32, #tpu.memory_space<vmem>>, vector<128x512xf32>
    tpu.vector_store %arg5[%c0_30, %c0_31], %48 {strides = array<i32>} : memref<128x512xf32, #tpu.memory_space<vmem>>, vector<128x512xf32>,
    %c3_i32 = arith.constant 3 : i32
    %c0_32 = arith.constant 0 : index
    %c0_33 = arith.constant 0 : index
    %50 = vector.load %arg5[%c0_32, %c0_33] : memref<128x512xf32, #tpu.memory_space<vmem>>, vector<128x512xf32>
    %51 = arith.index_cast %c3_i32 : i32 to index
    %c0_34 = arith.constant 0 : index
    %c0_35 = arith.constant 0 : index
    %52 = vector.load %arg2[%51, %c0_34, %c0_35] : memref<4x128x128xbf16, #tpu.memory_space<vmem>>, vector<1x128x128xbf16>
    %53 = vector.shape_cast %52 : vector<1x128x128xbf16> to vector<128x128xbf16>
    %54 = arith.truncf %50 : vector<128x512xf32> to vector<128x512xbf16>
    %cst_36 = arith.constant dense<0.000000e+00> : vector<128x512xf32>
    %55 = tpu.matmul %53, %54, %cst_36 {dimension_numbers = #tpu.dot_dimension_numbers<[1], [0], [0], [1], [0, 0, 1, 1], [], []>} : vector<128x128xbf16>, vector<128x512xbf16>, vector<128x512xf32> -> vector<128x512xf32>
    %56 = arith.index_cast %c3_i32 : i32 to index
    %c0_37 = arith.constant 0 : index
    %c0_38 = arith.constant 0 : index
    %57 = vector.load %arg3[%56, %c0_37, %c0_38] : memref<4x128x1xf32, #tpu.memory_space<vmem>>, vector<1x128x1xf32>
    %58 = vector.shape_cast %57 : vector<1x128x1xf32> to vector<128x1xf32>
    %59 = vector.broadcast %58 : vector<128x1xf32> to vector<128x512xf32>
    %60 = arith.addf %55, %59 : vector<128x512xf32>
    %61 = math.tanh %60 : vector<128x512xf32>
    %cst_39 = arith.constant 1.000000e-01 : f32
    %62 = vector.broadcast %cst_39 : f32 to vector<128x512xf32>
    %63 = arith.mulf %62, %61 : vector<128x512xf32>
    %64 = arith.addf %50, %63 : vector<128x512xf32>
    %c0_40 = arith.constant 0 : index
    %c0_41 = arith.constant 0 : index
    %65 = vector.load %arg5[%c0_40, %c0_41] : memref<128x512xf32, #tpu.memory_space<vmem>>, vector<128x512xf32>
    tpu.vector_store %arg5[%c0_40, %c0_41], %64 {strides = array<i32>} : memref<128x512xf32, #tpu.memory_space<vmem>>, vector<128x512xf32>,
    %c4_i32 = arith.constant 4 : i32
    %c0_42 = arith.constant 0 : index
    %c0_43 = arith.constant 0 : index
    %66 = vector.load %arg5[%c0_42, %c0_43] : memref<128x512xf32, #tpu.memory_space<vmem>>, vector<128x512xf32>
    %c0_44 = arith.constant 0 : index
    %c0_45 = arith.constant 0 : index
    %67 = vector.load %arg4[%c0_44, %c0_45] : memref<128x512xf32, #tpu.memory_space<vmem>>, vector<128x512xf32>
    tpu.vector_store %arg4[%c0_44, %c0_45], %66 {strides = array<i32>} : memref<128x512xf32, #tpu.memory_space<vmem>>, vector<128x512xf32>,
    return
  }
  func.func @transform_0(%arg0: i32) -> (i32, i32) {
    %c0_i32 = arith.constant 0 : i32
    %c0_i32_0 = arith.constant 0 : i32
    return %c0_i32, %arg0 : i32, i32
  }
  func.func @transform_1(%arg0: i32) -> (i32, i32, i32) {
    %c0_i32 = arith.constant 0 : i32
    %c0_i32_0 = arith.constant 0 : i32
    %c0_i32_1 = arith.constant 0 : i32
    %c0_i32_2 = arith.constant 0 : i32
    return %c0_i32, %c0_i32_0, %c0_i32_1 : i32, i32, i32
  }
  func.func @transform_2(%arg0: i32) -> (i32, i32, i32) {
    %c0_i32 = arith.constant 0 : i32
    %c0_i32_0 = arith.constant 0 : i32
    %c0_i32_1 = arith.constant 0 : i32
    %c0_i32_2 = arith.constant 0 : i32
    return %c0_i32, %c0_i32_0, %c0_i32_1 : i32, i32, i32
  }
  func.func @transform_3(%arg0: i32) -> (i32, i32) {
    %c0_i32 = arith.constant 0 : i32
    %c0_i32_0 = arith.constant 0 : i32
    return %c0_i32, %arg0 : i32, i32
  }
}

</mosaic_0001>

<bundles_post_ra>
// kernel: tpu_custom_call.1
= control target key start
LH: loop header
LB: loop body
LE: loop exit
PB: predicated region body
PF: predicated region fallthrough
CT: control target
= control target key end

     0   :  { %8 = vsyncpa [#allocation4], 0  ;;  %s5970_s0 = inlined_call_operand.hbm [shape: f32[128,1024], index: 0, kind: input, shape index: {}]   ;;  %s5971_s1 = inlined_call_operand.vmem [shape: bf16[4,128,128], index: 1, kind: input, shape index: {}]   ;;  %s5972_s2 = inlined_call_operand.vmem [shape: f32[4,128,1], index: 2, kind: input, shape index: {}]   ;;  %s5973_s3 = inlined_call_operand.hbm [shape: f32[128,1024], index: 3, kind: output, shape index: {}]  }
   0x1   :  { %10 = vsyncpa [#allocation4 + $0x1], 0 }
   0x2   :  { %11 = vsyncpa [#allocation5], 0 }
   0x3   :  { %13 = vsyncpa [#allocation5 + $0x1], 0  ;;  %s4408_s12 = smov 0   ;;  %s4410_s13 = smov 0  }
   0x4   :  { %s4412_s14 = smov 0   ;;  %s4414_s15 = smov 0  }
   0x5 LB: > { %s4429_s16 = sadd.s32 4294967295, %s4377_s15   ;;  %s3493_s17 = sadd.s32 4294967294, %s4377_s15   ;;  %s4377_s15 = sphi %s4414_s15, %s6225_s15   ;;  %s4373_s14 = sphi %s4412_s14, %s6224_s14   ;;  %s4369_s13 = sphi %s4410_s13, %s6223_s13   ;;  %s4365_s12 = sphi %s4408_s12, %s6222_s12  }
   0x6   : > { %s4433_s18 = sadd.s32 1, %s4377_s15   ;;  %s26_s19 = sadd.s32 1, %s4373_s14 }
   0x7   : > { %s23_s20 = ssub.s32 %s4377_s15, %s4433_s18  ;;  %p33_p0 = scmp.ne.s32.totalorder %s4373_s14, %s4369_s13 }
   0x8   : > { %p24_p1 = scmp.eq.s32.totalorder %s23_s20, 0  ;;  %p34_p2 = scmp.eq.s32.totalorder %s4377_s15, 0 }
   0x9   : > { %p39_p3 = scmp.ne.s32.totalorder %s4369_s13, %s4365_s12  ;;  %p40_p4 = scmp.eq.s32.totalorder %s4429_s16, 0 }
   0xa   : > { %s4445_s21 = scalar_select %p24_p1, %s4373_s14, %s26_s19  }
   0xb   : > { %p4447_p5 = por %p34_p2, %p33_p0  ;;  %p4451_p6 = por %p40_p4, %p39_p3 }
   0xc   : > { %p105_p7 = scmp.eq.s32.totalorder %s4429_s16, 1  ;;  %p111_p8 = scmp.eq.s32.totalorder %s3493_s17, 1 }
   0xd   : > { %p3649_p10 = scmp.lt.s32.totalorder %s4377_s15, 2  ;;  %s137_s26 = sand.u32 1, %s4373_s14  }
   0xe   : > { %p4458_p11 = por %p105_p7, %p33_p0  ;;  %p4462_p12 = por %p111_p8, %p39_p3 }
   0xf   : > { %s3635_s27 = sshll.u32 %s4377_s15, 9  ;;  %s3496_s28 = sshll.u32 %s137_s26, 9 }
  0x10   : > { %s6058_s24 = scalar_select %p4458_p11, 1, 0 }
  0x11   : > { %s6059_s25 = scalar_select %p4462_p12, 1, 0 }
  0x12   : > { %s4471_s4 = scalar_lea.hbm %s5970_s0, %s3635_s27  ;;  %s141_s5 = scalar_lea.vmem [#allocation3], %s3496_s28 }
  0x13   : > { %s148_s6 = sshll.u32 %s141_s5, 4  ;;  %p4475_p13 = pnand %p3649_p10, %p4447_p5  ;;  %s4479_s6 = int_to_ptr.vmem [resolvable:$true] %s148_s6 }
  0x14   : > { %s4482_s8 = scalar_lea.sflag [#allocation4], %s137_s26  ;;  %s4281_s9 = scalar_lea.hbm %s4471_s4, 8192 }
  0x15   : > { %p4282_p1 = scmp.ne.s32.totalorder %s4471_s4, %s4281_s9  ;;  %p4283_p2 = pneg %p4475_p13 }
  0x16   : > { %s4286_s17 = scalar_lea.hbm %s5970_s0, 16384  ;;  %p4287_p5 = scmp.lt.u32.totalorder %s4471_s4, %s5970_s0 }
  0x17   : > { %p4284_p3 = pnand %p4283_p2, %p4282_p1  ;;  %p4288_p7 = scmp.lt.u32.totalorder %s4286_s17, %s4281_s9 }
  0x18   : > { %p4290_p10 = scmp.lt.u32.totalorder %s4281_s9, %s4471_s4 }
  0x19   : > { %p4285_p4 = pneg %p4284_p3  ;;  %p4289_p8 = por %p4288_p7, %p4287_p5 }
  0x1b   : > { %p4291_p9 = por %p4290_p10, %p4289_p8 }
  0x1d   : > { %p4292_p0 = pnand %p4291_p9, %p4285_p4 }
  0x1f   : > { %4295 = shalt.err (!%p4292_p0)
}
  0x20   : > { %s4296_s22 = scalar_lea.vmem %s4479_s6, 8192  ;;  %s4379_s26 = smov [#allocation3]  }
  0x21   : > { %p4297_p1 = scmp.ne.s32.totalorder %s4479_s6, %s4296_s22  ;;  %s4301_s27 = sshll.u32 %s4379_s26, 4  ;;  %s4302_s27 = int_to_ptr.vmem [resolvable:$false] %s4301_s27 }
  0x22   : > { %s4303_s28 = scalar_lea.vmem %s4302_s27, 16384  ;;  %p4304_p11 = scmp.lt.s32.totalorder %s4479_s6, %s4302_s27 }
  0x23   : > { %p4299_p3 = pnand %p4297_p1, %p4283_p2  ;;  %p4305_p5 = scmp.lt.s32.totalorder %s4303_s28, %s4296_s22 }
  0x25   : > { %p4300_p12 = pneg %p4299_p3  ;;  %p4306_p7 = por %p4305_p5, %p4304_p11 }
  0x27   : > { %p4307_p8 = pnand %p4306_p7, %p4300_p12 }
  0x29   : > { %4310 = shalt.err (!%p4307_p8)
}
  0x2a   : > { %s4380_s29 = smov 1024   ;;  %s4381_s30 = smov 512  }
  0x2b   : > { %s4382_s5 = smov 32   ;;  %p156_p9 = scmp.lt.s32.totalorder %s4377_s15, 3 }
  0x2c   : > { %3644 = dma.hbm_to_vmem [thread:$0]  (!%p4475_p13), %s4471_s4, 8192, %s4479_s6, %s4482_s8, %s4380_s29, %s4381_s30, %s4382_s5  }
  0x2d   : > { %p6061_p0 = scmp.ge.s32.totalorder %s4377_s15, 1 }
  0x2f   : > { %p157_p2 = pnand %p6061_p0, %p156_p9 }
  0x31   : > { %160 = sbr.rel (%p157_p2) target bundleno = 1330 (0x532), region = 32 }
  0x38   : > { %s4514_s9 = sand.u32 1, %s4369_s13  }
  0x39   : > { %s3500_s10 = sshll.u32 %s4514_s9, 9  ;;  %s163_s11 = scalar_lea.sflag [#allocation4], %s4514_s9 }
  0x3a   : > { %s4520_s17 = scalar_lea.vmem [#allocation3], %s3500_s10 }
  0x3b   : > { %4356 = dma.done.wait (%p4451_p6), %s163_s11, 8192  }
  0x3c   : > { %4358 = vsyncadd (%p4451_p6), %s163_s11, 4294959104  ;;  %v5975_v0 = vmov 0   ;;  %v432_v1 = vld [vmem:[%s5972_s2] sm:$0xff]  ;;  %v434_v2 = vld [vmem:[%s5972_s2 + $0x10] sm:$0xff]  ;;  %s5791_s27 = scalar_lea.vmem [#allocation6], %s3500_s10  ;;  %s3636_s10 = sshll.u32 %s4429_s16, 9 }
  0x3d   : > { %3690 = vset.pattern.permute.xlu0 %v5975_v0  ;;  %3691 = vset.pattern.permute.xlu1 %v5975_v0  ;;  %v4537_v3 = vld [vmem:[%s4520_s17 + $0x8] sm:$0xff]  ;;  %v4543_v5 = vld [vmem:[%s4520_s17 + $0x18] sm:$0xff]  ;;  %v4553_v9 = vld [vmem:[%s4520_s17] sm:$0xff]  ;;  %s3420_s28 = sshll.u32 %s5791_s27, 4  ;;  %s5918_s29 = scalar_lea.hbm %s5973_s3, %s3636_s10  ;;  %s5922_s28 = int_to_ptr.vmem [resolvable:$true] %s3420_s28 }
  0x3e   : > { %608 = vmatprep.mubr.bf16.mxu0 %v5975_v0  ;;  %721 = vmatprep.mubr.bf16.mxu1 %v5975_v0  ;;  %v4540_v4 = vld [vmem:[%s4520_s17 + $0x28] sm:$0xff]  ;;  %v4546_v6 = vld [vmem:[%s4520_s17 + $0x38] sm:$0xff]  ;;  %v4556_v10 = vld [vmem:[%s4520_s17 + $0x20] sm:$0xff]  ;;  %s3407_s30 = scalar_lea.sflag [#allocation5], %s4514_s9  ;;  %s4311_s5 = scalar_lea.vmem %s5922_s28, 8192 }
  0x3f   : > { %450 = vperm.xlu0 %3690, %v432_v1   ;;  %460 = vperm.xlu1 %3691, %v434_v2   ;;  %v401_v7 = vpack.c.bf16 %v4540_v4, %v4537_v3  ;;  %v403_v8 = vpack.c.bf16 %v4546_v6, %v4543_v5  ;;  %v4559_v11 = vld [vmem:[%s4520_s17 + $0x10] sm:$0xff]  ;;  %v400_v12 = vpack.c.bf16 %v4556_v10, %v4553_v9  ;;  %v433_v14 = vld [vmem:[%s5972_s2 + $0x8] sm:$0xff]  ;;  %v435_v15 = vld [vmem:[%s5972_s2 + $0x18] sm:$0xff]  ;;  %p4312_p6 = scmp.ne.s32.totalorder %s5922_s28, %s4311_s5  ;;  %p6219_p11 = scmp.ne.s32.totalorder %s6058_s24, 0 }
  0x40   : > { %v4564_v13 = vld [vmem:[%s4520_s17 + $0x30] sm:$0xff]  ;;  %v4575_v17 = vld [vmem:[%s4520_s17 + $0x48] sm:$0xff]  ;;  %v4581_v19 = vld [vmem:[%s4520_s17 + $0x58] sm:$0xff]  ;;  %s4384_s11 = smov [#allocation6]  }
  0x41   : > { %576 = vmatprep.subr.bf16.mxu0 %v401_v7  ;;  %689 = vmatprep.subr.bf16.mxu1 %v403_v8  ;;  %v402_v16 = vpack.c.bf16 %v4564_v13, %v4559_v11  ;;  %v4578_v18 = vld [vmem:[%s4520_s17 + $0x68] sm:$0xff]  ;;  %v4586_v21 = vld [vmem:[%s4520_s17 + $0x78] sm:$0xff]  ;;  %v4589_v22 = vld [vmem:[%s4520_s17 + $0x40] sm:$0xff]  ;;  %p4313_p12 = pnand %p4312_p6, %p6219_p11  ;;  %s4315_s4 = sshll.u32 %s4384_s11, 4  ;;  %s4316_s4 = int_to_ptr.vmem [resolvable:$false] %s4315_s4 }
  0x42   : > { %577 = vmatpush1.bf16.msra.mxu0 %v400_v12  ;;  %v405_v20 = vpack.c.bf16 %v4578_v18, %v4575_v17  ;;  %v4592_v23 = vld [vmem:[%s4520_s17 + $0x60] sm:$0xff]  ;;  %v407_v24 = vpack.c.bf16 %v4586_v21, %v4581_v19  ;;  %v4599_v26 = vld [vmem:[%s4520_s17 + $0x50] sm:$0xff]  ;;  %v437_v30 = vld [vmem:[%s5972_s2 + $0x28] sm:$0xff]  ;;  %s4317_s23 = scalar_lea.vmem %s4316_s4, 16384  ;;  %p4318_p4 = scmp.lt.s32.totalorder %s5922_s28, %s4316_s4 }
  0x43   : > { %455 = vperm.xlu0 %3690, %v433_v14   ;;  %690 = vmatpush1.bf16.msra.mxu1 %v402_v16  ;;  %v404_v25 = vpack.c.bf16 %v4592_v23, %v4589_v22  ;;  %v4602_v27 = vld [vmem:[%s4520_s17 + $0x70] sm:$0xff]  ;;  %v436_v28 = vld [vmem:[%s5972_s2 + $0x20] sm:$0xff]  ;;  %v4613_v31 = vld [vmem:[%s4520_s17 + $0x88] sm:$0xff]  ;;  %p4314_p13 = pneg %p4313_p12  ;;  %p4319_p10 = scmp.lt.s32.totalorder %s4317_s23, %s4311_s5 }
  0x44   : > { %465 = vperm.xlu1 %3691, %v435_v15   ;;  %578 = vmatprep.subr.bf16.mxu0 %v405_v20  ;;  %v406_v29 = vpack.c.bf16 %v4602_v27, %v4599_v26  ;;  %v213_v32 = vld [vmem:[%s4520_s17 + $0xa8] sm:$0xff]  ;;  %v211_v34 = vld [vmem:[%s4520_s17 + $0x98] sm:$0xff]  ;;  %v4620_v36 = vld [vmem:[%s4520_s17 + $0x80] sm:$0xff] }
  0x45   : > { %691 = vmatprep.subr.bf16.mxu1 %v407_v24  ;;  %v409_v33 = vpack.c.bf16 %v213_v32, %v4613_v31  ;;  %v215_v35 = vld [vmem:[%s4520_s17 + $0xb8] sm:$0xff]  ;;  %v212_v38 = vld [vmem:[%s4520_s17 + $0xa0] sm:$0xff]  ;;  %v4624_v39 = vld [vmem:[%s4520_s17 + $0x90] sm:$0xff]  ;;  %p4320_p1 = por %p4319_p10, %p4318_p4 }
  0x46   : > { %579 = vmatpush1.bf16.msra.mxu0 %v404_v25  ;;  %v411_v37 = vpack.c.bf16 %v215_v35, %v211_v34  ;;  %v214_v40 = vld [vmem:[%s4520_s17 + $0xb0] sm:$0xff]  ;;  %v408_v41 = vpack.c.bf16 %v212_v38, %v4620_v36  ;;  %v439_v44 = vld [vmem:[%s5972_s2 + $0x38] sm:$0xff]  ;;  %v217_v45 = vld [vmem:[%s4520_s17 + $0xc8] sm:$0xff] }
  0x47   : > { %470 = vperm.xlu0 %3690, %v436_v28   ;;  %692 = vmatpush1.bf16.msra.mxu1 %v406_v29  ;;  %v410_v42 = vpack.c.bf16 %v214_v40, %v4624_v39  ;;  %v438_v43 = vld [vmem:[%s5972_s2 + $0x30] sm:$0xff]  ;;  %v221_v46 = vld [vmem:[%s4520_s17 + $0xe8] sm:$0xff]  ;;  %v219_v47 = vld [vmem:[%s4520_s17 + $0xd8] sm:$0xff]  ;;  %p4321_p3 = pnand %p4320_p1, %p4314_p13 }
  0x48   : > { %475 = vperm.xlu1 %3691, %v437_v30   ;;  %580 = vmatprep.subr.bf16.mxu0 %v409_v33  ;;  %v223_v48 = vld [vmem:[%s4520_s17 + $0xf8] sm:$0xff]  ;;  %v413_v49 = vpack.c.bf16 %v221_v46, %v217_v45  ;;  %v216_v51 = vld [vmem:[%s4520_s17 + $0xc0] sm:$0xff]  ;;  %v218_v53 = vld [vmem:[%s4520_s17 + $0xd0] sm:$0xff] }
  0x49   : > { %693 = vmatprep.subr.bf16.mxu1 %v411_v37  ;;  %v415_v50 = vpack.c.bf16 %v223_v48, %v219_v47  ;;  %v220_v52 = vld [vmem:[%s4520_s17 + $0xe0] sm:$0xff]  ;;  %v222_v55 = vld [vmem:[%s4520_s17 + $0xf0] sm:$0xff]  ;;  %v441_v57 = vld [vmem:[%s5972_s2 + $0x48] sm:$0xff] }
  0x4a   : > { %581 = vmatpush1.bf16.msra.mxu0 %v408_v41  ;;  %v412_v54 = vpack.c.bf16 %v220_v52, %v216_v51  ;;  %v440_v56 = vld [vmem:[%s5972_s2 + $0x40] sm:$0xff]  ;;  %v414_v58 = vpack.c.bf16 %v222_v55, %v218_v53  ;;  %v225_v59 = vld [vmem:[%s4520_s17 + $0x108] sm:$0xff]  ;;  %v227_v61 = vld [vmem:[%s4520_s17 + $0x118] sm:$0xff] }
  0x4b   : > { %480 = vperm.xlu0 %3690, %v438_v43   ;;  %694 = vmatpush1.bf16.msra.mxu1 %v410_v42  ;;  %v229_v60 = vld [vmem:[%s4520_s17 + $0x128] sm:$0xff]  ;;  %v231_v63 = vld [vmem:[%s4520_s17 + $0x138] sm:$0xff]  ;;  %v224_v1 = vld [vmem:[%s4520_s17 + $0x100] sm:$0xff] }
  0x4c   : > { %485 = vperm.xlu1 %3691, %v439_v44   ;;  %582 = vmatprep.subr.bf16.mxu0 %v413_v49  ;;  %v417_v62 = vpack.c.bf16 %v229_v60, %v225_v59  ;;  %v228_v2 = vld [vmem:[%s4520_s17 + $0x120] sm:$0xff]  ;;  %v419_v7 = vpack.c.bf16 %v231_v63, %v227_v61  ;;  %v226_v8 = vld [vmem:[%s4520_s17 + $0x110] sm:$0xff]  ;;  %v443_v16 = vld [vmem:[%s5972_s2 + $0x58] sm:$0xff] }
  0x4d   : > { %695 = vmatprep.subr.bf16.mxu1 %v415_v50  ;;  %v230_v12 = vld [vmem:[%s4520_s17 + $0x130] sm:$0xff]  ;;  %v416_v15 = vpack.c.bf16 %v228_v2, %v224_v1  ;;  %v233_v20 = vld [vmem:[%s4520_s17 + $0x148] sm:$0xff]  ;;  %v235_v28 = vld [vmem:[%s4520_s17 + $0x158] sm:$0xff] }
  0x4e   : > { %v442_v14 = vld [vmem:[%s5972_s2 + $0x50] sm:$0xff]  ;;  %583 = vmatpush1.bf16.msra.mxu0 %v412_v54  ;;  %v237_v24 = vld [vmem:[%s4520_s17 + $0x168] sm:$0xff]  ;;  %v418_v25 = vpack.c.bf16 %v230_v12, %v226_v8  ;;  %v239_v29 = vld [vmem:[%s4520_s17 + $0x178] sm:$0xff] }
  0x4f   : > { %490 = vperm.xlu0 %3690, %v440_v56   ;;  %696 = vmatpush1.bf16.msra.mxu1 %v414_v58  ;;  %v232_v30 = vld [vmem:[%s4520_s17 + $0x140] sm:$0xff]  ;;  %v421_v32 = vpack.c.bf16 %v237_v24, %v233_v20  ;;  %v423_v33 = vpack.c.bf16 %v239_v29, %v235_v28  ;;  %v234_v35 = vld [vmem:[%s4520_s17 + $0x150] sm:$0xff]  ;;  %v241_v38 = vld [vmem:[%s4520_s17 + $0x188] sm:$0xff] }
  0x50   : > { %495 = vperm.xlu1 %3691, %v441_v57   ;;  %584 = vmatprep.subr.bf16.mxu0 %v417_v62  ;;  %v236_v34 = vld [vmem:[%s4520_s17 + $0x160] sm:$0xff]  ;;  %v238_v37 = vld [vmem:[%s4520_s17 + $0x170] sm:$0xff]  ;;  %v245_v41 = vld [vmem:[%s4520_s17 + $0x1a8] sm:$0xff] }
  0x51   : > { %697 = vmatprep.subr.bf16.mxu1 %v419_v7  ;;  %v420_v40 = vpack.c.bf16 %v236_v34, %v232_v30  ;;  %v243_v42 = vld [vmem:[%s4520_s17 + $0x198] sm:$0xff]  ;;  %v422_v44 = vpack.c.bf16 %v238_v37, %v234_v35  ;;  %v444_v45 = vld [vmem:[%s5972_s2 + $0x60] sm:$0xff]  ;;  %v445_v48 = vld [vmem:[%s5972_s2 + $0x68] sm:$0xff]  ;;  %v425_v49 = vpack.c.bf16 %v245_v41, %v241_v38 }
  0x52   : > { %585 = vmatpush1.bf16.msra.mxu0 %v416_v15  ;;  %v247_v43 = vld [vmem:[%s4520_s17 + $0x1b8] sm:$0xff]  ;;  %v240_v46 = vld [vmem:[%s4520_s17 + $0x180] sm:$0xff]  ;;  %v242_v51 = vld [vmem:[%s4520_s17 + $0x190] sm:$0xff] }
  0x53   : > { %500 = vperm.xlu0 %3690, %v442_v14   ;;  %698 = vmatpush1.bf16.msra.mxu1 %v418_v25  ;;  %v244_v47 = vld [vmem:[%s4520_s17 + $0x1a0] sm:$0xff]  ;;  %v427_v50 = vpack.c.bf16 %v247_v43, %v243_v42  ;;  %v246_v52 = vld [vmem:[%s4520_s17 + $0x1b0] sm:$0xff]  ;;  %v249_v53 = vld [vmem:[%s4520_s17 + $0x1c8] sm:$0xff] }
  0x54   : > { %505 = vperm.xlu1 %3691, %v443_v16   ;;  %586 = vmatprep.subr.bf16.mxu0 %v421_v32  ;;  %v253_v54 = vld [vmem:[%s4520_s17 + $0x1e8] sm:$0xff]  ;;  %v251_v55 = vld [vmem:[%s4520_s17 + $0x1d8] sm:$0xff]  ;;  %v424_v56 = vpack.c.bf16 %v244_v47, %v240_v46  ;;  %v446_v57 = vld [vmem:[%s5972_s2 + $0x70] sm:$0xff]  ;;  %v426_v60 = vpack.c.bf16 %v246_v52, %v242_v51 }
  0x55   : > { %699 = vmatprep.subr.bf16.mxu1 %v423_v33  ;;  %v447_v58 = vld [vmem:[%s5972_s2 + $0x78] sm:$0xff]  ;;  %v248_v61 = vld [vmem:[%s4520_s17 + $0x1c0] sm:$0xff]  ;;  %v250_v63 = vld [vmem:[%s4520_s17 + $0x1d0] sm:$0xff]  ;;  %v429_v1 = vpack.c.bf16 %v253_v54, %v249_v53 }
  0x56   : > { %587 = vmatpush1.bf16.msra.mxu0 %v420_v40  ;;  %v255_v59 = vld [vmem:[%s4520_s17 + $0x1f8] sm:$0xff]  ;;  %v252_v62 = vld [vmem:[%s4520_s17 + $0x1e0] sm:$0xff]  ;;  %v254_v7 = vld [vmem:[%s4520_s17 + $0x1f0] sm:$0xff] }
  0x57   : > { %510 = vperm.xlu0 %3690, %v444_v45   ;;  %700 = vmatpush1.bf16.msra.mxu1 %v422_v44  ;;  %v431_v2 = vpack.c.bf16 %v255_v59, %v251_v55  ;;  %v428_v8 = vpack.c.bf16 %v252_v62, %v248_v61  ;;  %v430_v12 = vpack.c.bf16 %v254_v7, %v250_v63  ;;  %v3526_v14 = vld [vmem:[%s5972_s2 + $0x80] sm:$0xff]  ;;  %v3527_v15 = vld [vmem:[%s5972_s2 + $0x88] sm:$0xff]  ;;  %v3528_v20 = vld [vmem:[%s5972_s2 + $0x90] sm:$0xff] }
  0x58   : > { %515 = vperm.xlu1 %3691, %v445_v48   ;;  %588 = vmatprep.subr.bf16.mxu0 %v425_v49  ;;  %v3692_v16 = vld [vmem:[%s5971_s1] sm:$0xff]   ;;  %v3529_v24 = vld [vmem:[%s5972_s2 + $0x98] sm:$0xff]  ;;  %v3531_v28 = vld [vmem:[%s5972_s2 + $0xa8] sm:$0xff] }
  0x59   : > { %701 = vmatprep.subr.bf16.mxu1 %v427_v50  ;;  %v3530_v25 = vld [vmem:[%s5972_s2 + $0xa0] sm:$0xff]  ;;  %v3693_v29 = vld [vmem:[%s5971_s1 + $0x8] sm:$0xff]   ;;  %v3532_v30 = vld [vmem:[%s5972_s2 + $0xb0] sm:$0xff] }
  0x5a   : > { %589 = vmatpush1.bf16.msra.mxu0 %v424_v56  ;;  %v3533_v32 = vld [vmem:[%s5972_s2 + $0xb8] sm:$0xff]  ;;  %v3534_v33 = vld [vmem:[%s5972_s2 + $0xc0] sm:$0xff]  ;;  %v3535_v34 = vld [vmem:[%s5972_s2 + $0xc8] sm:$0xff] }
  0x5b   : > { %520 = vperm.xlu0 %3690, %v446_v57   ;;  %702 = vmatpush1.bf16.msra.mxu1 %v426_v60  ;;  %v3694_v35 = vld [vmem:[%s5971_s1 + $0x10] sm:$0xff]   ;;  %v3537_v38 = vld [vmem:[%s5972_s2 + $0xd8] sm:$0xff]  ;;  %v3538_v40 = vld [vmem:[%s5972_s2 + $0xe0] sm:$0xff] }
  0x5c   : > { %525 = vperm.xlu1 %3691, %v447_v58   ;;  %590 = vmatprep.subr.bf16.mxu0 %v429_v1  ;;  %v3536_v37 = vld [vmem:[%s5972_s2 + $0xd0] sm:$0xff]  ;;  %v3539_v41 = vld [vmem:[%s5972_s2 + $0xe8] sm:$0xff]  ;;  %v3695_v42 = vld [vmem:[%s5971_s1 + $0x18] sm:$0xff]  }
  0x5d   : > { %703 = vmatprep.subr.bf16.mxu1 %v431_v2  ;;  %v3540_v43 = vld [vmem:[%s5972_s2 + $0xf0] sm:$0xff]  ;;  %v3541_v44 = vld [vmem:[%s5972_s2 + $0xf8] sm:$0xff]  ;;  %v3566_v45 = vld [vmem:[%s5972_s2 + $0x100] sm:$0xff] }
  0x5e   : > { %591 = vmatpush1.bf16.msra.mxu0 %v428_v8  ;;  %v3567_v46 = vld [vmem:[%s5972_s2 + $0x108] sm:$0xff]  ;;  %v3696_v47 = vld [vmem:[%s5971_s1 + $0x20] sm:$0xff]   ;;  %v3568_v48 = vld [vmem:[%s5972_s2 + $0x110] sm:$0xff] }
  0x5f   : > { %1190 = vperm.xlu0 %3690, %v3526_v14   ;;  %704 = vmatpush1.bf16.msra.mxu1 %v430_v12  ;;  %v3569_v49 = vld [vmem:[%s5972_s2 + $0x118] sm:$0xff]  ;;  %v3570_v50 = vld [vmem:[%s5972_s2 + $0x120] sm:$0xff]  ;;  %v3571_v51 = vld [vmem:[%s5972_s2 + $0x128] sm:$0xff] }
  0x60   : > { %1195 = vperm.xlu1 %3691, %v3527_v15   ;;  %v3697_v52 = vld [vmem:[%s5971_s1 + $0x28] sm:$0xff]   ;;  %v3572_v53 = vld [vmem:[%s5972_s2 + $0x130] sm:$0xff]  ;;  %v3573_v54 = vld [vmem:[%s5972_s2 + $0x138] sm:$0xff] }
  0x61   : > { %609 = vmatmul.mubr.bf16.vlgmr.msra.gmra.mrb[0].mxu0 %v3692_v16  ;;  %v3574_v55 = vld [vmem:[%s5972_s2 + $0x140] sm:$0xff]  ;;  %v3575_v56 = vld [vmem:[%s5972_s2 + $0x148] sm:$0xff]  ;;  %v3698_v57 = vld [vmem:[%s5971_s1 + $0x30] sm:$0xff]  }
  0x62   : > { %722 = vmatmul.mubr.bf16.vlgmr.msra.gmra.mrb[0].mxu1 %v3692_v16  ;;  %618 = vmatprep.mubr.bf16.mxu0 %v5975_v0  ;;  %v3576_v58 = vld [vmem:[%s5972_s2 + $0x150] sm:$0xff]  ;;  %v3577_v59 = vld [vmem:[%s5972_s2 + $0x158] sm:$0xff]  ;;  %v3578_v60 = vld [vmem:[%s5972_s2 + $0x160] sm:$0xff] }
  0x63   : > { %1200 = vperm.xlu0 %3690, %v3528_v20   ;;  %731 = vmatprep.mubr.bf16.mxu1 %v5975_v0  ;;  %v3579_v61 = vld [vmem:[%s5972_s2 + $0x168] sm:$0xff]  ;;  %v3699_v62 = vld [vmem:[%s5971_s1 + $0x38] sm:$0xff]   ;;  %v3580_v63 = vld [vmem:[%s5972_s2 + $0x170] sm:$0xff] }
  0x64   : > { %1205 = vperm.xlu1 %3691, %v3529_v24   ;;  %v3581_v1 = vld [vmem:[%s5972_s2 + $0x178] sm:$0xff]  ;;  %v3606_v2 = vld [vmem:[%s5972_s2 + $0x180] sm:$0xff]  ;;  %v3607_v7 = vld [vmem:[%s5972_s2 + $0x188] sm:$0xff] }
  0x65   : > { %v3608_v8 = vld [vmem:[%s5972_s2 + $0x190] sm:$0xff]  ;;  %v3609_v12 = vld [vmem:[%s5972_s2 + $0x198] sm:$0xff]  ;;  %v3610_v14 = vld [vmem:[%s5972_s2 + $0x1a0] sm:$0xff] }
  0x66   : > { %v3611_v15 = vld [vmem:[%s5972_s2 + $0x1a8] sm:$0xff]  ;;  %v3612_v16 = vld [vmem:[%s5972_s2 + $0x1b0] sm:$0xff]  ;;  %v3613_v20 = vld [vmem:[%s5972_s2 + $0x1b8] sm:$0xff] }
  0x67   : > { %1210 = vperm.xlu0 %3690, %v3530_v25   ;;  %v3614_v24 = vld [vmem:[%s5972_s2 + $0x1c0] sm:$0xff]  ;;  %v3615_v25 = vld [vmem:[%s5972_s2 + $0x1c8] sm:$0xff] }
  0x68   : > { %1215 = vperm.xlu1 %3691, %v3531_v28   ;;  %v3616_v28 = vld [vmem:[%s5972_s2 + $0x1d0] sm:$0xff] }
  0x69   : > { %619 = vmatmul.mubr.bf16.gmra.mrb[4].mxu0 %v3693_v29 }
  0x6a   : > { %732 = vmatmul.mubr.bf16.gmra.mrb[4].mxu1 %v3693_v29  ;;  %628 = vmatprep.mubr.bf16.mxu0 %v5975_v0  ;;  %v3617_v29 = vld [vmem:[%s5972_s2 + $0x1d8] sm:$0xff] }
  0x6b   : > { %1220 = vperm.xlu0 %3690, %v3532_v30   ;;  %741 = vmatprep.mubr.bf16.mxu1 %v5975_v0  ;;  %v3618_v30 = vld [vmem:[%s5972_s2 + $0x1e0] sm:$0xff] }
  0x6c   : > { %1225 = vperm.xlu1 %3691, %v3533_v32   ;;  %v3619_v32 = vld [vmem:[%s5972_s2 + $0x1e8] sm:$0xff] }
  0x6f   : > { %1230 = vperm.xlu0 %3690, %v3534_v33   ;;  %v3620_v33 = vld [vmem:[%s5972_s2 + $0x1f0] sm:$0xff] }
  0x70   : > { %1235 = vperm.xlu1 %3691, %v3535_v34   ;;  %v3621_v34 = vld [vmem:[%s5972_s2 + $0x1f8] sm:$0xff] }
  0x71   : > { %629 = vmatmul.mubr.bf16.gmra.mrb[8].mxu0 %v3694_v35 }
  0x72   : > { %742 = vmatmul.mubr.bf16.gmra.mrb[8].mxu1 %v3694_v35  ;;  %638 = vmatprep.mubr.bf16.mxu0 %v5975_v0 }
  0x73   : > { %1240 = vperm.xlu0 %3690, %v3536_v37   ;;  %751 = vmatprep.mubr.bf16.mxu1 %v5975_v0 }
  0x74   : > { %1245 = vperm.xlu1 %3691, %v3537_v38  }
  0x77   : > { %1250 = vperm.xlu0 %3690, %v3538_v40  }
  0x78   : > { %1255 = vperm.xlu1 %3691, %v3539_v41  }
  0x79   : > { %639 = vmatmul.mubr.bf16.gmra.mrb[12].mxu0 %v3695_v42 }
  0x7a   : > { %752 = vmatmul.mubr.bf16.gmra.mrb[12].mxu1 %v3695_v42  ;;  %648 = vmatprep.mubr.bf16.mxu0 %v5975_v0 }
  0x7b   : > { %1260 = vperm.xlu0 %3690, %v3540_v43   ;;  %761 = vmatprep.mubr.bf16.mxu1 %v5975_v0 }
  0x7c   : > { %1265 = vperm.xlu1 %3691, %v3541_v44  }
  0x7f   : > { %1930 = vperm.xlu0 %3690, %v3566_v45  }
  0x80   : > { %1935 = vperm.xlu1 %3691, %v3567_v46  }
  0x81   : > { %649 = vmatmul.mubr.bf16.gmra.mrb[16].mxu0 %v3696_v47 }
  0x82   : > { %762 = vmatmul.mubr.bf16.gmra.mrb[16].mxu1 %v3696_v47  ;;  %658 = vmatprep.mubr.bf16.mxu0 %v5975_v0 }
  0x83   : > { %1940 = vperm.xlu0 %3690, %v3568_v48   ;;  %771 = vmatprep.mubr.bf16.mxu1 %v5975_v0 }
  0x84   : > { %1945 = vperm.xlu1 %3691, %v3569_v49  }
  0x87   : > { %1950 = vperm.xlu0 %3690, %v3570_v50  }
  0x88   : > { %1955 = vperm.xlu1 %3691, %v3571_v51  }
  0x89   : > { %659 = vmatmul.mubr.bf16.gmra.mrb[20].mxu0 %v3697_v52 }
  0x8a   : > { %772 = vmatmul.mubr.bf16.gmra.mrb[20].mxu1 %v3697_v52  ;;  %668 = vmatprep.mubr.bf16.mxu0 %v5975_v0 }
  0x8b   : > { %1960 = vperm.xlu0 %3690, %v3572_v53   ;;  %781 = vmatprep.mubr.bf16.mxu1 %v5975_v0 }
  0x8c   : > { %1965 = vperm.xlu1 %3691, %v3573_v54  }
  0x8f   : > { %1970 = vperm.xlu0 %3690, %v3574_v55  }
  0x90   : > { %1975 = vperm.xlu1 %3691, %v3575_v56  }
  0x91   : > { %669 = vmatmul.mubr.bf16.gmra.mrb[24].mxu0 %v3698_v57 }
  0x92   : > { %782 = vmatmul.mubr.bf16.gmra.mrb[24].mxu1 %v3698_v57  ;;  %678 = vmatprep.mubr.bf16.mxu0 %v5975_v0 }
  0x93   : > { %1980 = vperm.xlu0 %3690, %v3576_v58   ;;  %791 = vmatprep.mubr.bf16.mxu1 %v5975_v0 }
  0x94   : > { %1985 = vperm.xlu1 %3691, %v3577_v59  }
  0x97   : > { %1990 = vperm.xlu0 %3690, %v3578_v60  }
  0x98   : > { %1995 = vperm.xlu1 %3691, %v3579_v61  }
  0x99   : > { %679 = vmatmul.mubr.bf16.gmra.mrb[28].mxu0 %v3699_v62 }
  0x9a   : > { %792 = vmatmul.mubr.bf16.gmra.mrb[28].mxu1 %v3699_v62  ;;  %1348 = vmatprep.mubr.bf16.mxu0 %v5975_v0 }
  0x9b   : > { %2000 = vperm.xlu0 %3690, %v3580_v63   ;;  %1461 = vmatprep.mubr.bf16.mxu1 %v5975_v0 }
  0x9c   : > { %2005 = vperm.xlu1 %3691, %v3581_v1  }
  0x9f   : > { %2670 = vperm.xlu0 %3690, %v3606_v2  }
  0xa0   : > { %2675 = vperm.xlu1 %3691, %v3607_v7  }
  0xa3   : > { %2680 = vperm.xlu0 %3690, %v3608_v8  }
  0xa4   : > { %2685 = vperm.xlu1 %3691, %v3609_v12  }
  0xa7   : > { %2690 = vperm.xlu0 %3690, %v3610_v14  }
  0xa8   : > { %2695 = vperm.xlu1 %3691, %v3611_v15  }
  0xab   : > { %2700 = vperm.xlu0 %3690, %v3612_v16  }
  0xac   : > { %2705 = vperm.xlu1 %3691, %v3613_v20  }
  0xaf   : > { %2710 = vperm.xlu0 %3690, %v3614_v24  }
  0xb0   : > { %2715 = vperm.xlu1 %3691, %v3615_v25  }
  0xb3   : > { %2720 = vperm.xlu0 %3690, %v3616_v28  }
  0xb4   : > { %2725 = vperm.xlu1 %3691, %v3617_v29  }
  0xb7   : > { %2730 = vperm.xlu0 %3690, %v3618_v30  }
  0xb8   : > { %2735 = vperm.xlu1 %3691, %v3619_v32  }
  0xbb   : > { %2740 = vperm.xlu0 %3690, %v3620_v33  }
  0xbc   : > { %2745 = vperm.xlu1 %3691, %v3621_v34  }
  0xbe   : > { %v451_v35 = vpop.permute.xlu0 %450  ;;  %v461_v37 = vpop.permute.xlu1 %460 }
  0xc2   : > { %v456_v43 = vpop.permute.xlu0 %455 }
  0xc3   : > { %v466_v56 = vpop.permute.xlu1 %465 }
  0xc6   : > { %v471_v30 = vpop.permute.xlu0 %470 }
 0x134   : > { %v610_v38 = vpop.f32.mrb[0].mxu0 }
 0x135   : > { %v611_v40 = vadd.f32 %v610_v38, %v451_v35  ;;  %v723_v41 = vpop.f32.mrb[0].mxu1  ;;  %v612_v42 = vpop.f32.mrb[1].mxu0 }
 0x136   : > { %v724_v44 = vadd.f32 %v723_v41, %v451_v35  ;;  %v613_v45 = vadd.f32 %v612_v42, %v451_v35  ;;  %v725_v46 = vpop.f32.mrb[1].mxu1  ;;  %v614_v48 = vpop.f32.mrb[2].mxu0 }
 0x137   : > { %3724 = vtanh.f32 %v611_v40  ;;  %v726_v47 = vadd.f32 %v725_v46, %v451_v35  ;;  %v727_v49 = vpop.f32.mrb[2].mxu1  ;;  %v615_v50 = vadd.f32 %v614_v48, %v456_v43  ;;  %v616_v52 = vpop.f32.mrb[3].mxu0 }
 0x138   : > { %3726 = vtanh.f32 %v724_v44  ;;  %v728_v51 = vadd.f32 %v727_v49, %v456_v43  ;;  %v617_v53 = vadd.f32 %v616_v52, %v456_v43  ;;  %v729_v54 = vpop.f32.mrb[3].mxu1 }
 0x139   : > { %3728 = vtanh.f32 %v613_v45  ;;  %v730_v55 = vadd.f32 %v729_v54, %v456_v43 }
 0x13a   : > { %3730 = vtanh.f32 %v726_v47 }
 0x13b   : > { %3732 = vtanh.f32 %v615_v50 }
 0x13c   : > { %3734 = vtanh.f32 %v728_v51  ;;  %v620_v57 = vpop.f32.mrb[4].mxu0 }
 0x13d   : > { %3736 = vtanh.f32 %v617_v53  ;;  %v621_v58 = vadd.f32 %v620_v57, %v461_v37  ;;  %v733_v59 = vpop.f32.mrb[4].mxu1  ;;  %v622_v60 = vpop.f32.mrb[5].mxu0 }
 0x13e   : > { %3738 = vtanh.f32 %v730_v55  ;;  %v734_v61 = vadd.f32 %v733_v59, %v461_v37  ;;  %v623_v62 = vadd.f32 %v622_v60, %v461_v37  ;;  %v735_v63 = vpop.f32.mrb[5].mxu1  ;;  %v624_v1 = vpop.f32.mrb[6].mxu0 }
 0x13f   : > { %3740 = vtanh.f32 %v621_v58  ;;  %v736_v2 = vadd.f32 %v735_v63, %v461_v37  ;;  %v625_v7 = vadd.f32 %v624_v1, %v466_v56  ;;  %v737_v8 = vpop.f32.mrb[6].mxu1  ;;  %v626_v12 = vpop.f32.mrb[7].mxu0 }
 0x140   : > { %3742 = vtanh.f32 %v734_v61  ;;  %v738_v14 = vadd.f32 %v737_v8, %v466_v56  ;;  %v739_v15 = vpop.f32.mrb[7].mxu1  ;;  %v627_v20 = vadd.f32 %v626_v12, %v466_v56  ;;  %v476_v55 = vpop.permute.xlu1 %475 }
 0x141   : > { %v3725_v16 = vpop.eup %3724  ;;  %3744 = vtanh.f32 %v623_v62  ;;  %v740_v25 = vadd.f32 %v739_v15, %v466_v56 }
 0x142   : > { %v3727_v24 = vpop.eup %3726  ;;  %3746 = vtanh.f32 %v736_v2  ;;  %v866_v35 = vmul.f32 0.1, %v3725_v16 }
 0x143   : > { %v3729_v28 = vpop.eup %3728  ;;  %3748 = vtanh.f32 %v625_v7  ;;  %v868_v43 = vmul.f32 0.1, %v3727_v24 }
 0x144   : > { %v3731_v29 = vpop.eup %3730  ;;  %v867_v32 = vmul.f32 0.1, %v3729_v28  ;;  %3750 = vtanh.f32 %v738_v14  ;;  %v630_v33 = vpop.f32.mrb[8].mxu0  ;;  %v4902_v28 = vadd.f32 %v866_v35, %v4553_v9 }
 0x145   : > { %v3733_v34 = vpop.eup %3732  ;;  %v869_v37 = vmul.f32 0.1, %v3731_v29  ;;  %3752 = vtanh.f32 %v627_v20  ;;  %v631_v38 = vadd.f32 %v630_v33, %v471_v30  ;;  %v743_v40 = vpop.f32.mrb[8].mxu1  ;;  %v4905_v29 = vadd.f32 %v868_v43, %v4559_v11 }
 0x146   : > { %v632_v41 = vpop.f32.mrb[9].mxu0  ;;  %v3735_v42 = vpop.eup %3734  ;;  %v870_v44 = vmul.f32 0.1, %v3733_v34  ;;  %3754 = vtanh.f32 %v740_v25  ;;  %v744_v45 = vadd.f32 %v743_v40, %v471_v30  ;;  %v4884_v49 = vadd.f32 %v867_v32, %v4537_v3 }
 0x147   : > { %v745_v46 = vpop.f32.mrb[9].mxu1  ;;  %v634_v47 = vpop.f32.mrb[10].mxu0  ;;  %v4887_v50 = vadd.f32 %v869_v37, %v4543_v5  ;;  %3756 = vtanh.f32 %v631_v38  ;;  %v633_v51 = vadd.f32 %v632_v41, %v471_v30  ;;  %v872_v56 = vmul.f32 0.1, %v3735_v42 }
 0x148   : > { %v3737_v48 = vpop.eup %3736  ;;  %v747_v52 = vpop.f32.mrb[10].mxu1  ;;  %3758 = vtanh.f32 %v744_v45  ;;  %v746_v58 = vadd.f32 %v745_v46, %v471_v30  ;;  %v4890_v61 = vadd.f32 %v870_v44, %v4556_v10  ;;  %v635_v62 = vadd.f32 %v634_v47, %v476_v55 }
 0x149   : > { %v636_v53 = vpop.f32.mrb[11].mxu0  ;;  %v3739_v54 = vpop.eup %3738  ;;  %v871_v57 = vmul.f32 0.1, %v3737_v48  ;;  %3760 = vtanh.f32 %v633_v51  ;;  %v748_v2 = vadd.f32 %v747_v52, %v476_v55  ;;  %v4899_v16 = vadd.f32 %v872_v56, %v4564_v13 }
 0x14a   : > { %v749_v59 = vpop.f32.mrb[11].mxu1  ;;  %v3741_v60 = vpop.eup %3740  ;;  %v873_v3 = vmul.f32 0.1, %v3739_v54  ;;  %3762 = vtanh.f32 %v746_v58  ;;  %v637_v14 = vadd.f32 %v636_v53, %v476_v55  ;;  %v1139_v47 = vpack.c.bf16 %v4890_v61, %v4902_v28 }
 0x14b   : > { %v3743_v5 = vpop.eup %3742  ;;  %v4893_v63 = vadd.f32 %v871_v57, %v4540_v4  ;;  %v874_v1 = vmul.f32 0.1, %v3741_v60  ;;  %3764 = vtanh.f32 %v635_v62  ;;  %v481_v10 = vpop.permute.xlu0 %480  ;;  %v750_v24 = vadd.f32 %v749_v59, %v476_v55 }
 0x14c   : > { %v3745_v7 = vpop.eup %3744  ;;  %v4896_v8 = vadd.f32 %v873_v3, %v4546_v6  ;;  %v876_v12 = vmul.f32 0.1, %v3743_v5  ;;  %3766 = vtanh.f32 %v748_v2  ;;  %v640_v4 = vpop.f32.mrb[12].mxu0  ;;  %v1141_v48 = vpack.c.bf16 %v4899_v16, %v4905_v29 }
 0x14d   : > { %v3747_v15 = vpop.eup %3746  ;;  %v875_v20 = vmul.f32 0.1, %v3745_v7  ;;  %3768 = vtanh.f32 %v637_v14  ;;  %v1140_v6 = vpack.c.bf16 %v4893_v63, %v4884_v49  ;;  %v753_v30 = vpop.f32.mrb[12].mxu1  ;;  %v4910_v13 = vadd.f32 %v874_v1, %v4589_v22 }
 0x14e   : > { %v3749_v25 = vpop.eup %3748  ;;  %v642_v32 = vpop.f32.mrb[13].mxu0  ;;  %v877_v34 = vmul.f32 0.1, %v3747_v15  ;;  %3770 = vtanh.f32 %v750_v24  ;;  %v1142_v37 = vpack.c.bf16 %v4896_v8, %v4887_v50  ;;  %v4915_v11 = vadd.f32 %v876_v12, %v4599_v26 }
 0x14f   : > { %v3751_v33 = vpop.eup %3750  ;;  %v755_v9 = vpop.f32.mrb[13].mxu1  ;;  %v4918_v40 = vadd.f32 %v875_v20, %v4575_v17  ;;  %1316 = vmatprep.subr.bf16.mxu0 %v1140_v6  ;;  %v641_v41 = vadd.f32 %v640_v4, %v481_v10  ;;  %v754_v42 = vadd.f32 %v753_v30, %v481_v10  ;;  %v878_v45 = vmul.f32 0.1, %v3749_v25 }
 0x150   : > { %v644_v35 = vpop.f32.mrb[14].mxu0  ;;  %v3753_v38 = vpop.eup %3752  ;;  %1429 = vmatprep.subr.bf16.mxu1 %v1142_v37  ;;  %v880_v52 = vmul.f32 0.1, %v3751_v33  ;;  %v643_v53 = vadd.f32 %v642_v32, %v481_v10  ;;  %v4925_v56 = vadd.f32 %v877_v34, %v4581_v19  ;;  %1317 = vmatpush1.bf16.msra.mxu0 %v1139_v47  ;;  %v756_v58 = vadd.f32 %v755_v9, %v481_v10 }
 0x151   : > { %v757_v43 = vpop.f32.mrb[14].mxu1  ;;  %v646_v22 = vpop.f32.mrb[15].mxu0  ;;  %v879_v46 = vmul.f32 0.1, %v3753_v38  ;;  %3772 = vtanh.f32 %v641_v41  ;;  %1430 = vmatpush1.bf16.msra.mxu1 %v1141_v48  ;;  %v4934_v15 = vadd.f32 %v878_v45, %v4592_v23  ;;  %v4236_v45 = vld [vmem:[%s4520_s17 + $0xa8] sm:$0xff] }
 0x152   : > { %v3755_v44 = vpop.eup %3754  ;;  %v759_v26 = vpop.f32.mrb[15].mxu1  ;;  %3774 = vtanh.f32 %v754_v42  ;;  %v4937_v10 = vadd.f32 %v880_v52, %v4602_v27  ;;  %v4237_v52 = vld [vmem:[%s4520_s17 + $0xb8] sm:$0xff] }
 0x153   : > { %v3757_v51 = vpop.eup %3756  ;;  %v881_v17 = vmul.f32 0.1, %v3755_v44  ;;  %v486_v55 = vpop.permute.xlu1 %485  ;;  %v4928_v60 = vadd.f32 %v879_v46, %v4578_v18  ;;  %3776 = vtanh.f32 %v643_v53  ;;  %v1143_v47 = vpack.c.bf16 %v4934_v15, %v4910_v13 }
 0x154   : > { %v3759_v54 = vpop.eup %3758  ;;  %v882_v57 = vmul.f32 0.1, %v3757_v51  ;;  %v645_v62 = vadd.f32 %v644_v35, %v486_v55  ;;  %v491_v1 = vpop.permute.xlu0 %490  ;;  %3778 = vtanh.f32 %v756_v58  ;;  %v758_v19 = vadd.f32 %v757_v43, %v486_v55  ;;  %v4238_v58 = vld [vmem:[%s4520_s17 + $0x98] sm:$0xff] }
 0x155   : > { %v3761_v59 = vpop.eup %3760  ;;  %v884_v3 = vmul.f32 0.1, %v3759_v54  ;;  %v4931_v2 = vadd.f32 %v881_v17, %v4586_v21  ;;  %v650_v12 = vpop.f32.mrb[16].mxu0  ;;  %v647_v18 = vadd.f32 %v646_v22, %v486_v55  ;;  %v760_v6 = vadd.f32 %v759_v26, %v486_v55 }
 0x156   : > { %v3763_v5 = vpop.eup %3762  ;;  %v883_v7 = vmul.f32 0.1, %v3761_v59  ;;  %3780 = vtanh.f32 %v645_v62  ;;  %v763_v20 = vpop.f32.mrb[16].mxu1  ;;  %v4940_v25 = vadd.f32 %v882_v57, %v4620_v36  ;;  %v1144_v34 = vpack.c.bf16 %v4928_v60, %v4918_v40 }
 0x157   : > { %v3765_v14 = vpop.eup %3764  ;;  %v652_v24 = vpop.f32.mrb[17].mxu0  ;;  %v4943_v21 = vadd.f32 %v884_v3, %v4624_v39  ;;  %3782 = vtanh.f32 %v758_v19  ;;  %v885_v27 = vmul.f32 0.1, %v3763_v5  ;;  %v1146_v38 = vpack.c.bf16 %v4931_v2, %v4925_v56  ;;  %v4239_v3 = vld [vmem:[%s4520_s17 + $0xa0] sm:$0xff] }
 0x158   : > { %v3767_v4 = vpop.eup %3766  ;;  %v765_v30 = vpop.f32.mrb[17].mxu1  ;;  %v4946_v33 = vadd.f32 %v883_v7, %v4613_v31  ;;  %3784 = vtanh.f32 %v647_v18  ;;  %v886_v35 = vmul.f32 0.1, %v3765_v14  ;;  %1318 = vmatprep.subr.bf16.mxu0 %v1144_v34  ;;  %v651_v43 = vadd.f32 %v650_v12, %v491_v1  ;;  %v4240_v12 = vld [vmem:[%s4520_s17 + $0xb0] sm:$0xff] }
 0x159   : > { %v654_v32 = vpop.f32.mrb[18].mxu0  ;;  %v3769_v23 = vpop.eup %3768  ;;  %3786 = vtanh.f32 %v760_v6  ;;  %v888_v42 = vmul.f32 0.1, %v3767_v4  ;;  %v764_v22 = vadd.f32 %v763_v20, %v491_v1  ;;  %1431 = vmatprep.subr.bf16.mxu1 %v1146_v38  ;;  %v1145_v48 = vpack.c.bf16 %v4937_v10, %v4915_v11  ;;  %1319 = vmatpush1.bf16.msra.mxu0 %v1143_v47  ;;  %v4242_v47 = vld [vmem:[%s4520_s17 + $0xd8] sm:$0xff] }
 0x15a   : > { %v767_v37 = vpop.f32.mrb[18].mxu1  ;;  %v656_v36 = vpop.f32.mrb[19].mxu0  ;;  %v887_v39 = vmul.f32 0.1, %v3769_v23  ;;  %v653_v26 = vadd.f32 %v652_v24, %v491_v1  ;;  %3788 = vtanh.f32 %v651_v43  ;;  %v766_v53 = vadd.f32 %v765_v30, %v491_v1 }
 0x15b   : > { %v3771_v9 = vpop.eup %3770  ;;  %v769_v41 = vpop.f32.mrb[19].mxu1  ;;  %v4965_v59 = vadd.f32 %v4238_v58, %v885_v27  ;;  %v4968_v62 = vadd.f32 %v4239_v3, %v886_v35  ;;  %3790 = vtanh.f32 %v764_v22  ;;  %1432 = vmatpush1.bf16.msra.mxu1 %v1145_v48  ;;  %v4971_v14 = vadd.f32 %v4240_v12, %v888_v42  ;;  %v4243_v58 = vld [vmem:[%s4520_s17 + $0xe0] sm:$0xff]  ;;  %v4244_v12 = vld [vmem:[%s4520_s17 + $0xe8] sm:$0xff] }
 0x15c   : > { %v889_v31 = vmul.f32 0.1, %v3771_v9  ;;  %v496_v44 = vpop.permute.xlu1 %495  ;;  %v4953_v46 = vadd.f32 %v4236_v45, %v887_v39  ;;  %v3773_v51 = vpop.eup %3772  ;;  %3792 = vtanh.f32 %v653_v26 }
 0x15d   : > { %v655_v54 = vadd.f32 %v654_v32, %v496_v44  ;;  %v3775_v55 = vpop.eup %3774  ;;  %v4962_v57 = vpop.permute.xlu0 %500  ;;  %v768_v5 = vadd.f32 %v767_v37, %v496_v44  ;;  %v657_v1 = vadd.f32 %v656_v36, %v496_v44  ;;  %3794 = vtanh.f32 %v766_v53 }
 0x15e   : > { %v4960_v17 = vadd.f32 %v4237_v52, %v889_v31  ;;  %v660_v7 = vpop.f32.mrb[20].mxu0  ;;  %v3777_v19 = vpop.eup %3776  ;;  %v1148_v18 = vpack.c.bf16 %v4953_v46, %v4946_v33  ;;  %v770_v30 = vadd.f32 %v769_v41, %v496_v44  ;;  %v890_v37 = vmul.f32 0.1, %v3773_v51  ;;  %v4241_v44 = vld [vmem:[%s4520_s17 + $0xc8] sm:$0xff] }
 0x15f   : > { %v773_v20 = vpop.f32.mrb[20].mxu1  ;;  %v662_v24 = vpop.f32.mrb[21].mxu0  ;;  %v891_v6 = vmul.f32 0.1, %v3777_v19  ;;  %3796 = vtanh.f32 %v655_v54  ;;  %v661_v36 = vadd.f32 %v660_v7, %v4962_v57  ;;  %v892_v42 = vmul.f32 0.1, %v3775_v55 }
 0x160   : > { %v3779_v4 = vpop.eup %3778  ;;  %v1150_v32 = vpack.c.bf16 %v4960_v17, %v4965_v59  ;;  %v775_v23 = vpop.f32.mrb[21].mxu1  ;;  %1320 = vmatprep.subr.bf16.mxu0 %v1148_v18  ;;  %3798 = vtanh.f32 %v768_v5  ;;  %v774_v41 = vadd.f32 %v773_v20, %v4962_v57  ;;  %v1147_v26 = vpack.c.bf16 %v4968_v62, %v4940_v25 }
 0x161   : > { %v664_v27 = vpop.f32.mrb[22].mxu0  ;;  %v3781_v34 = vpop.eup %3780  ;;  %v893_v9 = vmul.f32 0.1, %v3779_v4  ;;  %v4980_v45 = vadd.f32 %v4241_v44, %v891_v6  ;;  %3800 = vtanh.f32 %v657_v1  ;;  %v1149_v54 = vpack.c.bf16 %v4971_v14, %v4943_v21 }
 0x162   : > { %v777_v35 = vpop.f32.mrb[22].mxu1  ;;  %v666_v39 = vpop.f32.mrb[23].mxu0  ;;  %v894_v31 = vmul.f32 0.1, %v3781_v34  ;;  %1433 = vmatprep.subr.bf16.mxu1 %v1150_v32  ;;  %3802 = vtanh.f32 %v770_v30  ;;  %1321 = vmatpush1.bf16.msra.mxu0 %v1147_v26  ;;  %v663_v7 = vadd.f32 %v662_v24, %v4962_v57  ;;  %v776_v18 = vadd.f32 %v775_v23, %v4962_v57  ;;  %v4245_v30 = vld [vmem:[%s4520_s17 + $0xf8] sm:$0xff] }
 0x163   : > { %v3783_v38 = vpop.eup %3782  ;;  %v779_v43 = vpop.f32.mrb[23].mxu1  ;;  %v4983_v48 = vadd.f32 %v4242_v47, %v893_v9  ;;  %3804 = vtanh.f32 %v661_v36  ;;  %1434 = vmatpush1.bf16.msra.mxu1 %v1149_v54  ;;  %v4247_v47 = vld [vmem:[%s4520_s17 + $0xc0] sm:$0xff]  ;;  %v4248_v54 = vld [vmem:[%s4520_s17 + $0xd0] sm:$0xff] }
 0x164   : > { %v3785_v22 = vpop.eup %3784  ;;  %v896_v52 = vmul.f32 0.1, %v3783_v38  ;;  %v506_v55 = vpop.permute.xlu1 %505  ;;  %v4990_v3 = vadd.f32 %v4243_v58, %v894_v31  ;;  %3806 = vtanh.f32 %v774_v41  ;;  %v4246_v31 = vld [vmem:[%s4520_s17 + $0xf0] sm:$0xff]  ;;  %v5006_v26 = vadd.f32 %v4247_v47, %v890_v37 }
 0x165   : > { %v3787_v51 = vpop.eup %3786  ;;  %v895_v53 = vmul.f32 0.1, %v3785_v22  ;;  %v511_v19 = vpop.permute.xlu0 %510  ;;  %v665_v20 = vadd.f32 %v664_v27, %v506_v55  ;;  %3808 = vtanh.f32 %v663_v7  ;;  %v778_v34 = vadd.f32 %v777_v35, %v506_v55 }
 0x166   : > { %v897_v5 = vmul.f32 0.1, %v3787_v51  ;;  %v670_v4 = vpop.f32.mrb[24].mxu0  ;;  %v3789_v6 = vpop.eup %3788  ;;  %v667_v9 = vadd.f32 %v666_v39, %v506_v55  ;;  %v5001_v22 = vadd.f32 %v4246_v31, %v896_v52  ;;  %3810 = vtanh.f32 %v776_v18  ;;  %6064 = vst [vmem:[#allocation11_spill] sm:$0xff] %v5006_v26 }
 0x167   : > { %v4994_v1 = vadd.f32 %v4244_v12, %v895_v53  ;;  %v783_v24 = vpop.f32.mrb[24].mxu1  ;;  %v672_v36 = vpop.f32.mrb[25].mxu0  ;;  %v780_v41 = vadd.f32 %v779_v43, %v506_v55  ;;  %3812 = vtanh.f32 %v665_v20  ;;  %v671_v39 = vadd.f32 %v670_v4, %v511_v19 }
 0x168   : > { %v4998_v32 = vadd.f32 %v4245_v30, %v897_v5  ;;  %v3791_v38 = vpop.eup %3790  ;;  %6063 = vst [vmem:[#allocation10_spill] sm:$0xff] %v5001_v22  ;;  %v785_v23 = vpop.f32.mrb[25].mxu1  ;;  %v5011_v58 = vadd.f32 %v4248_v54, %v892_v42  ;;  %3814 = vtanh.f32 %v778_v34  ;;  %v784_v43 = vadd.f32 %v783_v24, %v511_v19 }
 0x169   : > { %v1152_v57 = vpack.c.bf16 %v4994_v1, %v4980_v45  ;;  %v674_v27 = vpop.f32.mrb[26].mxu0  ;;  %v3793_v44 = vpop.eup %3792  ;;  %3816 = vtanh.f32 %v667_v9  ;;  %v1151_v37 = vpack.c.bf16 %v4990_v3, %v5006_v26  ;;  %v898_v18 = vmul.f32 0.1, %v3789_v6 }
 0x16a   : > { %6062 = vst [vmem:[#allocation9_spill] sm:$0xff] %v4998_v32  ;;  %v1154_v35 = vpack.c.bf16 %v4998_v32, %v4983_v48  ;;  %v787_v51 = vpop.f32.mrb[26].mxu1  ;;  %v676_v53 = vpop.f32.mrb[27].mxu0  ;;  %6065 = vst [vmem:[#allocation12_spill] sm:$0xff] %v5011_v58  ;;  %v899_v7 = vmul.f32 0.1, %v3793_v44  ;;  %3818 = vtanh.f32 %v780_v41  ;;  %v1153_v4 = vpack.c.bf16 %v5001_v22, %v5011_v58 }
 0x16b   : > { %v3795_v52 = vpop.eup %3794  ;;  %1322 = vmatprep.subr.bf16.mxu0 %v1152_v57  ;;  %v789_v55 = vpop.f32.mrb[27].mxu1  ;;  %v900_v30 = vmul.f32 0.1, %v3791_v38  ;;  %3820 = vtanh.f32 %v671_v39  ;;  %v673_v24 = vadd.f32 %v672_v36, %v511_v19  ;;  %v786_v6 = vadd.f32 %v785_v23, %v511_v19 }
 0x16c   : > { %v3797_v5 = vpop.eup %3796  ;;  %1435 = vmatprep.subr.bf16.mxu1 %v1154_v35  ;;  %v901_v20 = vmul.f32 0.1, %v3795_v52  ;;  %1323 = vmatpush1.bf16.msra.mxu0 %v1151_v37  ;;  %v516_v9 = vpop.permute.xlu1 %515  ;;  %3822 = vtanh.f32 %v784_v43  ;;  %v4249_v35 = vld [vmem:[%s4520_s17 + $0x108] sm:$0xff]  ;;  %v4250_v37 = vld [vmem:[%s4520_s17 + $0x118] sm:$0xff] }
 0x16d   : > { %v3799_v12 = vpop.eup %3798  ;;  %v902_v34 = vmul.f32 0.1, %v3797_v5  ;;  %1436 = vmatpush1.bf16.msra.mxu1 %v1153_v4  ;;  %v680_v41 = vpop.f32.mrb[28].mxu0  ;;  %v5018_v52 = vadd.f32 %v4249_v35, %v899_v7  ;;  %3824 = vtanh.f32 %v673_v24  ;;  %v675_v39 = vadd.f32 %v674_v27, %v516_v9 }
 0x16e   : > { %v3801_v42 = vpop.eup %3800  ;;  %v904_v57 = vmul.f32 0.1, %v3799_v12  ;;  %v793_v54 = vpop.f32.mrb[28].mxu1  ;;  %v5021_v0 = vadd.f32 %v4250_v37, %v901_v20  ;;  %v4251_v12 = vld [vmem:[%s4520_s17 + $0x128] sm:$0xff]  ;;  %3826 = vtanh.f32 %v786_v6  ;;  %v788_v19 = vadd.f32 %v787_v51, %v516_v9  ;;  %v4253_v37 = vld [vmem:[%s4520_s17 + $0x120] sm:$0xff]  ;;  %v4254_v51 = vld [vmem:[%s4520_s17 + $0x130] sm:$0xff] }
 0x16f   : > { %v3803_v31 = vpop.eup %3802  ;;  %v903_v44 = vmul.f32 0.1, %v3801_v42  ;;  %v682_v36 = vpop.f32.mrb[29].mxu0  ;;  %v4252_v42 = vld [vmem:[%s4520_s17 + $0x138] sm:$0xff]  ;;  %3828 = vtanh.f32 %v675_v39  ;;  %v677_v20 = vadd.f32 %v676_v53, %v516_v9  ;;  %v5036_v6 = vadd.f32 %v4253_v37, %v902_v34  ;;  %v4256_v53 = vld [vmem:[%s4520_s17 + $0x110] sm:$0xff] }
 0x170   : > { %v3805_v47 = vpop.eup %3804  ;;  %v905_v38 = vmul.f32 0.1, %v3803_v31  ;;  %v795_v23 = vpop.f32.mrb[29].mxu1  ;;  %3830 = vtanh.f32 %v788_v19  ;;  %v790_v58 = vadd.f32 %v789_v55, %v516_v9  ;;  %v5047_v26 = vadd.f32 %v4256_v53, %v900_v30  ;;  %v4257_v19 = vld [vmem:[%s4520_s17 + $0x140] sm:$0xff] }
 0x171   : > { %v3807_v5 = vpop.eup %3806  ;;  %v5024_v43 = vadd.f32 %v4251_v12, %v903_v44  ;;  %v5026_v7 = vpop.f32.mrb[30].mxu0  ;;  %v906_v24 = vmul.f32 0.1, %v3805_v47  ;;  %6067 = vst [vmem:[#allocation14_spill] sm:$0xff] %v5036_v6  ;;  %v5039_v12 = vadd.f32 %v4254_v51, %v904_v57  ;;  %3832 = vtanh.f32 %v677_v20 }
 0x172   : > { %v3809_v4 = vpop.eup %3808  ;;  %v5029_v27 = vadd.f32 %v4252_v42, %v905_v38  ;;  %v5031_v31 = vpop.f32.mrb[30].mxu1  ;;  %v4255_v42 = vld [vmem:[%s4520_s17 + $0x100] sm:$0xff]  ;;  %6070 = vst [vmem:[#allocation17_spill] sm:$0xff] %v5047_v26  ;;  %v908_v57 = vmul.f32 0.1, %v3807_v5  ;;  %3834 = vtanh.f32 %v790_v58 }
 0x173   : > { %6066 = vst [vmem:[#allocation13_spill] sm:$0xff] %v5024_v43  ;;  %v5033_v35 = vpop.f32.mrb[31].mxu0  ;;  %v3811_v44 = vpop.eup %3810  ;;  %6068 = vst [vmem:[#allocation15_spill] sm:$0xff] %v5039_v12  ;;  %v5044_v39 = vadd.f32 %v4255_v42, %v898_v18  ;;  %v1156_v34 = vpack.c.bf16 %v5024_v43, %v5018_v52  ;;  %v907_v51 = vmul.f32 0.1, %v3809_v4  ;;  %v5054_v32 = vadd.f32 %v4257_v19, %v906_v24 }
 0x174   : > { %v5041_v38 = vpop.f32.mrb[31].mxu1  ;;  %v3813_v47 = vpop.eup %3812  ;;  %v1158_v55 = vpack.c.bf16 %v5029_v27, %v5021_v0  ;;  %v909_v18 = vmul.f32 0.1, %v3811_v44  ;;  %v1157_v5 = vpack.c.bf16 %v5039_v12, %v5047_v26  ;;  %v4262_v12 = vld [vmem:[%s4520_s17 + $0x160] sm:$0xff] }
 0x175   : > { %6069 = vst [vmem:[#allocation16_spill] sm:$0xff] %v5044_v39  ;;  %v3815_v37 = vpop.eup %3814  ;;  %v521_v22 = vpop.permute.xlu0 %520  ;;  %1324 = vmatprep.subr.bf16.mxu0 %v1156_v34  ;;  %v910_v53 = vmul.f32 0.1, %v3813_v47  ;;  %v1155_v58 = vpack.c.bf16 %v5036_v6, %v5044_v39  ;;  %v4258_v34 = vld [vmem:[%s4520_s17 + $0x150] sm:$0xff] }
 0x176   : > { %v3817_v9 = vpop.eup %3816  ;;  %v681_v30 = vadd.f32 %v680_v41, %v521_v22  ;;  %v794_v20 = vadd.f32 %v793_v54, %v521_v22  ;;  %1437 = vmatprep.subr.bf16.mxu1 %v1158_v55  ;;  %v912_v24 = vmul.f32 0.1, %v3815_v37  ;;  %v683_v44 = vadd.f32 %v682_v36, %v521_v22  ;;  %v526_v54 = vpop.permute.xlu1 %525  ;;  %v4259_v55 = vld [vmem:[%s4520_s17 + $0x148] sm:$0xff] }
 0x177   : > { %v3819_v42 = vpop.eup %3818  ;;  %v911_v43 = vmul.f32 0.1, %v3817_v9  ;;  %v5061_v47 = vadd.f32 %v4258_v34, %v908_v57  ;;  %v5064_v9 = vadd.f32 %v4259_v55, %v907_v51  ;;  %1325 = vmatpush1.bf16.msra.mxu0 %v1155_v58  ;;  %1438 = vmatpush1.bf16.msra.mxu1 %v1157_v5  ;;  %v796_v26 = vadd.f32 %v795_v23, %v521_v22  ;;  %v4261_v36 = vld [vmem:[%s4520_s17 + $0x168] sm:$0xff]  ;;  %v4263_v51 = vld [vmem:[%s4520_s17 + $0x178] sm:$0xff]  ;;  %v4264_v58 = vld [vmem:[%s4520_s17 + $0x170] sm:$0xff] }
 0x178   : > { %v3821_v4 = vpop.eup %3820  ;;  %v913_v19 = vmul.f32 0.1, %v3819_v42  ;;  %3836 = vtanh.f32 %v681_v30  ;;  %v4260_v42 = vld [vmem:[%s4520_s17 + $0x158] sm:$0xff]  ;;  %v685_v57 = vadd.f32 %v5026_v7, %v526_v54  ;;  %v5074_v6 = vadd.f32 %v4262_v12, %v910_v53 }
 0x179   : > { %v3823_v41 = vpop.eup %3822  ;;  %3838 = vtanh.f32 %v794_v20  ;;  %v5067_v39 = vadd.f32 %v4260_v42, %v909_v18  ;;  %v5070_v30 = vadd.f32 %v4261_v36, %v911_v43  ;;  %v798_v22 = vadd.f32 %v5031_v31, %v526_v54  ;;  %v4265_v42 = vld [vmem:[%s4520_s17 + $0x1a0] sm:$0xff] }
 0x17a   : > { %v3825_v37 = vpop.eup %3824  ;;  %3840 = vtanh.f32 %v683_v44  ;;  %v5077_v20 = vadd.f32 %v4263_v51, %v913_v19  ;;  %v5081_v18 = vadd.f32 %v4264_v58, %v912_v24  ;;  %v914_v5 = vmul.f32 0.1, %v3821_v4  ;;  %v4267_v51 = vld [vmem:[%s4520_s17 + $0x1b0] sm:$0xff] }
 0x17b   : > { %v3827_v34 = vpop.eup %3826  ;;  %3842 = vtanh.f32 %v796_v26  ;;  %v687_v43 = vadd.f32 %v5033_v35, %v526_v54  ;;  %v915_v44 = vmul.f32 0.1, %v3825_v37  ;;  %v800_v12 = vadd.f32 %v5041_v38, %v526_v54 }
 0x17c   : > { %6071 = vst [vmem:[#allocation18_spill] sm:$0xff] %v5077_v20  ;;  %v3829_v23 = vpop.eup %3828  ;;  %6072 = vst [vmem:[#allocation19_spill] sm:$0xff] %v5081_v18  ;;  %3844 = vtanh.f32 %v685_v57  ;;  %v917_v26 = vmul.f32 0.1, %v3827_v34  ;;  %v1160_v31 = vpack.c.bf16 %v5070_v30, %v5064_v9  ;;  %v916_v24 = vmul.f32 0.1, %v3823_v41 }
 0x17d   : > { %v3831_v7 = vpop.eup %3830  ;;  %v918_v55 = vmul.f32 0.1, %v3829_v23  ;;  %3846 = vtanh.f32 %v798_v22  ;;  %v1162_v37 = vpack.c.bf16 %v5077_v20, %v5067_v39  ;;  %v1159_v36 = vpack.c.bf16 %v5074_v6, %v5054_v32  ;;  %v4266_v41 = vld [vmem:[%s4520_s17 + $0x188] sm:$0xff] }
 0x17e   : > { %v3833_v53 = vpop.eup %3832  ;;  %v920_v19 = vmul.f32 0.1, %v3831_v7  ;;  %3848 = vtanh.f32 %v687_v43  ;;  %1326 = vmatprep.subr.bf16.mxu0 %v1160_v31  ;;  %v1161_v57 = vpack.c.bf16 %v5081_v18, %v5061_v47  ;;  %v5097_v34 = vadd.f32 %v4266_v41, %v915_v44  ;;  %v4268_v23 = vld [vmem:[%s4520_s17 + $0x1a8] sm:$0xff]  ;;  %v4269_v7 = vld [vmem:[%s4520_s17 + $0x180] sm:$0xff]  ;;  %v4271_v31 = vld [vmem:[%s4520_s17 + $0x1b8] sm:$0xff] }
 0x17f   : > { %v3835_v4 = vpop.eup %3834  ;;  %v919_v35 = vmul.f32 0.1, %v3833_v53  ;;  %3850 = vtanh.f32 %v800_v12  ;;  %v5090_v38 = vadd.f32 %v4265_v42, %v918_v55  ;;  %1439 = vmatprep.subr.bf16.mxu1 %v1162_v37  ;;  %v5106_v55 = vadd.f32 %v4269_v7, %v914_v5  ;;  %v4270_v12 = vld [vmem:[%s4520_s17 + $0x198] sm:$0xff]  ;;  %1327 = vmatpush1.bf16.msra.mxu0 %v1159_v36  ;;  %v4272_v42 = vld [vmem:[%s4520_s17 + $0x190] sm:$0xff] }
 0x180   : > { %v921_v54 = vmul.f32 0.1, %v3835_v4  ;;  %6074 = vst [vmem:[#allocation21_spill] sm:$0xff] %v5097_v34  ;;  %v5100_v22 = vadd.f32 %v4267_v51, %v920_v19  ;;  %v5109_v53 = vadd.f32 %v4270_v12, %v917_v26  ;;  %1440 = vmatpush1.bf16.msra.mxu1 %v1161_v57  ;;  %v5115_v19 = vadd.f32 %v4272_v42, %v916_v24 }
 0x181   : > { %6073 = vst [vmem:[#allocation20_spill] sm:$0xff] %v5090_v38  ;;  %v5103_v58 = vadd.f32 %v4268_v23, %v919_v35  ;;  %6077 = vst [vmem:[#allocation24_spill] sm:$0xff] %v5106_v55  ;;  %v1163_v26 = vpack.c.bf16 %v5090_v38, %v5106_v55  ;;  %v4276_v55 = vld [vmem:[%s4520_s17 + $0x1e8] sm:$0xff] }
 0x182   : > { %6075 = vst [vmem:[#allocation22_spill] sm:$0xff] %v5100_v22  ;;  %v3837_v43 = vpop.eup %3836  ;;  %6078 = vst [vmem:[#allocation25_spill] sm:$0xff] %v5109_v53  ;;  %v5112_v4 = vadd.f32 %v4271_v31, %v921_v54  ;;  %v1165_v54 = vpack.c.bf16 %v5100_v22, %v5115_v19 }
 0x183   : > { %6076 = vst [vmem:[#allocation23_spill] sm:$0xff] %v5103_v58  ;;  %v3839_v44 = vpop.eup %3838  ;;  %6080 = vst [vmem:[#allocation27_spill] sm:$0xff] %v5115_v19  ;;  %v1164_v35 = vpack.c.bf16 %v5103_v58, %v5097_v34  ;;  %v922_v7 = vmul.f32 0.1, %v3837_v43  ;;  %v4278_v58 = vld [vmem:[%s4520_s17 + $0x1d8] sm:$0xff] }
 0x184   : > { %6079 = vst [vmem:[#allocation26_spill] sm:$0xff] %v5112_v4  ;;  %v3841_v37 = vpop.eup %3840  ;;  %v1166_v5 = vpack.c.bf16 %v5112_v4, %v5109_v53  ;;  %v4274_v53 = vld [vmem:[%s4520_s17 + $0x1c8] sm:$0xff] }
 0x185   : > { %v3843_v41 = vpop.eup %3842  ;;  %1328 = vmatprep.subr.bf16.mxu0 %v1164_v35  ;;  %v923_v57 = vmul.f32 0.1, %v3841_v37  ;;  %v924_v35 = vmul.f32 0.1, %v3839_v44 }
 0x186   : > { %v3845_v36 = vpop.eup %3844  ;;  %1441 = vmatprep.subr.bf16.mxu1 %v1166_v5  ;;  %1329 = vmatpush1.bf16.msra.mxu0 %v1163_v26  ;;  %v925_v12 = vmul.f32 0.1, %v3843_v41  ;;  %v4273_v5 = vld [vmem:[%s4520_s17 + $0x1e0] sm:$0xff] }
 0x187   : > { %v3847_v24 = vpop.eup %3846  ;;  %v926_v51 = vmul.f32 0.1, %v3845_v36  ;;  %1442 = vmatpush1.bf16.msra.mxu1 %v1165_v54  ;;  %v5129_v37 = vadd.f32 %v4274_v53, %v923_v57  ;;  %v4275_v36 = vld [vmem:[%s4520_s17 + $0x1f0] sm:$0xff]  ;;  %v4277_v41 = vld [vmem:[%s4520_s17 + $0x1c0] sm:$0xff] }
 0x188   : > { %v3849_v23 = vpop.eup %3848  ;;  %v928_v31 = vmul.f32 0.1, %v3847_v24  ;;  %v5138_v24 = vadd.f32 %v4277_v41, %v922_v7  ;;  %v5141_v44 = vadd.f32 %v4278_v58, %v925_v12  ;;  %v6089_v7 = vmov 0   ;;  %v3701_v12 = vld [vmem:[%s5971_s1 + $0x48] sm:$0xff]   ;;  %v3707_v41 = vld [vmem:[%s5971_s1 + $0x78] sm:$0xff]  }
 0x189   : > { %v3851_v42 = vpop.eup %3850  ;;  %v927_v19 = vmul.f32 0.1, %v3849_v23  ;;  %v5126_v4 = vadd.f32 %v4273_v5, %v926_v51  ;;  %6082 = vst [vmem:[#allocation29_spill] sm:$0xff] %v5129_v37  ;;  %v4279_v23 = vld [vmem:[%s4520_s17 + $0x1f8] sm:$0xff]  ;;  %v4280_v51 = vld [vmem:[%s4520_s17 + $0x1d0] sm:$0xff]  ;;  %v3704_v5 = vld [vmem:[%s5971_s1 + $0x60] sm:$0xff]  }
 0x18a   : > { %v929_v26 = vmul.f32 0.1, %v3851_v42  ;;  %v5132_v54 = vadd.f32 %v4275_v36, %v928_v31  ;;  %6085 = vst [vmem:[#allocation32_spill] sm:$0xff] %v5138_v24  ;;  %6086 = vst [vmem:[#allocation33_spill] sm:$0xff] %v5141_v44  ;;  %v5147_v42 = vadd.f32 %v4280_v51, %v924_v35  ;;  %v3702_v31 = vld [vmem:[%s5971_s1 + $0x50] sm:$0xff]   ;;  %v3703_v35 = vld [vmem:[%s5971_s1 + $0x58] sm:$0xff]   ;;  %v1196_v51 = vpop.permute.xlu1 %1195 }
 0x18b   : > { %6081 = vst [vmem:[#allocation28_spill] sm:$0xff] %v5126_v4  ;;  %v5135_v43 = vadd.f32 %v4276_v55, %v927_v19  ;;  %v1167_v55 = vpack.c.bf16 %v5126_v4, %v5138_v24  ;;  %v3700_v19 = vld [vmem:[%s5971_s1 + $0x40] sm:$0xff]   ;;  %v3706_v36 = vld [vmem:[%s5971_s1 + $0x70] sm:$0xff]  }
 0x18c   : > { %6083 = vst [vmem:[#allocation30_spill] sm:$0xff] %v5132_v54  ;;  %v5144_v22 = vadd.f32 %v4279_v23, %v929_v26  ;;  %6088 = vst [vmem:[#allocation35_spill] sm:$0xff] %v5147_v42  ;;  %v1169_v58 = vpack.c.bf16 %v5132_v54, %v5147_v42  ;;  %v3705_v26 = vld [vmem:[%s5971_s1 + $0x68] sm:$0xff]   ;;  %v1191_v23 = vpop.permute.xlu0 %1190 }
 0x18d   : > { %6084 = vst [vmem:[#allocation31_spill] sm:$0xff] %v5135_v43  ;;  %v1168_v53 = vpack.c.bf16 %v5135_v43, %v5129_v37 }
 0x18e   : > { %6087 = vst [vmem:[#allocation34_spill] sm:$0xff] %v5144_v22  ;;  %v1170_v57 = vpack.c.bf16 %v5144_v22, %v5141_v44 }
 0x18f   : > { %1330 = vmatprep.subr.bf16.mxu0 %v1168_v53 }
 0x190   : > { %1443 = vmatprep.subr.bf16.mxu1 %v1170_v57  ;;  %1331 = vmatpush1.bf16.msra.mxu0 %v1167_v55  ;;  %v1201_v24 = vpop.permute.xlu0 %1200 }
 0x191   : > { %1444 = vmatpush1.bf16.msra.mxu1 %v1169_v58 }
 0x193   : > { %1349 = vmatmul.mubr.bf16.vlgmr.msra.gmra.mrb[32].mxu0 %v3700_v19 }
 0x194   : > { %1462 = vmatmul.mubr.bf16.vlgmr.msra.gmra.mrb[32].mxu1 %v3700_v19  ;;  %1358 = vmatprep.mubr.bf16.mxu0 %v6089_v7 }
 0x195   : > { %1471 = vmatprep.mubr.bf16.mxu1 %v6089_v7 }
 0x19b   : > { %1359 = vmatmul.mubr.bf16.gmra.mrb[36].mxu0 %v3701_v12 }
 0x19c   : > { %1472 = vmatmul.mubr.bf16.gmra.mrb[36].mxu1 %v3701_v12  ;;  %1368 = vmatprep.mubr.bf16.mxu0 %v6089_v7 }
 0x19d   : > { %1481 = vmatprep.mubr.bf16.mxu1 %v6089_v7 }
 0x1a3   : > { %1369 = vmatmul.mubr.bf16.gmra.mrb[40].mxu0 %v3702_v31 }
 0x1a4   : > { %1482 = vmatmul.mubr.bf16.gmra.mrb[40].mxu1 %v3702_v31  ;;  %1378 = vmatprep.mubr.bf16.mxu0 %v6089_v7 }
 0x1a5   : > { %1491 = vmatprep.mubr.bf16.mxu1 %v6089_v7 }
 0x1ab   : > { %1379 = vmatmul.mubr.bf16.gmra.mrb[44].mxu0 %v3703_v35 }
 0x1ac   : > { %1492 = vmatmul.mubr.bf16.gmra.mrb[44].mxu1 %v3703_v35  ;;  %1388 = vmatprep.mubr.bf16.mxu0 %v6089_v7 }
 0x1ad   : > { %1501 = vmatprep.mubr.bf16.mxu1 %v6089_v7 }
 0x1b3   : > { %1389 = vmatmul.mubr.bf16.gmra.mrb[48].mxu0 %v3704_v5 }
 0x1b4   : > { %1502 = vmatmul.mubr.bf16.gmra.mrb[48].mxu1 %v3704_v5  ;;  %1398 = vmatprep.mubr.bf16.mxu0 %v6089_v7 }
 0x1b5   : > { %1511 = vmatprep.mubr.bf16.mxu1 %v6089_v7 }
 0x1bb   : > { %1399 = vmatmul.mubr.bf16.gmra.mrb[52].mxu0 %v3705_v26 }
 0x1bc   : > { %1512 = vmatmul.mubr.bf16.gmra.mrb[52].mxu1 %v3705_v26  ;;  %1408 = vmatprep.mubr.bf16.mxu0 %v6089_v7 }
 0x1bd   : > { %1521 = vmatprep.mubr.bf16.mxu1 %v6089_v7 }
 0x1c3   : > { %1409 = vmatmul.mubr.bf16.gmra.mrb[56].mxu0 %v3706_v36 }
 0x1c4   : > { %1522 = vmatmul.mubr.bf16.gmra.mrb[56].mxu1 %v3706_v36  ;;  %1418 = vmatprep.mubr.bf16.mxu0 %v6089_v7 }
 0x1c5   : > { %1531 = vmatprep.mubr.bf16.mxu1 %v6089_v7 }
 0x1cb   : > { %1419 = vmatmul.mubr.bf16.gmra.mrb[60].mxu0 %v3707_v41 }
 0x1cc   : > { %1532 = vmatmul.mubr.bf16.gmra.mrb[60].mxu1 %v3707_v41  ;;  %2088 = vmatprep.mubr.bf16.mxu0 %v6089_v7 }
 0x1cd   : > { %2201 = vmatprep.mubr.bf16.mxu1 %v6089_v7 }
 0x266   : > { %v1350_v53 = vpop.f32.mrb[32].mxu0 }
 0x267   : > { %v1351_v57 = vadd.f32 %v1350_v53, %v1191_v23  ;;  %v1463_v55 = vpop.f32.mrb[32].mxu1  ;;  %v1352_v58 = vpop.f32.mrb[33].mxu0 }
 0x268   : > { %v1464_v19 = vadd.f32 %v1463_v55, %v1191_v23  ;;  %v1353_v12 = vadd.f32 %v1352_v58, %v1191_v23  ;;  %v1465_v31 = vpop.f32.mrb[33].mxu1  ;;  %v1354_v35 = vpop.f32.mrb[34].mxu0 }
 0x269   : > { %3852 = vtanh.f32 %v1351_v57  ;;  %v1466_v5 = vadd.f32 %v1465_v31, %v1191_v23  ;;  %v1355_v26 = vadd.f32 %v1354_v35, %v1196_v51  ;;  %v1467_v36 = vpop.f32.mrb[34].mxu1  ;;  %v1356_v42 = vpop.f32.mrb[35].mxu0 }
 0x26a   : > { %3854 = vtanh.f32 %v1464_v19  ;;  %v1468_v41 = vadd.f32 %v1467_v36, %v1196_v51  ;;  %v1469_v22 = vpop.f32.mrb[35].mxu1  ;;  %v1357_v7 = vadd.f32 %v1356_v42, %v1196_v51  ;;  %v1206_v53 = vpop.permute.xlu1 %1205 }
 0x26b   : > { %3856 = vtanh.f32 %v1353_v12  ;;  %v1470_v44 = vadd.f32 %v1469_v22, %v1196_v51 }
 0x26c   : > { %3858 = vtanh.f32 %v1466_v5 }
 0x26d   : > { %3860 = vtanh.f32 %v1355_v26 }
 0x26e   : > { %3862 = vtanh.f32 %v1468_v41  ;;  %v1360_v55 = vpop.f32.mrb[36].mxu0 }
 0x26f   : > { %3864 = vtanh.f32 %v1357_v7  ;;  %v1361_v58 = vadd.f32 %v1360_v55, %v1201_v24  ;;  %v1473_v43 = vpop.f32.mrb[36].mxu1  ;;  %v1362_v57 = vpop.f32.mrb[37].mxu0 }
 0x270   : > { %3866 = vtanh.f32 %v1470_v44  ;;  %v1474_v23 = vadd.f32 %v1473_v43, %v1201_v24  ;;  %v1363_v31 = vadd.f32 %v1362_v57, %v1201_v24  ;;  %v1475_v35 = vpop.f32.mrb[37].mxu1  ;;  %v1364_v19 = vpop.f32.mrb[38].mxu0 }
 0x271   : > { %3868 = vtanh.f32 %v1361_v58  ;;  %v1476_v36 = vadd.f32 %v1475_v35, %v1201_v24  ;;  %v1365_v12 = vadd.f32 %v1364_v19, %v1206_v53  ;;  %v1477_v42 = vpop.f32.mrb[38].mxu1  ;;  %v1366_v5 = vpop.f32.mrb[39].mxu0 }
 0x272   : > { %3870 = vtanh.f32 %v1474_v23  ;;  %v1478_v22 = vadd.f32 %v1477_v42, %v1206_v53  ;;  %v1479_v51 = vpop.f32.mrb[39].mxu1  ;;  %v1367_v41 = vadd.f32 %v1366_v5, %v1206_v53  ;;  %v1211_v44 = vpop.permute.xlu0 %1210 }
 0x273   : > { %v3853_v26 = vpop.eup %3852  ;;  %3872 = vtanh.f32 %v1363_v31  ;;  %v1480_v55 = vadd.f32 %v1479_v51, %v1206_v53 }
 0x274   : > { %v3855_v7 = vpop.eup %3854  ;;  %3874 = vtanh.f32 %v1476_v36  ;;  %v1606_v35 = vmul.f32 0.1, %v3853_v26 }
 0x275   : > { %v3857_v54 = vpop.eup %3856  ;;  %3876 = vtanh.f32 %v1365_v12  ;;  %v1608_v31 = vmul.f32 0.1, %v3855_v7 }
 0x276   : > { %v3859_v43 = vpop.eup %3858  ;;  %v1607_v57 = vmul.f32 0.1, %v3857_v54  ;;  %3878 = vtanh.f32 %v1478_v22  ;;  %v1370_v58 = vpop.f32.mrb[40].mxu0 }
 0x277   : > { %v3861_v24 = vpop.eup %3860  ;;  %v1609_v19 = vmul.f32 0.1, %v3859_v43  ;;  %3880 = vtanh.f32 %v1367_v41  ;;  %v1371_v23 = vadd.f32 %v1370_v58, %v1211_v44  ;;  %v1483_v42 = vpop.f32.mrb[40].mxu1 }
 0x278   : > { %v1372_v37 = vpop.f32.mrb[41].mxu0  ;;  %v3863_v4 = vpop.eup %3862  ;;  %v1610_v5 = vmul.f32 0.1, %v3861_v24  ;;  %3882 = vtanh.f32 %v1480_v55  ;;  %v1484_v36 = vadd.f32 %v1483_v42, %v1211_v44  ;;  %v5198_v34 = vadd.f32 %v1607_v57, %v4884_v49 }
 0x279   : > { %v1485_v53 = vpop.f32.mrb[41].mxu1  ;;  %v1374_v51 = vpop.f32.mrb[42].mxu0  ;;  %v5201_v54 = vadd.f32 %v1609_v19, %v4887_v50  ;;  %3884 = vtanh.f32 %v1371_v23  ;;  %v1373_v22 = vadd.f32 %v1372_v37, %v1211_v44  ;;  %v1612_v38 = vmul.f32 0.1, %v3863_v4 }
 0x27a   : > { %v3865_v12 = vpop.eup %3864  ;;  %v1487_v26 = vpop.f32.mrb[42].mxu1  ;;  %3886 = vtanh.f32 %v1484_v36  ;;  %v1486_v55 = vadd.f32 %v1485_v53, %v1211_v44  ;;  %v5204_v18 = vadd.f32 %v1610_v5, %v4890_v61 }
 0x27b   : > { %v1376_v41 = vpop.f32.mrb[43].mxu0  ;;  %v3867_v43 = vpop.eup %3866  ;;  %v1611_v7 = vmul.f32 0.1, %v3865_v12  ;;  %3888 = vtanh.f32 %v1373_v22  ;;  %v5213_v5 = vadd.f32 %v1612_v38, %v4899_v16 }
 0x27c   : > { %v1216_v58 = vpop.permute.xlu1 %1215  ;;  %v1489_v24 = vpop.f32.mrb[43].mxu1  ;;  %v1613_v49 = vmul.f32 0.1, %v3867_v43  ;;  %3890 = vtanh.f32 %v1486_v55  ;;  %v5216_v43 = vadd.f32 %v1606_v35, %v4902_v28 }
 0x27d   : > { %v3869_v42 = vpop.eup %3868  ;;  %v1375_v57 = vadd.f32 %v1374_v51, %v1216_v58  ;;  %v5207_v19 = vadd.f32 %v1611_v7, %v4893_v63  ;;  %v1488_v23 = vadd.f32 %v1487_v26, %v1216_v58  ;;  %v1377_v36 = vadd.f32 %v1376_v41, %v1216_v58  ;;  %v1221_v61 = vpop.permute.xlu0 %1220 }
 0x27e   : > { %v3871_v50 = vpop.eup %3870  ;;  %v1614_v37 = vmul.f32 0.1, %v3869_v42  ;;  %v5210_v4 = vadd.f32 %v1613_v49, %v4896_v8  ;;  %v1490_v12 = vadd.f32 %v1489_v24, %v1216_v58  ;;  %v1380_v63 = vpop.f32.mrb[44].mxu0  ;;  %6090 = vst [vmem:[#allocation36_spill] sm:$0xff] %v5216_v43  ;;  %v5219_v26 = vadd.f32 %v1608_v31, %v4905_v29 }
 0x27f   : > { %v3873_v20 = vpop.eup %3872  ;;  %v1616_v44 = vmul.f32 0.1, %v3871_v50  ;;  %3892 = vtanh.f32 %v1375_v57  ;;  %v1880_v8 = vpack.c.bf16 %v5207_v19, %v5198_v34  ;;  %v1493_v41 = vpop.f32.mrb[44].mxu1  ;;  %v1381_v24 = vadd.f32 %v1380_v63, %v1221_v61 }
 0x280   : > { %v3875_v53 = vpop.eup %3874  ;;  %v1615_v51 = vmul.f32 0.1, %v3873_v20  ;;  %3894 = vtanh.f32 %v1488_v23  ;;  %6091 = vst [vmem:[#allocation37_spill] sm:$0xff] %v5219_v26  ;;  %v1382_v7 = vpop.f32.mrb[45].mxu0  ;;  %v5224_v16 = vadd.f32 %v1614_v37, %v4910_v13  ;;  %v1882_v38 = vpack.c.bf16 %v5210_v4, %v5201_v54 }
 0x281   : > { %v3877_v22 = vpop.eup %3876  ;;  %3896 = vtanh.f32 %v1377_v36  ;;  %v1617_v20 = vmul.f32 0.1, %v3875_v53  ;;  %v1495_v28 = vpop.f32.mrb[45].mxu1  ;;  %v5229_v29 = vadd.f32 %v1616_v44, %v4915_v11  ;;  %2056 = vmatprep.subr.bf16.mxu0 %v1880_v8  ;;  %v1494_v42 = vadd.f32 %v1493_v41, %v1221_v61 }
 0x282   : > { %v3879_v55 = vpop.eup %3878  ;;  %3898 = vtanh.f32 %v1490_v12  ;;  %v1384_v35 = vpop.f32.mrb[46].mxu0  ;;  %v5232_v31 = vadd.f32 %v1615_v51, %v4918_v40  ;;  %v1618_v50 = vmul.f32 0.1, %v3877_v22  ;;  %2169 = vmatprep.subr.bf16.mxu1 %v1882_v38  ;;  %v1879_v23 = vpack.c.bf16 %v5204_v18, %v5216_v43 }
 0x283   : > { %v3881_v58 = vpop.eup %3880  ;;  %v1497_v49 = vpop.f32.mrb[46].mxu1  ;;  %v1881_v36 = vpack.c.bf16 %v5213_v5, %v5219_v26  ;;  %v1620_v53 = vmul.f32 0.1, %v3879_v55  ;;  %3900 = vtanh.f32 %v1381_v24  ;;  %v1383_v51 = vadd.f32 %v1382_v7, %v1221_v61 }
 0x284   : > { %v1386_v13 = vpop.f32.mrb[47].mxu0  ;;  %v3883_v57 = vpop.eup %3882  ;;  %v1619_v37 = vmul.f32 0.1, %v3881_v58  ;;  %v5239_v8 = vadd.f32 %v1617_v20, %v4925_v56  ;;  %3902 = vtanh.f32 %v1494_v42  ;;  %2057 = vmatpush1.bf16.msra.mxu0 %v1879_v23  ;;  %v1496_v41 = vadd.f32 %v1495_v28, %v1221_v61 }
 0x285   : > { %v1499_v11 = vpop.f32.mrb[47].mxu1  ;;  %v3885_v44 = vpop.eup %3884  ;;  %v1621_v40 = vmul.f32 0.1, %v3883_v57  ;;  %2170 = vmatpush1.bf16.msra.mxu1 %v1881_v36  ;;  %3904 = vtanh.f32 %v1383_v51  ;;  %v5248_v23 = vadd.f32 %v1618_v50, %v4934_v15  ;;  %v5251_v61 = vadd.f32 %v1620_v53, %v4937_v10 }
 0x286   : > { %v3887_v12 = vpop.eup %3886  ;;  %v1226_v63 = vpop.permute.xlu1 %1225  ;;  %v1622_v22 = vmul.f32 0.1, %v3885_v44  ;;  %v5242_v58 = vadd.f32 %v1619_v37, %v4928_v60  ;;  %3906 = vtanh.f32 %v1496_v41 }
 0x287   : > { %v3889_v38 = vpop.eup %3888  ;;  %v1624_v26 = vmul.f32 0.1, %v3887_v12  ;;  %v1385_v55 = vadd.f32 %v1384_v35, %v1226_v63  ;;  %v1231_v24 = vpop.permute.xlu0 %1230  ;;  %v5245_v7 = vadd.f32 %v1621_v40, %v4931_v2  ;;  %v1498_v56 = vadd.f32 %v1497_v49, %v1226_v63 }
 0x288   : > { %v3891_v57 = vpop.eup %3890  ;;  %v1623_v43 = vmul.f32 0.1, %v3889_v38  ;;  %v1390_v20 = vpop.f32.mrb[48].mxu0  ;;  %v1387_v60 = vadd.f32 %v1386_v13, %v1226_v63  ;;  %v5254_v36 = vadd.f32 %v1622_v22, %v4940_v25  ;;  %v1500_v49 = vadd.f32 %v1499_v11, %v1226_v63 }
 0x289   : > { %v3893_v42 = vpop.eup %3892  ;;  %3908 = vtanh.f32 %v1385_v55  ;;  %v1503_v28 = vpop.f32.mrb[48].mxu1  ;;  %v5257_v2 = vadd.f32 %v1624_v26, %v4943_v21  ;;  %v1625_v10 = vmul.f32 0.1, %v3891_v57  ;;  %v1884_v13 = vpack.c.bf16 %v5242_v58, %v5232_v31 }
 0x28a   : > { %v1392_v35 = vpop.f32.mrb[49].mxu0  ;;  %v3895_v37 = vpop.eup %3894  ;;  %3910 = vtanh.f32 %v1498_v56  ;;  %v5260_v50 = vadd.f32 %v1623_v43, %v4946_v33  ;;  %v1626_v12 = vmul.f32 0.1, %v3893_v42  ;;  %v1886_v21 = vpack.c.bf16 %v5245_v7, %v5239_v8 }
 0x28b   : > { %v1505_v44 = vpop.f32.mrb[49].mxu1  ;;  %v1394_v40 = vpop.f32.mrb[50].mxu0  ;;  %3912 = vtanh.f32 %v1387_v60  ;;  %v1628_v11 = vmul.f32 0.1, %v3895_v37  ;;  %2058 = vmatprep.subr.bf16.mxu0 %v1884_v13  ;;  %v1391_v33 = vadd.f32 %v1390_v20, %v1231_v24  ;;  %v1504_v43 = vadd.f32 %v1503_v28, %v1231_v24 }
 0x28c   : > { %v3897_v15 = vpop.eup %3896  ;;  %v1507_v53 = vpop.f32.mrb[50].mxu1  ;;  %3914 = vtanh.f32 %v1500_v49  ;;  %2171 = vmatprep.subr.bf16.mxu1 %v1886_v21  ;;  %v1883_v55 = vpack.c.bf16 %v5248_v23, %v5224_v16  ;;  %v1885_v57 = vpack.c.bf16 %v5251_v61, %v5229_v29  ;;  %v1393_v56 = vadd.f32 %v1392_v35, %v1231_v24 }
 0x28d   : > { %v1396_v51 = vpop.f32.mrb[51].mxu0  ;;  %v3899_v25 = vpop.eup %3898  ;;  %v1627_v22 = vmul.f32 0.1, %v3897_v15  ;;  %3916 = vtanh.f32 %v1391_v33  ;;  %v1506_v37 = vadd.f32 %v1505_v44, %v1231_v24  ;;  %v5280_v15 = vadd.f32 %v1626_v12, %v4968_v62 }
 0x28e   : > { %v1509_v26 = vpop.f32.mrb[51].mxu1  ;;  %v1629_v63 = vmul.f32 0.1, %v3899_v25  ;;  %v1236_v41 = vpop.permute.xlu1 %1235  ;;  %3918 = vtanh.f32 %v1504_v43  ;;  %2059 = vmatpush1.bf16.msra.mxu0 %v1883_v55  ;;  %2172 = vmatpush1.bf16.msra.mxu1 %v1885_v57 }
 0x28f   : > { %v5267_v38 = vadd.f32 %v1627_v22, %v4953_v46  ;;  %v3901_v42 = vpop.eup %3900  ;;  %v1395_v20 = vadd.f32 %v1394_v40, %v1236_v41  ;;  %v1241_v49 = vpop.permute.xlu0 %1240  ;;  %v5277_v46 = vadd.f32 %v1625_v10, %v4965_v59  ;;  %v1508_v13 = vadd.f32 %v1507_v53, %v1236_v41 }
 0x290   : > { %v5274_v60 = vadd.f32 %v1629_v63, %v4960_v17  ;;  %v3903_v28 = vpop.eup %3902  ;;  %v1400_v35 = vpop.f32.mrb[52].mxu0  ;;  %v5283_v17 = vadd.f32 %v1628_v11, %v4971_v14  ;;  %3920 = vtanh.f32 %v1393_v56  ;;  %v1397_v24 = vadd.f32 %v1396_v51, %v1236_v41 }
 0x291   : > { %6092 = vst [vmem:[#allocation38_spill] sm:$0xff] %v5277_v46  ;;  %v3905_v25 = vpop.eup %3904  ;;  %v1888_v44 = vpack.c.bf16 %v5267_v38, %v5260_v50  ;;  %v1513_v40 = vpop.f32.mrb[52].mxu1  ;;  %3922 = vtanh.f32 %v1506_v37  ;;  %v1510_v62 = vadd.f32 %v1509_v26, %v1236_v41  ;;  %v1630_v33 = vmul.f32 0.1, %v3901_v42 }
 0x292   : > { %v1402_v59 = vpop.f32.mrb[53].mxu0  ;;  %v3907_v10 = vpop.eup %3906  ;;  %v1631_v22 = vmul.f32 0.1, %v3905_v25  ;;  %v1890_v12 = vpack.c.bf16 %v5274_v60, %v5277_v46  ;;  %3924 = vtanh.f32 %v1395_v20  ;;  %v1401_v51 = vadd.f32 %v1400_v35, %v1241_v49 }
 0x293   : > { %v1515_v53 = vpop.f32.mrb[53].mxu1  ;;  %v1404_v21 = vpop.f32.mrb[54].mxu0  ;;  %v1633_v14 = vmul.f32 0.1, %v3907_v10  ;;  %2060 = vmatprep.subr.bf16.mxu0 %v1888_v44  ;;  %v1632_v57 = vmul.f32 0.1, %v3903_v28  ;;  %3926 = vtanh.f32 %v1508_v13  ;;  %v1514_v37 = vadd.f32 %v1513_v40, %v1241_v49 }
 0x294   : > { %v3909_v63 = vpop.eup %3908  ;;  %v1517_v11 = vpop.f32.mrb[54].mxu1  ;;  %2173 = vmatprep.subr.bf16.mxu1 %v1890_v12  ;;  %v5290_v25 = vadd.f32 %v1631_v22, %v4980_v45  ;;  %3928 = vtanh.f32 %v1397_v24  ;;  %v1887_v42 = vpack.c.bf16 %v5280_v15, %v5254_v36  ;;  %v1889_v28 = vpack.c.bf16 %v5283_v17, %v5257_v2 }
 0x295   : > { %v1406_v43 = vpop.f32.mrb[55].mxu0  ;;  %v3911_v55 = vpop.eup %3910  ;;  %v1634_v56 = vmul.f32 0.1, %v3909_v63  ;;  %v5293_v46 = vadd.f32 %v1633_v14, %v4983_v48  ;;  %3930 = vtanh.f32 %v1510_v62  ;;  %v1403_v48 = vadd.f32 %v1402_v59, %v1241_v49  ;;  %v6097_v14 = vld [vmem:[#allocation9_spill] sm:$0xff]  ;;  %v6099_v59 = vld [vmem:[#allocation10_spill] sm:$0xff] }
 0x296   : > { %v1519_v26 = vpop.f32.mrb[55].mxu1  ;;  %v3913_v41 = vpop.eup %3912  ;;  %6093 = vst [vmem:[#allocation39_spill] sm:$0xff] %v5290_v25  ;;  %v1636_v35 = vmul.f32 0.1, %v3911_v55  ;;  %3932 = vtanh.f32 %v1401_v51  ;;  %2061 = vmatpush1.bf16.msra.mxu0 %v1887_v42  ;;  %2174 = vmatpush1.bf16.msra.mxu1 %v1889_v28  ;;  %v1516_v22 = vadd.f32 %v1515_v53, %v1241_v49 }
 0x297   : > { %6094 = vst [vmem:[#allocation40_spill] sm:$0xff] %v5293_v46  ;;  %v3915_v20 = vpop.eup %3914  ;;  %v1635_v44 = vmul.f32 0.1, %v3913_v41  ;;  %v1246_v13 = vpop.permute.xlu1 %1245  ;;  %v5300_v40 = vadd.f32 %v1634_v56, %v4990_v3  ;;  %3934 = vtanh.f32 %v1514_v37 }
 0x298   : > { %v1637_v45 = vmul.f32 0.1, %v3915_v20  ;;  %v1251_v10 = vpop.permute.xlu0 %1250  ;;  %v1405_v12 = vadd.f32 %v1404_v21, %v1246_v13  ;;  %v1410_v62 = vpop.f32.mrb[56].mxu0  ;;  %3936 = vtanh.f32 %v1403_v48  ;;  %v1518_v3 = vadd.f32 %v1517_v11, %v1246_v13 }
 0x299   : > { %6095 = vst [vmem:[#allocation41_spill] sm:$0xff] %v5300_v40  ;;  %v5303_v24 = vadd.f32 %v1635_v44, %v4994_v1  ;;  %v3917_v63 = vpop.eup %3916  ;;  %v1407_v56 = vadd.f32 %v1406_v43, %v1246_v13  ;;  %v1523_v41 = vpop.f32.mrb[56].mxu1  ;;  %v5309_v20 = vadd.f32 %v1636_v35, %v6099_v59  ;;  %3938 = vtanh.f32 %v1516_v22  ;;  %v6101_v44 = vld [vmem:[#allocation11_spill] sm:$0xff] }
 0x29a   : > { %v5306_v55 = vadd.f32 %v1637_v45, %v6097_v14  ;;  %v1412_v51 = vpop.f32.mrb[57].mxu0  ;;  %v3919_v42 = vpop.eup %3918  ;;  %v1520_v1 = vadd.f32 %v1519_v26, %v1246_v13  ;;  %v5314_v28 = vadd.f32 %v1630_v33, %v6101_v44  ;;  %3940 = vtanh.f32 %v1405_v12  ;;  %v6103_v14 = vld [vmem:[#allocation12_spill] sm:$0xff] }
 0x29b   : > { %6096 = vst [vmem:[#allocation42_spill] sm:$0xff] %v5303_v24  ;;  %6100 = vst [vmem:[#allocation10_spill] sm:$0xff] %v5309_v20  ;;  %v1892_v49 = vpack.c.bf16 %v5303_v24, %v5290_v25  ;;  %v1525_v53 = vpop.f32.mrb[57].mxu1  ;;  %v1414_v21 = vpop.f32.mrb[58].mxu0  ;;  %v1411_v43 = vadd.f32 %v1410_v62, %v1251_v10  ;;  %v5319_v22 = vadd.f32 %v1632_v57, %v6103_v14  ;;  %3942 = vtanh.f32 %v1518_v3 }
 0x29c   : > { %6098 = vst [vmem:[#allocation9_spill] sm:$0xff] %v5306_v55  ;;  %v3921_v37 = vpop.eup %3920  ;;  %6102 = vst [vmem:[#allocation11_spill] sm:$0xff] %v5314_v28  ;;  %v1894_v11 = vpack.c.bf16 %v5306_v55, %v5293_v46  ;;  %v1527_v45 = vpop.f32.mrb[58].mxu1  ;;  %v1524_v26 = vadd.f32 %v1523_v41, %v1251_v10  ;;  %3944 = vtanh.f32 %v1407_v56  ;;  %v1891_v33 = vpack.c.bf16 %v5300_v40, %v5314_v28  ;;  %v6109_v46 = vld [vmem:[#allocation16_spill] sm:$0xff] }
 0x29d   : > { %v1416_v48 = vpop.f32.mrb[59].mxu0  ;;  %v3923_v35 = vpop.eup %3922  ;;  %6104 = vst [vmem:[#allocation12_spill] sm:$0xff] %v5319_v22  ;;  %2062 = vmatprep.subr.bf16.mxu0 %v1892_v49  ;;  %v1639_v24 = vmul.f32 0.1, %v3921_v37  ;;  %v1638_v44 = vmul.f32 0.1, %v3917_v63  ;;  %3946 = vtanh.f32 %v1520_v1  ;;  %v1893_v55 = vpack.c.bf16 %v5309_v20, %v5319_v22 }
 0x29e   : > { %v1529_v13 = vpop.f32.mrb[59].mxu1  ;;  %v3925_v59 = vpop.eup %3924  ;;  %2175 = vmatprep.subr.bf16.mxu1 %v1894_v11  ;;  %v1641_v62 = vmul.f32 0.1, %v3923_v35  ;;  %v1640_v14 = vmul.f32 0.1, %v3919_v42  ;;  %3948 = vtanh.f32 %v1411_v43  ;;  %2063 = vmatpush1.bf16.msra.mxu0 %v1891_v33  ;;  %v1413_v41 = vadd.f32 %v1412_v51, %v1251_v10  ;;  %v6105_v33 = vld [vmem:[#allocation13_spill] sm:$0xff] }
 0x29f   : > { %v3927_v12 = vpop.eup %3926  ;;  %v1642_v3 = vmul.f32 0.1, %v3925_v59  ;;  %v1256_v37 = vpop.permute.xlu1 %1255  ;;  %3950 = vtanh.f32 %v1524_v26  ;;  %2176 = vmatpush1.bf16.msra.mxu1 %v1893_v55  ;;  %v1526_v28 = vadd.f32 %v1525_v53, %v1251_v10  ;;  %v5326_v1 = vadd.f32 %v1639_v24, %v5018_v52  ;;  %v6107_v20 = vld [vmem:[#allocation14_spill] sm:$0xff] }
 0x2a0   : > { %v3929_v57 = vpop.eup %3928  ;;  %v1644_v56 = vmul.f32 0.1, %v3927_v12  ;;  %v1420_v40 = vpop.f32.mrb[60].mxu0  ;;  %3952 = vtanh.f32 %v1413_v41  ;;  %v1415_v22 = vadd.f32 %v1414_v21, %v1256_v37  ;;  %v5329_v51 = vadd.f32 %v1641_v62, %v5021_v0  ;;  %v6108_v62 = vld [vmem:[#allocation15_spill] sm:$0xff] }
 0x2a1   : > { %v3931_v49 = vpop.eup %3930  ;;  %v1643_v11 = vmul.f32 0.1, %v3929_v57  ;;  %v1533_v42 = vpop.f32.mrb[60].mxu1  ;;  %3954 = vtanh.f32 %v1526_v28  ;;  %v1528_v55 = vadd.f32 %v1527_v45, %v1256_v37  ;;  %v1417_v21 = vadd.f32 %v1416_v48, %v1256_v37 }
 0x2a2   : > { %v3933_v63 = vpop.eup %3932  ;;  %v1645_v35 = vmul.f32 0.1, %v3931_v49  ;;  %v1422_v59 = vpop.f32.mrb[61].mxu0  ;;  %3956 = vtanh.f32 %v1415_v22  ;;  %v5338_v0 = vadd.f32 %v1642_v3, %v6107_v20  ;;  %v1530_v28 = vadd.f32 %v1529_v13, %v1256_v37 }
 0x2a3   : > { %v3935_v43 = vpop.eup %3934  ;;  %v5332_v12 = vadd.f32 %v1643_v11, %v6105_v33  ;;  %v1535_v10 = vpop.f32.mrb[61].mxu1  ;;  %v1646_v24 = vmul.f32 0.1, %v3933_v63  ;;  %v5341_v11 = vadd.f32 %v1644_v56, %v6108_v62  ;;  %3958 = vtanh.f32 %v1528_v55 }
 0x2a4   : > { %v1424_v53 = vpop.f32.mrb[62].mxu0  ;;  %v3937_v26 = vpop.eup %3936  ;;  %v5335_v52 = vadd.f32 %v1645_v35, %v5029_v27  ;;  %v5344_v25 = vadd.f32 %v1638_v44, %v6109_v46  ;;  %v6110_v27 = vld [vmem:[#allocation17_spill] sm:$0xff]  ;;  %3960 = vtanh.f32 %v1417_v21  ;;  %v1648_v3 = vmul.f32 0.1, %v3935_v43 }
 0x2a5   : > { %v1537_v57 = vpop.f32.mrb[62].mxu1  ;;  %v1426_v41 = vpop.f32.mrb[63].mxu0  ;;  %v5347_v63 = vadd.f32 %v1640_v14, %v6110_v27  ;;  %v1896_v48 = vpack.c.bf16 %v5332_v12, %v5326_v1  ;;  %v1647_v35 = vmul.f32 0.1, %v3937_v26  ;;  %3962 = vtanh.f32 %v1530_v28 }
 0x2a6   : > { %6106 = vst [vmem:[#allocation13_spill] sm:$0xff] %v5335_v52  ;;  %v3939_v49 = vpop.eup %3938  ;;  %v1539_v45 = vpop.f32.mrb[63].mxu1  ;;  %v1898_v13 = vpack.c.bf16 %v5335_v52, %v5329_v51  ;;  %v5354_v56 = vadd.f32 %v1646_v24, %v5054_v32  ;;  %v1895_v43 = vpack.c.bf16 %v5338_v0, %v5344_v25 }
 0x2a7   : > { %v3941_v33 = vpop.eup %3940  ;;  %v1261_v20 = vpop.permute.xlu0 %1260  ;;  %v1649_v46 = vmul.f32 0.1, %v3939_v49  ;;  %2064 = vmatprep.subr.bf16.mxu0 %v1896_v48  ;;  %v1897_v26 = vpack.c.bf16 %v5341_v11, %v5347_v63 }
 0x2a8   : > { %v3943_v22 = vpop.eup %3942  ;;  %v1421_v44 = vadd.f32 %v1420_v40, %v1261_v20  ;;  %v1534_v14 = vadd.f32 %v1533_v42, %v1261_v20  ;;  %v1650_v21 = vmul.f32 0.1, %v3941_v33  ;;  %2177 = vmatprep.subr.bf16.mxu1 %v1898_v13  ;;  %v1423_v32 = vadd.f32 %v1422_v59, %v1261_v20  ;;  %v1266_v49 = vpop.permute.xlu1 %1265  ;;  %2065 = vmatpush1.bf16.msra.mxu0 %v1895_v43 }
 0x2a9   : > { %v3945_v37 = vpop.eup %3944  ;;  %v1652_v27 = vmul.f32 0.1, %v3943_v22  ;;  %v5361_v40 = vadd.f32 %v1648_v3, %v5061_v47  ;;  %v5364_v42 = vadd.f32 %v1647_v35, %v5064_v9  ;;  %2178 = vmatpush1.bf16.msra.mxu1 %v1897_v26  ;;  %v1536_v33 = vadd.f32 %v1535_v10, %v1261_v20  ;;  %v6111_v3 = vld [vmem:[#allocation18_spill] sm:$0xff]  ;;  %v6112_v10 = vld [vmem:[#allocation19_spill] sm:$0xff] }
 0x2aa   : > { %v3947_v55 = vpop.eup %3946  ;;  %v1651_v62 = vmul.f32 0.1, %v3945_v37  ;;  %3964 = vtanh.f32 %v1421_v44  ;;  %v5367_v13 = vadd.f32 %v1649_v46, %v5067_v39  ;;  %v1425_v59 = vadd.f32 %v1424_v53, %v1266_v49 }
 0x2ab   : > { %v3949_v28 = vpop.eup %3948  ;;  %v1653_v52 = vmul.f32 0.1, %v3947_v55  ;;  %3966 = vtanh.f32 %v1534_v14  ;;  %v5373_v47 = vadd.f32 %v1650_v21, %v5074_v6  ;;  %v1538_v35 = vadd.f32 %v1537_v57, %v1266_v49 }
 0x2ac   : > { %v3951_v24 = vpop.eup %3950  ;;  %v5370_v22 = vadd.f32 %v1651_v62, %v5070_v30  ;;  %3968 = vtanh.f32 %v1423_v32  ;;  %v5379_v20 = vadd.f32 %v1652_v27, %v6112_v10  ;;  %v1654_v39 = vmul.f32 0.1, %v3949_v28 }
 0x2ad   : > { %v3953_v48 = vpop.eup %3952  ;;  %v5376_v9 = vadd.f32 %v1653_v52, %v6111_v3  ;;  %3970 = vtanh.f32 %v1536_v33  ;;  %v1427_v46 = vadd.f32 %v1426_v41, %v1266_v49  ;;  %v1540_v53 = vadd.f32 %v1539_v45, %v1266_v49  ;;  %v6113_v41 = vld [vmem:[#allocation20_spill] sm:$0xff]  ;;  %v6114_v33 = vld [vmem:[#allocation21_spill] sm:$0xff] }
 0x2ae   : > { %v3955_v37 = vpop.eup %3954  ;;  %3972 = vtanh.f32 %v1425_v59  ;;  %v1655_v14 = vmul.f32 0.1, %v3953_v48  ;;  %v1900_v52 = vpack.c.bf16 %v5370_v22, %v5364_v42  ;;  %v1656_v43 = vmul.f32 0.1, %v3951_v24  ;;  %v6116_v24 = vld [vmem:[#allocation22_spill] sm:$0xff] }
 0x2af   : > { %v3957_v44 = vpop.eup %3956  ;;  %3974 = vtanh.f32 %v1538_v35  ;;  %v1657_v6 = vmul.f32 0.1, %v3955_v37  ;;  %v1902_v28 = vpack.c.bf16 %v5376_v9, %v5367_v13  ;;  %v1899_v45 = vpack.c.bf16 %v5373_v47, %v5354_v56  ;;  %v6118_v37 = vld [vmem:[#allocation23_spill] sm:$0xff] }
 0x2b0   : > { %v3959_v30 = vpop.eup %3958  ;;  %v1658_v55 = vmul.f32 0.1, %v3957_v44  ;;  %3976 = vtanh.f32 %v1427_v46  ;;  %2066 = vmatprep.subr.bf16.mxu0 %v1900_v52  ;;  %v1901_v49 = vpack.c.bf16 %v5379_v20, %v5361_v40  ;;  %v5393_v48 = vadd.f32 %v1655_v14, %v6114_v33  ;;  %v6120_v44 = vld [vmem:[#allocation24_spill] sm:$0xff]  ;;  %v6122_v46 = vld [vmem:[#allocation25_spill] sm:$0xff] }
 0x2b1   : > { %v3961_v62 = vpop.eup %3960  ;;  %v1660_v21 = vmul.f32 0.1, %v3959_v30  ;;  %3978 = vtanh.f32 %v1540_v53  ;;  %2179 = vmatprep.subr.bf16.mxu1 %v1902_v28  ;;  %v5402_v10 = vadd.f32 %v1654_v39, %v6120_v44  ;;  %v5405_v30 = vadd.f32 %v1657_v6, %v6122_v46  ;;  %2067 = vmatpush1.bf16.msra.mxu0 %v1899_v45 }
 0x2b2   : > { %v3963_v57 = vpop.eup %3962  ;;  %v1659_v26 = vmul.f32 0.1, %v3961_v62  ;;  %v5386_v27 = vadd.f32 %v1658_v55, %v6113_v41  ;;  %6115 = vst [vmem:[#allocation14_spill] sm:$0xff] %v5393_v48  ;;  %v6124_v55 = vld [vmem:[#allocation26_spill] sm:$0xff]  ;;  %2180 = vmatpush1.bf16.msra.mxu1 %v1901_v49  ;;  %v6126_v62 = vld [vmem:[#allocation27_spill] sm:$0xff] }
 0x2b3   : > { %v1661_v32 = vmul.f32 0.1, %v3963_v57  ;;  %v5396_v59 = vadd.f32 %v1660_v21, %v6116_v24  ;;  %6121 = vst [vmem:[#allocation17_spill] sm:$0xff] %v5402_v10  ;;  %6123 = vst [vmem:[#allocation18_spill] sm:$0xff] %v5405_v30  ;;  %v5411_v21 = vadd.f32 %v1656_v43, %v6126_v62  ;;  %v6128_v62 = vld [vmem:[#allocation28_spill] sm:$0xff] }
 0x2b4   : > { %v5399_v3 = vadd.f32 %v1659_v26, %v6118_v37  ;;  %v3965_v35 = vpop.eup %3964  ;;  %v1903_v6 = vpack.c.bf16 %v5386_v27, %v5402_v10 }
 0x2b5   : > { %6117 = vst [vmem:[#allocation15_spill] sm:$0xff] %v5396_v59  ;;  %v5408_v53 = vadd.f32 %v1661_v32, %v6124_v55  ;;  %v3967_v14 = vpop.eup %3966  ;;  %6127 = vst [vmem:[#allocation20_spill] sm:$0xff] %v5411_v21  ;;  %v1905_v28 = vpack.c.bf16 %v5396_v59, %v5411_v21  ;;  %v1662_v33 = vmul.f32 0.1, %v3965_v35 }
 0x2b6   : > { %6119 = vst [vmem:[#allocation16_spill] sm:$0xff] %v5399_v3  ;;  %v1904_v52 = vpack.c.bf16 %v5399_v3, %v5393_v48  ;;  %v3969_v57 = vpop.eup %3968  ;;  %v1664_v46 = vmul.f32 0.1, %v3967_v14  ;;  %v6140_v14 = vld [vmem:[#allocation34_spill] sm:$0xff] }
 0x2b7   : > { %6125 = vst [vmem:[#allocation19_spill] sm:$0xff] %v5408_v53  ;;  %v1906_v39 = vpack.c.bf16 %v5408_v53, %v5405_v30  ;;  %v3971_v26 = vpop.eup %3970  ;;  %v1663_v32 = vmul.f32 0.1, %v3969_v57  ;;  %v6130_v30 = vld [vmem:[#allocation29_spill] sm:$0xff]  ;;  %v6134_v57 = vld [vmem:[#allocation31_spill] sm:$0xff] }
 0x2b8   : > { %2068 = vmatprep.subr.bf16.mxu0 %v1904_v52  ;;  %v3973_v41 = vpop.eup %3972  ;;  %v1665_v24 = vmul.f32 0.1, %v3971_v26  ;;  %v6138_v26 = vld [vmem:[#allocation33_spill] sm:$0xff] }
 0x2b9   : > { %2181 = vmatprep.subr.bf16.mxu1 %v1906_v39  ;;  %2069 = vmatpush1.bf16.msra.mxu0 %v1903_v6  ;;  %v3975_v43 = vpop.eup %3974  ;;  %v1666_v45 = vmul.f32 0.1, %v3973_v41  ;;  %v5425_v21 = vadd.f32 %v1663_v32, %v6130_v30  ;;  %v6132_v39 = vld [vmem:[#allocation30_spill] sm:$0xff] }
 0x2ba   : > { %2182 = vmatpush1.bf16.msra.mxu1 %v1905_v28  ;;  %v3977_v49 = vpop.eup %3976  ;;  %v1668_v37 = vmul.f32 0.1, %v3975_v43  ;;  %v6136_v28 = vld [vmem:[#allocation32_spill] sm:$0xff]  ;;  %v5437_v43 = vadd.f32 %v1665_v24, %v6138_v26  ;;  %v3708_v24 = vld [vmem:[%s5971_s1 + $0x80] sm:$0xff]  }
 0x2bb   : > { %v3979_v44 = vpop.eup %3978  ;;  %v1667_v55 = vmul.f32 0.1, %v3977_v49  ;;  %v5422_v53 = vadd.f32 %v1666_v45, %v6128_v62  ;;  %6131 = vst [vmem:[#allocation22_spill] sm:$0xff] %v5425_v21  ;;  %v5434_v35 = vadd.f32 %v1662_v33, %v6136_v28  ;;  %v6142_v45 = vld [vmem:[#allocation35_spill] sm:$0xff]  ;;  %v3715_v26 = vld [vmem:[%s5971_s1 + $0xb8] sm:$0xff]  }
 0x2bc   : > { %v1669_v52 = vmul.f32 0.1, %v3979_v44  ;;  %v5428_v6 = vadd.f32 %v1668_v37, %v6132_v39  ;;  %6139 = vst [vmem:[#allocation26_spill] sm:$0xff] %v5437_v43  ;;  %v5443_v44 = vadd.f32 %v1664_v46, %v6142_v45  ;;  %v6144_v46 = vmov 0   ;;  %v3710_v62 = vld [vmem:[%s5971_s1 + $0x90] sm:$0xff]   ;;  %v3712_v39 = vld [vmem:[%s5971_s1 + $0xa0] sm:$0xff]   ;;  %v1936_v45 = vpop.permute.xlu1 %1935 }
 0x2bd   : > { %6129 = vst [vmem:[#allocation21_spill] sm:$0xff] %v5422_v53  ;;  %v5431_v41 = vadd.f32 %v1667_v55, %v6134_v57  ;;  %6137 = vst [vmem:[#allocation25_spill] sm:$0xff] %v5434_v35  ;;  %v1907_v37 = vpack.c.bf16 %v5422_v53, %v5434_v35  ;;  %v3709_v55 = vld [vmem:[%s5971_s1 + $0x88] sm:$0xff]   ;;  %v3714_v28 = vld [vmem:[%s5971_s1 + $0xb0] sm:$0xff]  }
 0x2be   : > { %6133 = vst [vmem:[#allocation23_spill] sm:$0xff] %v5428_v6  ;;  %v5440_v49 = vadd.f32 %v1669_v52, %v6140_v14  ;;  %6143 = vst [vmem:[#allocation28_spill] sm:$0xff] %v5443_v44  ;;  %v1909_v33 = vpack.c.bf16 %v5428_v6, %v5443_v44  ;;  %v3711_v52 = vld [vmem:[%s5971_s1 + $0x98] sm:$0xff]   ;;  %v3713_v57 = vld [vmem:[%s5971_s1 + $0xa8] sm:$0xff]   ;;  %v1931_v14 = vpop.permute.xlu0 %1930 }
 0x2bf   : > { %6135 = vst [vmem:[#allocation24_spill] sm:$0xff] %v5431_v41  ;;  %v1908_v30 = vpack.c.bf16 %v5431_v41, %v5425_v21 }
 0x2c0   : > { %6141 = vst [vmem:[#allocation27_spill] sm:$0xff] %v5440_v49  ;;  %v1910_v32 = vpack.c.bf16 %v5440_v49, %v5437_v43 }
 0x2c1   : > { %2070 = vmatprep.subr.bf16.mxu0 %v1908_v30 }
 0x2c2   : > { %2183 = vmatprep.subr.bf16.mxu1 %v1910_v32  ;;  %2071 = vmatpush1.bf16.msra.mxu0 %v1907_v37  ;;  %v1941_v35 = vpop.permute.xlu0 %1940 }
 0x2c3   : > { %2184 = vmatpush1.bf16.msra.mxu1 %v1909_v33 }
 0x2c5   : > { %2089 = vmatmul.mubr.bf16.vlgmr.msra.gmra.mrb[64].mxu0 %v3708_v24 }
 0x2c6   : > { %2202 = vmatmul.mubr.bf16.vlgmr.msra.gmra.mrb[64].mxu1 %v3708_v24  ;;  %2098 = vmatprep.mubr.bf16.mxu0 %v6144_v46 }
 0x2c7   : > { %2211 = vmatprep.mubr.bf16.mxu1 %v6144_v46 }
 0x2cd   : > { %2099 = vmatmul.mubr.bf16.gmra.mrb[68].mxu0 %v3709_v55 }
 0x2ce   : > { %2212 = vmatmul.mubr.bf16.gmra.mrb[68].mxu1 %v3709_v55  ;;  %2108 = vmatprep.mubr.bf16.mxu0 %v6144_v46 }
 0x2cf   : > { %2221 = vmatprep.mubr.bf16.mxu1 %v6144_v46 }
 0x2d5   : > { %2109 = vmatmul.mubr.bf16.gmra.mrb[72].mxu0 %v3710_v62 }
 0x2d6   : > { %2222 = vmatmul.mubr.bf16.gmra.mrb[72].mxu1 %v3710_v62  ;;  %2118 = vmatprep.mubr.bf16.mxu0 %v6144_v46 }
 0x2d7   : > { %2231 = vmatprep.mubr.bf16.mxu1 %v6144_v46 }
 0x2dd   : > { %2119 = vmatmul.mubr.bf16.gmra.mrb[76].mxu0 %v3711_v52 }
 0x2de   : > { %2232 = vmatmul.mubr.bf16.gmra.mrb[76].mxu1 %v3711_v52  ;;  %2128 = vmatprep.mubr.bf16.mxu0 %v6144_v46 }
 0x2df   : > { %2241 = vmatprep.mubr.bf16.mxu1 %v6144_v46 }
 0x2e5   : > { %2129 = vmatmul.mubr.bf16.gmra.mrb[80].mxu0 %v3712_v39 }
 0x2e6   : > { %2242 = vmatmul.mubr.bf16.gmra.mrb[80].mxu1 %v3712_v39  ;;  %2138 = vmatprep.mubr.bf16.mxu0 %v6144_v46 }
 0x2e7   : > { %2251 = vmatprep.mubr.bf16.mxu1 %v6144_v46 }
 0x2ed   : > { %2139 = vmatmul.mubr.bf16.gmra.mrb[84].mxu0 %v3713_v57 }
 0x2ee   : > { %2252 = vmatmul.mubr.bf16.gmra.mrb[84].mxu1 %v3713_v57  ;;  %2148 = vmatprep.mubr.bf16.mxu0 %v6144_v46 }
 0x2ef   : > { %2261 = vmatprep.mubr.bf16.mxu1 %v6144_v46 }
 0x2f5   : > { %2149 = vmatmul.mubr.bf16.gmra.mrb[88].mxu0 %v3714_v28 }
 0x2f6   : > { %2262 = vmatmul.mubr.bf16.gmra.mrb[88].mxu1 %v3714_v28  ;;  %2158 = vmatprep.mubr.bf16.mxu0 %v6144_v46 }
 0x2f7   : > { %2271 = vmatprep.mubr.bf16.mxu1 %v6144_v46 }
 0x2fd   : > { %2159 = vmatmul.mubr.bf16.gmra.mrb[92].mxu0 %v3715_v26 }
 0x2fe   : > { %2272 = vmatmul.mubr.bf16.gmra.mrb[92].mxu1 %v3715_v26  ;;  %2828 = vmatprep.mubr.bf16.mxu0 %v6144_v46 }
 0x2ff   : > { %2941 = vmatprep.mubr.bf16.mxu1 %v6144_v46 }
 0x398   : > { %v2090_v30 = vpop.f32.mrb[64].mxu0 }
 0x399   : > { %v2091_v32 = vadd.f32 %v2090_v30, %v1931_v14  ;;  %v2203_v37 = vpop.f32.mrb[64].mxu1  ;;  %v2092_v33 = vpop.f32.mrb[65].mxu0 }
 0x39a   : > { %v2204_v24 = vadd.f32 %v2203_v37, %v1931_v14  ;;  %v2093_v55 = vadd.f32 %v2092_v33, %v1931_v14  ;;  %v2205_v62 = vpop.f32.mrb[65].mxu1  ;;  %v2094_v52 = vpop.f32.mrb[66].mxu0 }
 0x39b   : > { %3980 = vtanh.f32 %v2091_v32  ;;  %v2206_v39 = vadd.f32 %v2205_v62, %v1931_v14  ;;  %v2095_v57 = vadd.f32 %v2094_v52, %v1936_v45  ;;  %v2207_v28 = vpop.f32.mrb[66].mxu1  ;;  %v2096_v44 = vpop.f32.mrb[67].mxu0 }
 0x39c   : > { %3982 = vtanh.f32 %v2204_v24  ;;  %v2208_v26 = vadd.f32 %v2207_v28, %v1936_v45  ;;  %v2209_v49 = vpop.f32.mrb[67].mxu1  ;;  %v2097_v46 = vadd.f32 %v2096_v44, %v1936_v45  ;;  %v1946_v30 = vpop.permute.xlu1 %1945 }
 0x39d   : > { %3984 = vtanh.f32 %v2093_v55  ;;  %v2210_v43 = vadd.f32 %v2209_v49, %v1936_v45 }
 0x39e   : > { %3986 = vtanh.f32 %v2206_v39 }
 0x39f   : > { %3988 = vtanh.f32 %v2095_v57 }
 0x3a0   : > { %3990 = vtanh.f32 %v2208_v26  ;;  %v2100_v37 = vpop.f32.mrb[68].mxu0 }
 0x3a1   : > { %3992 = vtanh.f32 %v2097_v46  ;;  %v2101_v33 = vadd.f32 %v2100_v37, %v1941_v35  ;;  %v2213_v41 = vpop.f32.mrb[68].mxu1  ;;  %v2102_v32 = vpop.f32.mrb[69].mxu0 }
 0x3a2   : > { %3994 = vtanh.f32 %v2210_v43  ;;  %v2214_v14 = vadd.f32 %v2213_v41, %v1941_v35  ;;  %v2103_v62 = vadd.f32 %v2102_v32, %v1941_v35  ;;  %v2215_v52 = vpop.f32.mrb[69].mxu1  ;;  %v2104_v24 = vpop.f32.mrb[70].mxu0 }
 0x3a3   : > { %3996 = vtanh.f32 %v2101_v33  ;;  %v2216_v28 = vadd.f32 %v2215_v52, %v1941_v35  ;;  %v2105_v55 = vadd.f32 %v2104_v24, %v1946_v30  ;;  %v2217_v44 = vpop.f32.mrb[70].mxu1  ;;  %v2106_v39 = vpop.f32.mrb[71].mxu0 }
 0x3a4   : > { %3998 = vtanh.f32 %v2214_v14  ;;  %v2218_v49 = vadd.f32 %v2217_v44, %v1946_v30  ;;  %v2219_v45 = vpop.f32.mrb[71].mxu1  ;;  %v2107_v26 = vadd.f32 %v2106_v39, %v1946_v30  ;;  %v1951_v43 = vpop.permute.xlu0 %1950 }
 0x3a5   : > { %v3981_v57 = vpop.eup %3980  ;;  %4000 = vtanh.f32 %v2103_v62  ;;  %v2220_v37 = vadd.f32 %v2219_v45, %v1946_v30 }
 0x3a6   : > { %v3983_v46 = vpop.eup %3982  ;;  %4002 = vtanh.f32 %v2216_v28  ;;  %v2346_v52 = vmul.f32 0.1, %v3981_v57 }
 0x3a7   : > { %v3985_v6 = vpop.eup %3984  ;;  %4004 = vtanh.f32 %v2105_v55  ;;  %v2348_v62 = vmul.f32 0.1, %v3983_v46 }
 0x3a8   : > { %v3987_v41 = vpop.eup %3986  ;;  %v2347_v32 = vmul.f32 0.1, %v3985_v6  ;;  %4006 = vtanh.f32 %v2218_v49  ;;  %v2110_v33 = vpop.f32.mrb[72].mxu0 }
 0x3a9   : > { %v3989_v35 = vpop.eup %3988  ;;  %v2349_v24 = vmul.f32 0.1, %v3987_v41  ;;  %4008 = vtanh.f32 %v2107_v26  ;;  %v2111_v14 = vadd.f32 %v2110_v33, %v1951_v43  ;;  %v2223_v44 = vpop.f32.mrb[72].mxu1 }
 0x3aa   : > { %v2112_v21 = vpop.f32.mrb[73].mxu0  ;;  %v3991_v53 = vpop.eup %3990  ;;  %v2350_v39 = vmul.f32 0.1, %v3989_v35  ;;  %4010 = vtanh.f32 %v2220_v37  ;;  %v2224_v28 = vadd.f32 %v2223_v44, %v1951_v43  ;;  %v5494_v10 = vadd.f32 %v2347_v32, %v5198_v34 }
 0x3ab   : > { %v2225_v30 = vpop.f32.mrb[73].mxu1  ;;  %v2114_v45 = vpop.f32.mrb[74].mxu0  ;;  %v5497_v6 = vadd.f32 %v2349_v24, %v5201_v54  ;;  %4012 = vtanh.f32 %v2111_v14  ;;  %v2113_v49 = vadd.f32 %v2112_v21, %v1951_v43  ;;  %v2352_v3 = vmul.f32 0.1, %v3991_v53 }
 0x3ac   : > { %v3993_v55 = vpop.eup %3992  ;;  %v2227_v57 = vpop.f32.mrb[74].mxu1  ;;  %4014 = vtanh.f32 %v2224_v28  ;;  %v2226_v37 = vadd.f32 %v2225_v30, %v1951_v43  ;;  %v5500_v59 = vadd.f32 %v2350_v39, %v5204_v18 }
 0x3ad   : > { %v2116_v26 = vpop.f32.mrb[75].mxu0  ;;  %v3995_v41 = vpop.eup %3994  ;;  %v2351_v46 = vmul.f32 0.1, %v3993_v55  ;;  %4016 = vtanh.f32 %v2113_v49  ;;  %v5509_v39 = vadd.f32 %v2352_v3, %v5213_v5 }
 0x3ae   : > { %v1956_v33 = vpop.permute.xlu1 %1955  ;;  %v2229_v35 = vpop.f32.mrb[75].mxu1  ;;  %6145 = vst [vmem:[#allocation29_spill] sm:$0xff] %v5500_v59  ;;  %v2353_v34 = vmul.f32 0.1, %v3995_v41  ;;  %4018 = vtanh.f32 %v2226_v37  ;;  %v6149_v41 = vld [vmem:[#allocation36_spill] sm:$0xff] }
 0x3af   : > { %v3997_v44 = vpop.eup %3996  ;;  %v2115_v32 = vadd.f32 %v2114_v45, %v1956_v33  ;;  %v5503_v24 = vadd.f32 %v2351_v46, %v5207_v19  ;;  %v2228_v14 = vadd.f32 %v2227_v57, %v1956_v33  ;;  %v2117_v28 = vadd.f32 %v2116_v26, %v1956_v33  ;;  %v1961_v18 = vpop.permute.xlu0 %1960  ;;  %6148 = vst [vmem:[#allocation32_spill] sm:$0xff] %v5509_v39  ;;  %v6150_v57 = vld [vmem:[#allocation37_spill] sm:$0xff] }
 0x3b0   : > { %v3999_v54 = vpop.eup %3998  ;;  %v2354_v21 = vmul.f32 0.1, %v3997_v44  ;;  %v5506_v53 = vadd.f32 %v2353_v34, %v5210_v4  ;;  %v2230_v55 = vadd.f32 %v2229_v35, %v1956_v33  ;;  %v2120_v19 = vpop.f32.mrb[76].mxu0  ;;  %v5512_v46 = vadd.f32 %v2346_v52, %v6149_v41 }
 0x3b1   : > { %6146 = vst [vmem:[#allocation30_spill] sm:$0xff] %v5503_v24  ;;  %v4001_v48 = vpop.eup %4000  ;;  %v2356_v43 = vmul.f32 0.1, %v3999_v54  ;;  %4020 = vtanh.f32 %v2115_v32  ;;  %v5515_v37 = vadd.f32 %v2348_v62, %v6150_v57  ;;  %v2620_v4 = vpack.c.bf16 %v5503_v24, %v5494_v10  ;;  %v2233_v26 = vpop.f32.mrb[76].mxu1 }
 0x3b2   : > { %6147 = vst [vmem:[#allocation31_spill] sm:$0xff] %v5506_v53  ;;  %v4003_v30 = vpop.eup %4002  ;;  %v2355_v45 = vmul.f32 0.1, %v4001_v48  ;;  %4022 = vtanh.f32 %v2228_v14  ;;  %v2122_v44 = vpop.f32.mrb[77].mxu0  ;;  %v5520_v5 = vadd.f32 %v2354_v21, %v5224_v16  ;;  %v2622_v3 = vpack.c.bf16 %v5506_v53, %v5497_v6 }
 0x3b3   : > { %v4005_v49 = vpop.eup %4004  ;;  %4024 = vtanh.f32 %v2117_v28  ;;  %v2357_v48 = vmul.f32 0.1, %v4003_v30  ;;  %v2235_v52 = vpop.f32.mrb[77].mxu1  ;;  %v5525_v62 = vadd.f32 %v2356_v43, %v5229_v29  ;;  %2796 = vmatprep.subr.bf16.mxu0 %v2620_v4  ;;  %v2121_v54 = vadd.f32 %v2120_v19, %v1961_v18 }
 0x3b4   : > { %v4007_v34 = vpop.eup %4006  ;;  %4026 = vtanh.f32 %v2230_v55  ;;  %v2124_v33 = vpop.f32.mrb[78].mxu0  ;;  %v5528_v32 = vadd.f32 %v2355_v45, %v5232_v31  ;;  %v2234_v14 = vadd.f32 %v2233_v26, %v1961_v18  ;;  %v2358_v30 = vmul.f32 0.1, %v4005_v49  ;;  %2909 = vmatprep.subr.bf16.mxu1 %v2622_v3 }
 0x3b5   : > { %v4009_v35 = vpop.eup %4008  ;;  %v2237_v28 = vpop.f32.mrb[78].mxu1  ;;  %v2619_v41 = vpack.c.bf16 %v5500_v59, %v5512_v46  ;;  %v2621_v57 = vpack.c.bf16 %v5509_v39, %v5515_v37  ;;  %v2360_v53 = vmul.f32 0.1, %v4007_v34  ;;  %4028 = vtanh.f32 %v2121_v54 }
 0x3b6   : > { %v2126_v16 = vpop.f32.mrb[79].mxu0  ;;  %v4011_v21 = vpop.eup %4010  ;;  %v2359_v55 = vmul.f32 0.1, %v4009_v35  ;;  %v2123_v45 = vadd.f32 %v2122_v44, %v1961_v18  ;;  %v5535_v26 = vadd.f32 %v2357_v48, %v5239_v8  ;;  %4030 = vtanh.f32 %v2234_v14 }
 0x3b7   : > { %v2239_v29 = vpop.f32.mrb[79].mxu1  ;;  %v4013_v43 = vpop.eup %4012  ;;  %v2361_v31 = vmul.f32 0.1, %v4011_v21  ;;  %2797 = vmatpush1.bf16.msra.mxu0 %v2619_v41  ;;  %2910 = vmatpush1.bf16.msra.mxu1 %v2621_v57  ;;  %v2236_v3 = vadd.f32 %v2235_v52, %v1961_v18  ;;  %v5544_v41 = vadd.f32 %v2358_v30, %v5248_v23  ;;  %v5547_v18 = vadd.f32 %v2360_v53, %v5251_v61 }
 0x3b8   : > { %v4015_v19 = vpop.eup %4014  ;;  %v1966_v4 = vpop.permute.xlu1 %1965  ;;  %v2362_v49 = vmul.f32 0.1, %v4013_v43  ;;  %v5538_v24 = vadd.f32 %v2359_v55, %v5242_v58  ;;  %4032 = vtanh.f32 %v2123_v45 }
 0x3b9   : > { %v4017_v35 = vpop.eup %4016  ;;  %v2364_v39 = vmul.f32 0.1, %v4015_v19  ;;  %v2125_v34 = vadd.f32 %v2124_v33, %v1966_v4  ;;  %v1971_v54 = vpop.permute.xlu0 %1970  ;;  %v5541_v44 = vadd.f32 %v2361_v31, %v5245_v7  ;;  %4034 = vtanh.f32 %v2236_v3 }
 0x3ba   : > { %v4019_v21 = vpop.eup %4018  ;;  %v2363_v59 = vmul.f32 0.1, %v4017_v35  ;;  %v2238_v8 = vadd.f32 %v2237_v28, %v1966_v4  ;;  %v2130_v48 = vpop.f32.mrb[80].mxu0  ;;  %v2127_v58 = vadd.f32 %v2126_v16, %v1966_v4  ;;  %v5550_v57 = vadd.f32 %v2362_v49, %v5254_v36 }
 0x3bb   : > { %v4021_v14 = vpop.eup %4020  ;;  %4036 = vtanh.f32 %v2125_v34  ;;  %v2243_v52 = vpop.f32.mrb[80].mxu1  ;;  %v5553_v7 = vadd.f32 %v2364_v39, %v5257_v2  ;;  %v2240_v28 = vadd.f32 %v2239_v29, %v1966_v4  ;;  %v2365_v61 = vmul.f32 0.1, %v4019_v21 }
 0x3bc   : > { %v2132_v33 = vpop.f32.mrb[81].mxu0  ;;  %v4023_v55 = vpop.eup %4022  ;;  %4038 = vtanh.f32 %v2238_v8  ;;  %v5556_v30 = vadd.f32 %v2363_v59, %v5260_v50  ;;  %v2624_v53 = vpack.c.bf16 %v5538_v24, %v5528_v32  ;;  %v2366_v19 = vmul.f32 0.1, %v4021_v14 }
 0x3bd   : > { %v2245_v43 = vpop.f32.mrb[81].mxu1  ;;  %v2134_v31 = vpop.f32.mrb[82].mxu0  ;;  %4040 = vtanh.f32 %v2127_v58  ;;  %v2626_v2 = vpack.c.bf16 %v5541_v44, %v5535_v26  ;;  %v2368_v29 = vmul.f32 0.1, %v4023_v55  ;;  %v2131_v50 = vadd.f32 %v2130_v48, %v1971_v54 }
 0x3be   : > { %v4025_v23 = vpop.eup %4024  ;;  %6151 = vst [vmem:[#allocation33_spill] sm:$0xff] %v5556_v30  ;;  %v2247_v16 = vpop.f32.mrb[82].mxu1  ;;  %4042 = vtanh.f32 %v2240_v28  ;;  %2798 = vmatprep.subr.bf16.mxu0 %v2624_v53  ;;  %v2244_v59 = vadd.f32 %v2243_v52, %v1971_v54  ;;  %v2623_v34 = vpack.c.bf16 %v5544_v41, %v5520_v5  ;;  %v2625_v21 = vpack.c.bf16 %v5547_v18, %v5525_v62 }
 0x3bf   : > { %v2136_v45 = vpop.f32.mrb[83].mxu0  ;;  %v4027_v36 = vpop.eup %4026  ;;  %v2367_v49 = vmul.f32 0.1, %v4025_v23  ;;  %2911 = vmatprep.subr.bf16.mxu1 %v2626_v2  ;;  %v2133_v8 = vadd.f32 %v2132_v33, %v1971_v54  ;;  %4044 = vtanh.f32 %v2131_v50  ;;  %v2246_v55 = vadd.f32 %v2245_v43, %v1971_v54  ;;  %v6154_v23 = vld [vmem:[#allocation38_spill] sm:$0xff] }
 0x3c0   : > { %v2249_v39 = vpop.f32.mrb[83].mxu1  ;;  %v2369_v4 = vmul.f32 0.1, %v4027_v36  ;;  %v1976_v3 = vpop.permute.xlu1 %1975  ;;  %v5576_v53 = vadd.f32 %v2366_v19, %v5280_v15  ;;  %4046 = vtanh.f32 %v2244_v59  ;;  %2799 = vmatpush1.bf16.msra.mxu0 %v2623_v34  ;;  %2912 = vmatpush1.bf16.msra.mxu1 %v2625_v21 }
 0x3c1   : > { %v5563_v35 = vadd.f32 %v2367_v49, %v5267_v38  ;;  %v4029_v14 = vpop.eup %4028  ;;  %v2135_v48 = vadd.f32 %v2134_v31, %v1976_v3  ;;  %v1981_v28 = vpop.permute.xlu0 %1980  ;;  %v5573_v38 = vadd.f32 %v2365_v61, %v6154_v23  ;;  %v2248_v36 = vadd.f32 %v2247_v16, %v1976_v3 }
 0x3c2   : > { %v5570_v58 = vadd.f32 %v2369_v4, %v5274_v60  ;;  %v4031_v52 = vpop.eup %4030  ;;  %6156 = vst [vmem:[#allocation37_spill] sm:$0xff] %v5576_v53  ;;  %v2140_v33 = vpop.f32.mrb[84].mxu0  ;;  %v5579_v60 = vadd.f32 %v2368_v29, %v5283_v17  ;;  %4048 = vtanh.f32 %v2133_v8  ;;  %v2137_v54 = vadd.f32 %v2136_v45, %v1976_v3 }
 0x3c3   : > { %6152 = vst [vmem:[#allocation34_spill] sm:$0xff] %v5563_v35  ;;  %6155 = vst [vmem:[#allocation36_spill] sm:$0xff] %v5573_v38  ;;  %v4033_v49 = vpop.eup %4032  ;;  %v2628_v43 = vpack.c.bf16 %v5563_v35, %v5556_v30  ;;  %v2253_v31 = vpop.f32.mrb[84].mxu1  ;;  %4050 = vtanh.f32 %v2246_v55  ;;  %v2250_v15 = vadd.f32 %v2249_v39, %v1976_v3  ;;  %v2370_v34 = vmul.f32 0.1, %v4029_v14 }
 0x3c4   : > { %6153 = vst [vmem:[#allocation35_spill] sm:$0xff] %v5570_v58  ;;  %6157 = vst [vmem:[#allocation38_spill] sm:$0xff] %v5579_v60  ;;  %v2142_v61 = vpop.f32.mrb[85].mxu0  ;;  %v4035_v2 = vpop.eup %4034  ;;  %v2371_v4 = vmul.f32 0.1, %v4033_v49  ;;  %v2630_v19 = vpack.c.bf16 %v5570_v58, %v5573_v38  ;;  %4052 = vtanh.f32 %v2135_v48  ;;  %v2141_v45 = vadd.f32 %v2140_v33, %v1981_v28  ;;  %v6158_v49 = vld [vmem:[#allocation39_spill] sm:$0xff] }
 0x3c5   : > { %v2255_v16 = vpop.f32.mrb[85].mxu1  ;;  %v2144_v50 = vpop.f32.mrb[86].mxu0  ;;  %v2373_v17 = vmul.f32 0.1, %v4035_v2  ;;  %2800 = vmatprep.subr.bf16.mxu0 %v2628_v43  ;;  %v2372_v23 = vmul.f32 0.1, %v4031_v52  ;;  %4054 = vtanh.f32 %v2248_v36  ;;  %v2254_v55 = vadd.f32 %v2253_v31, %v1981_v28 }
 0x3c6   : > { %v4037_v59 = vpop.eup %4036  ;;  %v2257_v29 = vpop.f32.mrb[86].mxu1  ;;  %2913 = vmatprep.subr.bf16.mxu1 %v2630_v19  ;;  %v5586_v58 = vadd.f32 %v2371_v4, %v6158_v49  ;;  %v6159_v38 = vld [vmem:[#allocation40_spill] sm:$0xff]  ;;  %4056 = vtanh.f32 %v2137_v54  ;;  %v2627_v14 = vpack.c.bf16 %v5576_v53, %v5550_v57  ;;  %v2629_v52 = vpack.c.bf16 %v5579_v60, %v5553_v7  ;;  %v6161_v31 = vld [vmem:[#allocation41_spill] sm:$0xff]  ;;  %v6163_v54 = vld [vmem:[#allocation42_spill] sm:$0xff] }
 0x3c7   : > { %v2146_v21 = vpop.f32.mrb[87].mxu0  ;;  %v4039_v8 = vpop.eup %4038  ;;  %v2374_v35 = vmul.f32 0.1, %v4037_v59  ;;  %v5589_v30 = vadd.f32 %v2373_v17, %v6159_v38  ;;  %4058 = vtanh.f32 %v2250_v15  ;;  %v2143_v38 = vadd.f32 %v2142_v61, %v1981_v28  ;;  %v6165_v49 = vld [vmem:[#allocation9_spill] sm:$0xff]  ;;  %v6167_v61 = vld [vmem:[#allocation10_spill] sm:$0xff] }
 0x3c8   : > { %v2259_v39 = vpop.f32.mrb[87].mxu1  ;;  %v4041_v3 = vpop.eup %4040  ;;  %v2376_v33 = vmul.f32 0.1, %v4039_v8  ;;  %4060 = vtanh.f32 %v2141_v45  ;;  %2801 = vmatpush1.bf16.msra.mxu0 %v2627_v14  ;;  %2914 = vmatpush1.bf16.msra.mxu1 %v2629_v52  ;;  %v2256_v17 = vadd.f32 %v2255_v16, %v1981_v28  ;;  %v6169_v52 = vld [vmem:[#allocation11_spill] sm:$0xff] }
 0x3c9   : > { %6160 = vst [vmem:[#allocation39_spill] sm:$0xff] %v5589_v30  ;;  %v4043_v48 = vpop.eup %4042  ;;  %v2375_v43 = vmul.f32 0.1, %v4041_v3  ;;  %v1986_v36 = vpop.permute.xlu1 %1985  ;;  %v5596_v2 = vadd.f32 %v2374_v35, %v6161_v31  ;;  %4062 = vtanh.f32 %v2254_v55 }
 0x3ca   : > { %v2377_v4 = vmul.f32 0.1, %v4043_v48  ;;  %v1991_v19 = vpop.permute.xlu0 %1990  ;;  %v2145_v8 = vadd.f32 %v2144_v50, %v1986_v36  ;;  %v2150_v15 = vpop.f32.mrb[88].mxu0  ;;  %4064 = vtanh.f32 %v2143_v38  ;;  %v2258_v35 = vadd.f32 %v2257_v29, %v1986_v36 }
 0x3cb   : > { %6162 = vst [vmem:[#allocation40_spill] sm:$0xff] %v5596_v2  ;;  %v5599_v59 = vadd.f32 %v2375_v43, %v6163_v54  ;;  %v4045_v3 = vpop.eup %4044  ;;  %v2147_v31 = vadd.f32 %v2146_v21, %v1986_v36  ;;  %v2263_v48 = vpop.f32.mrb[88].mxu1  ;;  %v5605_v53 = vadd.f32 %v2376_v33, %v6167_v61  ;;  %4066 = vtanh.f32 %v2256_v17 }
 0x3cc   : > { %v5602_v60 = vadd.f32 %v2377_v4, %v6165_v49  ;;  %v2152_v45 = vpop.f32.mrb[89].mxu0  ;;  %v4047_v14 = vpop.eup %4046  ;;  %v2260_v43 = vadd.f32 %v2259_v39, %v1986_v36  ;;  %v5610_v4 = vadd.f32 %v2370_v34, %v6169_v52  ;;  %4068 = vtanh.f32 %v2145_v8  ;;  %v6170_v49 = vld [vmem:[#allocation12_spill] sm:$0xff] }
 0x3cd   : > { %6164 = vst [vmem:[#allocation41_spill] sm:$0xff] %v5599_v59  ;;  %6168 = vst [vmem:[#allocation9_spill] sm:$0xff] %v5605_v53  ;;  %v2632_v28 = vpack.c.bf16 %v5599_v59, %v5586_v58  ;;  %v2265_v16 = vpop.f32.mrb[89].mxu1  ;;  %v2154_v50 = vpop.f32.mrb[90].mxu0  ;;  %v2151_v21 = vadd.f32 %v2150_v15, %v1991_v19  ;;  %v5615_v17 = vadd.f32 %v2372_v23, %v6170_v49  ;;  %4070 = vtanh.f32 %v2258_v35 }
 0x3ce   : > { %6166 = vst [vmem:[#allocation42_spill] sm:$0xff] %v5602_v60  ;;  %v4049_v55 = vpop.eup %4048  ;;  %v2634_v29 = vpack.c.bf16 %v5602_v60, %v5589_v30  ;;  %v2267_v38 = vpop.f32.mrb[90].mxu1  ;;  %v2264_v39 = vadd.f32 %v2263_v48, %v1991_v19  ;;  %4072 = vtanh.f32 %v2147_v31  ;;  %v2631_v34 = vpack.c.bf16 %v5596_v2, %v5610_v4 }
 0x3cf   : > { %v2156_v54 = vpop.f32.mrb[91].mxu0  ;;  %v4051_v33 = vpop.eup %4050  ;;  %2802 = vmatprep.subr.bf16.mxu0 %v2632_v28  ;;  %v2379_v59 = vmul.f32 0.1, %v4049_v55  ;;  %v2378_v52 = vmul.f32 0.1, %v4045_v3  ;;  %4074 = vtanh.f32 %v2260_v43  ;;  %v2633_v60 = vpack.c.bf16 %v5605_v53, %v5615_v17 }
 0x3d0   : > { %v2269_v36 = vpop.f32.mrb[91].mxu1  ;;  %v4053_v61 = vpop.eup %4052  ;;  %2915 = vmatprep.subr.bf16.mxu1 %v2634_v29  ;;  %v2381_v15 = vmul.f32 0.1, %v4051_v33  ;;  %v2380_v49 = vmul.f32 0.1, %v4047_v14  ;;  %4076 = vtanh.f32 %v2151_v21  ;;  %2803 = vmatpush1.bf16.msra.mxu0 %v2631_v34  ;;  %v2153_v48 = vadd.f32 %v2152_v45, %v1991_v19 }
 0x3d1   : > { %v4055_v8 = vpop.eup %4054  ;;  %v2382_v35 = vmul.f32 0.1, %v4053_v61  ;;  %v1996_v55 = vpop.permute.xlu1 %1995  ;;  %4078 = vtanh.f32 %v2264_v39  ;;  %2916 = vmatpush1.bf16.msra.mxu1 %v2633_v60  ;;  %v2266_v2 = vadd.f32 %v2265_v16, %v1991_v19  ;;  %v5622_v43 = vadd.f32 %v2379_v59, %v5326_v1 }
 0x3d2   : > { %v4057_v23 = vpop.eup %4056  ;;  %v2384_v31 = vmul.f32 0.1, %v4055_v8  ;;  %v2160_v30 = vpop.f32.mrb[92].mxu0  ;;  %4080 = vtanh.f32 %v2153_v48  ;;  %v2155_v53 = vadd.f32 %v2154_v50, %v1996_v55  ;;  %v5625_v45 = vadd.f32 %v2381_v15, %v5329_v51  ;;  %v6171_v8 = vld [vmem:[#allocation13_spill] sm:$0xff] }
 0x3d3   : > { %v4059_v28 = vpop.eup %4058  ;;  %v2383_v29 = vmul.f32 0.1, %v4057_v23  ;;  %v2273_v14 = vpop.f32.mrb[92].mxu1  ;;  %4082 = vtanh.f32 %v2266_v2  ;;  %v2268_v60 = vadd.f32 %v2267_v38, %v1996_v55  ;;  %v2157_v50 = vadd.f32 %v2156_v54, %v1996_v55 }
 0x3d4   : > { %v4061_v3 = vpop.eup %4060  ;;  %v2385_v33 = vmul.f32 0.1, %v4059_v28  ;;  %v2162_v61 = vpop.f32.mrb[93].mxu0  ;;  %4084 = vtanh.f32 %v2155_v53  ;;  %v5634_v51 = vadd.f32 %v2382_v35, %v5338_v0  ;;  %v2270_v2 = vadd.f32 %v2269_v36, %v1996_v55 }
 0x3d5   : > { %v4063_v21 = vpop.eup %4062  ;;  %v5628_v34 = vadd.f32 %v2383_v29, %v5332_v12  ;;  %v2275_v19 = vpop.f32.mrb[93].mxu1  ;;  %v2386_v59 = vmul.f32 0.1, %v4061_v3  ;;  %v5637_v12 = vadd.f32 %v2384_v31, %v5341_v11  ;;  %4086 = vtanh.f32 %v2268_v60 }
 0x3d6   : > { %v2164_v16 = vpop.f32.mrb[94].mxu0  ;;  %v4065_v39 = vpop.eup %4064  ;;  %v5631_v1 = vadd.f32 %v2385_v33, %v6171_v8  ;;  %v5640_v29 = vadd.f32 %v2378_v52, %v5344_v25  ;;  %v5643_v3 = vadd.f32 %v2380_v49, %v5347_v63  ;;  %4088 = vtanh.f32 %v2157_v50 }
 0x3d7   : > { %v2277_v23 = vpop.f32.mrb[94].mxu1  ;;  %v2166_v48 = vpop.f32.mrb[95].mxu0  ;;  %v2636_v53 = vpack.c.bf16 %v5628_v34, %v5622_v43  ;;  %v2388_v35 = vmul.f32 0.1, %v4063_v21  ;;  %v2387_v33 = vmul.f32 0.1, %v4065_v39  ;;  %4090 = vtanh.f32 %v2270_v2 }
 0x3d8   : > { %v4067_v28 = vpop.eup %4066  ;;  %v2279_v38 = vpop.f32.mrb[95].mxu1  ;;  %v2638_v11 = vpack.c.bf16 %v5631_v1, %v5625_v45  ;;  %v5650_v55 = vadd.f32 %v2386_v59, %v5354_v56  ;;  %v2635_v21 = vpack.c.bf16 %v5634_v51, %v5640_v29  ;;  %v2637_v39 = vpack.c.bf16 %v5637_v12, %v5643_v3 }
 0x3d9   : > { %v4069_v15 = vpop.eup %4068  ;;  %v2001_v0 = vpop.permute.xlu0 %2000  ;;  %v2389_v25 = vmul.f32 0.1, %v4067_v28  ;;  %2804 = vmatprep.subr.bf16.mxu0 %v2636_v53 }
 0x3da   : > { %v4071_v54 = vpop.eup %4070  ;;  %v2161_v63 = vadd.f32 %v2160_v30, %v2001_v0  ;;  %v2274_v52 = vadd.f32 %v2273_v14, %v2001_v0  ;;  %v2390_v31 = vmul.f32 0.1, %v4069_v15  ;;  %2917 = vmatprep.subr.bf16.mxu1 %v2638_v11  ;;  %v2163_v56 = vadd.f32 %v2162_v61, %v2001_v0  ;;  %v2006_v28 = vpop.permute.xlu1 %2005  ;;  %2805 = vmatpush1.bf16.msra.mxu0 %v2635_v21 }
 0x3db   : > { %v4073_v36 = vpop.eup %4072  ;;  %v2392_v50 = vmul.f32 0.1, %v4071_v54  ;;  %v5657_v30 = vadd.f32 %v2388_v35, %v5361_v40  ;;  %v5660_v14 = vadd.f32 %v2387_v33, %v5364_v42  ;;  %2918 = vmatpush1.bf16.msra.mxu1 %v2637_v39  ;;  %v2276_v15 = vadd.f32 %v2275_v19, %v2001_v0 }
 0x3dc   : > { %v4075_v49 = vpop.eup %4074  ;;  %v2391_v60 = vmul.f32 0.1, %v4073_v36  ;;  %4092 = vtanh.f32 %v2161_v63  ;;  %v5663_v11 = vadd.f32 %v2389_v25, %v5367_v13  ;;  %v2165_v61 = vadd.f32 %v2164_v16, %v2006_v28 }
 0x3dd   : > { %v4077_v8 = vpop.eup %4076  ;;  %v2393_v2 = vmul.f32 0.1, %v4075_v49  ;;  %4094 = vtanh.f32 %v2274_v52  ;;  %v5669_v40 = vadd.f32 %v2390_v31, %v5373_v47  ;;  %v2278_v35 = vadd.f32 %v2277_v23, %v2006_v28 }
 0x3de   : > { %v4079_v59 = vpop.eup %4078  ;;  %v5666_v54 = vadd.f32 %v2391_v60, %v5370_v22  ;;  %4096 = vtanh.f32 %v2163_v56  ;;  %v5675_v19 = vadd.f32 %v2392_v50, %v5379_v20  ;;  %v2394_v13 = vmul.f32 0.1, %v4077_v8  ;;  %v6172_v8 = vld [vmem:[#allocation14_spill] sm:$0xff] }
 0x3df   : > { %v4081_v53 = vpop.eup %4080  ;;  %v5672_v42 = vadd.f32 %v2393_v2, %v5376_v9  ;;  %4098 = vtanh.f32 %v2276_v15  ;;  %v2167_v0 = vadd.f32 %v2166_v48, %v2006_v28  ;;  %v2280_v16 = vadd.f32 %v2279_v38, %v2006_v28  ;;  %v6173_v2 = vld [vmem:[#allocation15_spill] sm:$0xff]  ;;  %v6175_v15 = vld [vmem:[#allocation17_spill] sm:$0xff] }
 0x3e0   : > { %v4083_v36 = vpop.eup %4082  ;;  %4100 = vtanh.f32 %v2165_v61  ;;  %v2395_v25 = vmul.f32 0.1, %v4081_v53  ;;  %v2640_v9 = vpack.c.bf16 %v5666_v54, %v5660_v14  ;;  %v2396_v31 = vmul.f32 0.1, %v4079_v59  ;;  %v6174_v59 = vld [vmem:[#allocation16_spill] sm:$0xff]  ;;  %v6176_v61 = vld [vmem:[#allocation18_spill] sm:$0xff] }
 0x3e1   : > { %v4085_v33 = vpop.eup %4084  ;;  %4102 = vtanh.f32 %v2278_v35  ;;  %v2397_v47 = vmul.f32 0.1, %v4083_v36  ;;  %v2642_v20 = vpack.c.bf16 %v5672_v42, %v5663_v11  ;;  %v2639_v38 = vpack.c.bf16 %v5669_v40, %v5650_v55  ;;  %v6177_v35 = vld [vmem:[#allocation19_spill] sm:$0xff] }
 0x3e2   : > { %v4087_v22 = vpop.eup %4086  ;;  %v2398_v63 = vmul.f32 0.1, %v4085_v33  ;;  %4104 = vtanh.f32 %v2167_v0  ;;  %2806 = vmatprep.subr.bf16.mxu0 %v2640_v9  ;;  %v2641_v39 = vpack.c.bf16 %v5675_v19, %v5657_v30  ;;  %v5689_v50 = vadd.f32 %v2395_v25, %v6172_v8 }
 0x3e3   : > { %v4089_v52 = vpop.eup %4088  ;;  %v2400_v49 = vmul.f32 0.1, %v4087_v22  ;;  %4106 = vtanh.f32 %v2280_v16  ;;  %2919 = vmatprep.subr.bf16.mxu1 %v2642_v20  ;;  %v5698_v53 = vadd.f32 %v2394_v13, %v6175_v15  ;;  %v5701_v36 = vadd.f32 %v2397_v47, %v6176_v61  ;;  %2807 = vmatpush1.bf16.msra.mxu0 %v2639_v38  ;;  %v6178_v22 = vld [vmem:[#allocation20_spill] sm:$0xff]  ;;  %v6179_v15 = vld [vmem:[#allocation21_spill] sm:$0xff] }
 0x3e4   : > { %v4091_v23 = vpop.eup %4090  ;;  %v2399_v60 = vmul.f32 0.1, %v4089_v52  ;;  %v5682_v48 = vadd.f32 %v2398_v63, %v5386_v27  ;;  %2920 = vmatpush1.bf16.msra.mxu1 %v2641_v39  ;;  %v5707_v25 = vadd.f32 %v2396_v31, %v6178_v22  ;;  %v6181_v22 = vld [vmem:[#allocation22_spill] sm:$0xff] }
 0x3e5   : > { %v2401_v21 = vmul.f32 0.1, %v4091_v23  ;;  %v5692_v56 = vadd.f32 %v2400_v49, %v6173_v2 }
 0x3e6   : > { %v5695_v28 = vadd.f32 %v2399_v60, %v6174_v59  ;;  %v4093_v27 = vpop.eup %4092  ;;  %v2643_v52 = vpack.c.bf16 %v5682_v48, %v5698_v53 }
 0x3e7   : > { %v5704_v33 = vadd.f32 %v2401_v21, %v6177_v35  ;;  %v4095_v0 = vpop.eup %4094  ;;  %v2645_v49 = vpack.c.bf16 %v5692_v56, %v5707_v25  ;;  %v2402_v21 = vmul.f32 0.1, %v4093_v27 }
 0x3e8   : > { %v2644_v63 = vpack.c.bf16 %v5695_v28, %v5689_v50  ;;  %v4097_v16 = vpop.eup %4096  ;;  %v2404_v2 = vmul.f32 0.1, %v4095_v0  ;;  %v6191_v0 = vld [vmem:[#allocation27_spill] sm:$0xff] }
 0x3e9   : > { %v2646_v13 = vpack.c.bf16 %v5704_v33, %v5701_v36  ;;  %v4099_v47 = vpop.eup %4098  ;;  %v2403_v31 = vmul.f32 0.1, %v4097_v16  ;;  %v6185_v16 = vld [vmem:[#allocation24_spill] sm:$0xff] }
 0x3ea   : > { %2808 = vmatprep.subr.bf16.mxu0 %v2644_v63  ;;  %v4101_v9 = vpop.eup %4100  ;;  %v2405_v38 = vmul.f32 0.1, %v4099_v47  ;;  %v6189_v47 = vld [vmem:[#allocation26_spill] sm:$0xff] }
 0x3eb   : > { %2921 = vmatprep.subr.bf16.mxu1 %v2646_v13  ;;  %2809 = vmatpush1.bf16.msra.mxu0 %v2643_v52  ;;  %v4103_v23 = vpop.eup %4102  ;;  %v2406_v60 = vmul.f32 0.1, %v4101_v9  ;;  %v5721_v63 = vadd.f32 %v2403_v31, %v6181_v22  ;;  %v6183_v13 = vld [vmem:[#allocation23_spill] sm:$0xff]  ;;  %v3719_v22 = vld [vmem:[%s5971_s1 + $0xd8] sm:$0xff]  }
 0x3ec   : > { %2922 = vmatpush1.bf16.msra.mxu1 %v2645_v49  ;;  %v4105_v20 = vpop.eup %4104  ;;  %v2408_v39 = vmul.f32 0.1, %v4103_v23  ;;  %v6187_v49 = vld [vmem:[#allocation25_spill] sm:$0xff]  ;;  %v5733_v23 = vadd.f32 %v2405_v38, %v6189_v47  ;;  %v3723_v47 = vld [vmem:[%s5971_s1 + $0xf8] sm:$0xff]  }
 0x3ed   : > { %v4107_v8 = vpop.eup %4106  ;;  %v2407_v59 = vmul.f32 0.1, %v4105_v20  ;;  %v5718_v61 = vadd.f32 %v2406_v60, %v6179_v15  ;;  %6182 = vst [vmem:[#allocation11_spill] sm:$0xff] %v5721_v63  ;;  %v5730_v27 = vadd.f32 %v2402_v21, %v6187_v49  ;;  %v6193_v60 = vld [vmem:[#allocation28_spill] sm:$0xff]  ;;  %v3716_v38 = vld [vmem:[%s5971_s1 + $0xc0] sm:$0xff]   ;;  %v3717_v15 = vld [vmem:[%s5971_s1 + $0xc8] sm:$0xff]  }
 0x3ee   : > { %v2409_v35 = vmul.f32 0.1, %v4107_v8  ;;  %v5724_v52 = vadd.f32 %v2408_v39, %v6183_v13  ;;  %6190 = vst [vmem:[#allocation15_spill] sm:$0xff] %v5733_v23  ;;  %v5739_v8 = vadd.f32 %v2404_v2, %v6193_v60  ;;  %v6195_v2 = vmov 0   ;;  %v3720_v13 = vld [vmem:[%s5971_s1 + $0xe0] sm:$0xff]   ;;  %v3722_v49 = vld [vmem:[%s5971_s1 + $0xf0] sm:$0xff]   ;;  %v2676_v60 = vpop.permute.xlu1 %2675 }
 0x3ef   : > { %6180 = vst [vmem:[#allocation10_spill] sm:$0xff] %v5718_v61  ;;  %v5727_v9 = vadd.f32 %v2407_v59, %v6185_v16  ;;  %6188 = vst [vmem:[#allocation14_spill] sm:$0xff] %v5730_v27  ;;  %v2647_v59 = vpack.c.bf16 %v5718_v61, %v5730_v27  ;;  %v3721_v16 = vld [vmem:[%s5971_s1 + $0xe8] sm:$0xff]  }
 0x3f0   : > { %6184 = vst [vmem:[#allocation12_spill] sm:$0xff] %v5724_v52  ;;  %v5736_v20 = vadd.f32 %v2409_v35, %v6191_v0  ;;  %6194 = vst [vmem:[#allocation17_spill] sm:$0xff] %v5739_v8  ;;  %v2649_v21 = vpack.c.bf16 %v5724_v52, %v5739_v8  ;;  %v3718_v35 = vld [vmem:[%s5971_s1 + $0xd0] sm:$0xff]   ;;  %v2671_v0 = vpop.permute.xlu0 %2670  ;;  %v6197_v8 = vld [vmem:[#allocation32_spill] sm:$0xff] }
 0x3f1   : > { %6186 = vst [vmem:[#allocation13_spill] sm:$0xff] %v5727_v9  ;;  %v2648_v31 = vpack.c.bf16 %v5727_v9, %v5721_v63 }
 0x3f2   : > { %6192 = vst [vmem:[#allocation16_spill] sm:$0xff] %v5736_v20  ;;  %v2650_v39 = vpack.c.bf16 %v5736_v20, %v5733_v23 }
 0x3f3   : > { %2810 = vmatprep.subr.bf16.mxu0 %v2648_v31 }
 0x3f4   : > { %2923 = vmatprep.subr.bf16.mxu1 %v2650_v39  ;;  %2811 = vmatpush1.bf16.msra.mxu0 %v2647_v59  ;;  %v2681_v61 = vpop.permute.xlu0 %2680 }
 0x3f5   : > { %2924 = vmatpush1.bf16.msra.mxu1 %v2649_v21 }
 0x3f7   : > { %2829 = vmatmul.mubr.bf16.vlgmr.msra.gmra.mrb[96].mxu0 %v3716_v38 }
 0x3f8   : > { %2942 = vmatmul.mubr.bf16.vlgmr.msra.gmra.mrb[96].mxu1 %v3716_v38  ;;  %2838 = vmatprep.mubr.bf16.mxu0 %v6195_v2 }
 0x3f9   : > { %2951 = vmatprep.mubr.bf16.mxu1 %v6195_v2 }
 0x3ff   : > { %2839 = vmatmul.mubr.bf16.gmra.mrb[100].mxu0 %v3717_v15 }
 0x400   : > { %2952 = vmatmul.mubr.bf16.gmra.mrb[100].mxu1 %v3717_v15  ;;  %2848 = vmatprep.mubr.bf16.mxu0 %v6195_v2 }
 0x401   : > { %2961 = vmatprep.mubr.bf16.mxu1 %v6195_v2 }
 0x407   : > { %2849 = vmatmul.mubr.bf16.gmra.mrb[104].mxu0 %v3718_v35 }
 0x408   : > { %2962 = vmatmul.mubr.bf16.gmra.mrb[104].mxu1 %v3718_v35  ;;  %2858 = vmatprep.mubr.bf16.mxu0 %v6195_v2 }
 0x409   : > { %2971 = vmatprep.mubr.bf16.mxu1 %v6195_v2 }
 0x40f   : > { %2859 = vmatmul.mubr.bf16.gmra.mrb[108].mxu0 %v3719_v22 }
 0x410   : > { %2972 = vmatmul.mubr.bf16.gmra.mrb[108].mxu1 %v3719_v22  ;;  %2868 = vmatprep.mubr.bf16.mxu0 %v6195_v2 }
 0x411   : > { %2981 = vmatprep.mubr.bf16.mxu1 %v6195_v2 }
 0x417   : > { %2869 = vmatmul.mubr.bf16.gmra.mrb[112].mxu0 %v3720_v13 }
 0x418   : > { %2982 = vmatmul.mubr.bf16.gmra.mrb[112].mxu1 %v3720_v13  ;;  %2878 = vmatprep.mubr.bf16.mxu0 %v6195_v2 }
 0x419   : > { %2991 = vmatprep.mubr.bf16.mxu1 %v6195_v2 }
 0x41f   : > { %2879 = vmatmul.mubr.bf16.gmra.mrb[116].mxu0 %v3721_v16 }
 0x420   : > { %2992 = vmatmul.mubr.bf16.gmra.mrb[116].mxu1 %v3721_v16  ;;  %2888 = vmatprep.mubr.bf16.mxu0 %v6195_v2 }
 0x421   : > { %3001 = vmatprep.mubr.bf16.mxu1 %v6195_v2 }
 0x427   : > { %2889 = vmatmul.mubr.bf16.gmra.mrb[120].mxu0 %v3722_v49 }
 0x428   : > { %3002 = vmatmul.mubr.bf16.gmra.mrb[120].mxu1 %v3722_v49  ;;  %2898 = vmatprep.mubr.bf16.mxu0 %v6195_v2 }
 0x429   : > { %3011 = vmatprep.mubr.bf16.mxu1 %v6195_v2 }
 0x42f   : > { %2899 = vmatmul.mubr.bf16.gmra.mrb[124].mxu0 %v3723_v47 }
 0x430   : > { %3012 = vmatmul.mubr.bf16.gmra.mrb[124].mxu1 %v3723_v47 }
 0x4ca   : > { %v2830_v31 = vpop.f32.mrb[96].mxu0 }
 0x4cb   : > { %v2831_v39 = vadd.f32 %v2830_v31, %v2671_v0  ;;  %v2943_v59 = vpop.f32.mrb[96].mxu1  ;;  %v2832_v21 = vpop.f32.mrb[97].mxu0 }
 0x4cc   : > { %v2944_v38 = vadd.f32 %v2943_v59, %v2671_v0  ;;  %v2833_v15 = vadd.f32 %v2832_v21, %v2671_v0  ;;  %v2945_v35 = vpop.f32.mrb[97].mxu1  ;;  %v2834_v22 = vpop.f32.mrb[98].mxu0 }
 0x4cd   : > { %4108 = vtanh.f32 %v2831_v39  ;;  %v2946_v13 = vadd.f32 %v2945_v35, %v2671_v0  ;;  %v2835_v16 = vadd.f32 %v2834_v22, %v2676_v60  ;;  %v2947_v2 = vpop.f32.mrb[98].mxu1  ;;  %v2836_v49 = vpop.f32.mrb[99].mxu0 }
 0x4ce   : > { %4110 = vtanh.f32 %v2944_v38  ;;  %v2948_v20 = vadd.f32 %v2947_v2, %v2676_v60  ;;  %v2949_v9 = vpop.f32.mrb[99].mxu1  ;;  %v2837_v47 = vadd.f32 %v2836_v49, %v2676_v60  ;;  %v2686_v31 = vpop.permute.xlu1 %2685 }
 0x4cf   : > { %4112 = vtanh.f32 %v2833_v15  ;;  %v2950_v52 = vadd.f32 %v2949_v9, %v2676_v60 }
 0x4d0   : > { %4114 = vtanh.f32 %v2946_v13 }
 0x4d1   : > { %4116 = vtanh.f32 %v2835_v16 }
 0x4d2   : > { %4118 = vtanh.f32 %v2948_v20  ;;  %v2840_v59 = vpop.f32.mrb[100].mxu0 }
 0x4d3   : > { %4120 = vtanh.f32 %v2837_v47  ;;  %v2841_v21 = vadd.f32 %v2840_v59, %v2681_v61  ;;  %v2953_v23 = vpop.f32.mrb[100].mxu1  ;;  %v2842_v39 = vpop.f32.mrb[101].mxu0 }
 0x4d4   : > { %4122 = vtanh.f32 %v2950_v52  ;;  %v2954_v0 = vadd.f32 %v2953_v23, %v2681_v61  ;;  %v2843_v35 = vadd.f32 %v2842_v39, %v2681_v61  ;;  %v2955_v22 = vpop.f32.mrb[101].mxu1  ;;  %v2844_v38 = vpop.f32.mrb[102].mxu0 }
 0x4d5   : > { %4124 = vtanh.f32 %v2841_v21  ;;  %v2956_v2 = vadd.f32 %v2955_v22, %v2681_v61  ;;  %v2845_v15 = vadd.f32 %v2844_v38, %v2686_v31  ;;  %v2957_v49 = vpop.f32.mrb[102].mxu1  ;;  %v2846_v13 = vpop.f32.mrb[103].mxu0 }
 0x4d6   : > { %4126 = vtanh.f32 %v2954_v0  ;;  %v2958_v9 = vadd.f32 %v2957_v49, %v2686_v31  ;;  %v2959_v60 = vpop.f32.mrb[103].mxu1  ;;  %v2847_v20 = vadd.f32 %v2846_v13, %v2686_v31  ;;  %v2691_v21 = vpop.permute.xlu0 %2690 }
 0x4d7   : > { %v4109_v16 = vpop.eup %4108  ;;  %4128 = vtanh.f32 %v2843_v35  ;;  %v2960_v63 = vadd.f32 %v2959_v60, %v2686_v31 }
 0x4d8   : > { %v4111_v47 = vpop.eup %4110  ;;  %v3086_v59 = vmul.f32 0.1, %v4109_v16  ;;  %4130 = vtanh.f32 %v2956_v2 }
 0x4d9   : > { %v4113_v52 = vpop.eup %4112  ;;  %v3088_v23 = vmul.f32 0.1, %v4111_v47  ;;  %4132 = vtanh.f32 %v2845_v15 }
 0x4da   : > { %v4115_v39 = vpop.eup %4114  ;;  %v3150_v61 = vadd.f32 %v3086_v59, %v5512_v46  ;;  %v3087_v22 = vmul.f32 0.1, %v4113_v52  ;;  %4134 = vtanh.f32 %v2958_v9  ;;  %v2850_v0 = vpop.f32.mrb[104].mxu0 }
 0x4db   : > { %v4117_v38 = vpop.eup %4116  ;;  %v3152_v49 = vadd.f32 %v3088_v23, %v5515_v37  ;;  %v3089_v35 = vmul.f32 0.1, %v4115_v39  ;;  %4136 = vtanh.f32 %v2847_v20  ;;  %v2851_v13 = vadd.f32 %v2850_v0, %v2691_v21  ;;  %v2963_v16 = vpop.f32.mrb[104].mxu1 }
 0x4dc   : > { %v2852_v2 = vpop.f32.mrb[105].mxu0  ;;  %v4119_v31 = vpop.eup %4118  ;;  %3342 = vst [vmem:[%s5791_s27] sm:$0xff] %v3150_v61  ;;  %v3151_v46 = vadd.f32 %v3087_v22, %v5494_v10  ;;  %v3090_v15 = vmul.f32 0.1, %v4117_v38  ;;  %4138 = vtanh.f32 %v2960_v63  ;;  %v2964_v9 = vadd.f32 %v2963_v16, %v2691_v21  ;;  %v6196_v10 = vld [vmem:[#allocation29_spill] sm:$0xff] }
 0x4dd   : > { %v2965_v60 = vpop.f32.mrb[105].mxu1  ;;  %v2854_v37 = vpop.f32.mrb[106].mxu0  ;;  %3344 = vst [vmem:[%s5791_s27 + $0x10] sm:$0xff] %v3152_v49  ;;  %v3153_v20 = vadd.f32 %v3089_v35, %v5497_v6  ;;  %v3092_v59 = vmul.f32 0.1, %v4119_v31  ;;  %4140 = vtanh.f32 %v2851_v13  ;;  %v2853_v52 = vadd.f32 %v2852_v2, %v2691_v21  ;;  %v6198_v31 = vld [vmem:[#allocation30_spill] sm:$0xff] }
 0x4de   : > { %v4121_v47 = vpop.eup %4120  ;;  %v2967_v23 = vpop.f32.mrb[106].mxu1  ;;  %3343 = vst [vmem:[%s5791_s27 + $0x8] sm:$0xff] %v3151_v46  ;;  %v3154_v22 = vadd.f32 %v3090_v15, %v6196_v10  ;;  %4142 = vtanh.f32 %v2964_v9  ;;  %v2966_v38 = vadd.f32 %v2965_v60, %v2691_v21  ;;  %v6199_v21 = vld [vmem:[#allocation31_spill] sm:$0xff] }
 0x4df   : > { %v2856_v39 = vpop.f32.mrb[107].mxu0  ;;  %v4123_v61 = vpop.eup %4122  ;;  %v3091_v63 = vmul.f32 0.1, %v4121_v47  ;;  %3345 = vst [vmem:[%s5791_s27 + $0x18] sm:$0xff] %v3153_v20  ;;  %v3156_v6 = vadd.f32 %v3092_v59, %v6197_v8  ;;  %4144 = vtanh.f32 %v2853_v52 }
 0x4e0   : > { %v2696_v0 = vpop.permute.xlu1 %2695  ;;  %v2969_v16 = vpop.f32.mrb[107].mxu1  ;;  %v3093_v35 = vmul.f32 0.1, %v4123_v61  ;;  %3346 = vst [vmem:[%s5791_s27 + $0x20] sm:$0xff] %v3154_v22  ;;  %4146 = vtanh.f32 %v2966_v38 }
 0x4e1   : > { %v4125_v49 = vpop.eup %4124  ;;  %v2855_v13 = vadd.f32 %v2854_v37, %v2696_v0  ;;  %v3155_v27 = vadd.f32 %v3091_v63, %v6198_v31  ;;  %v2968_v15 = vadd.f32 %v2967_v23, %v2696_v0  ;;  %3348 = vst [vmem:[%s5791_s27 + $0x30] sm:$0xff] %v3156_v6  ;;  %v2857_v20 = vadd.f32 %v2856_v39, %v2696_v0  ;;  %v2701_v59 = vpop.permute.xlu0 %2700 }
 0x4e2   : > { %v4127_v2 = vpop.eup %4126  ;;  %v3094_v46 = vmul.f32 0.1, %v4125_v49  ;;  %v3157_v60 = vadd.f32 %v3093_v35, %v6199_v21  ;;  %v2970_v61 = vadd.f32 %v2969_v16, %v2696_v0  ;;  %v2860_v10 = vpop.f32.mrb[108].mxu0 }
 0x4e3   : > { %v4129_v9 = vpop.eup %4128  ;;  %v3096_v47 = vmul.f32 0.1, %v4127_v2  ;;  %4148 = vtanh.f32 %v2855_v13  ;;  %3347 = vst [vmem:[%s5791_s27 + $0x28] sm:$0xff] %v3155_v27  ;;  %v2861_v38 = vadd.f32 %v2860_v10, %v2701_v59  ;;  %v2973_v49 = vpop.f32.mrb[108].mxu1 }
 0x4e4   : > { %v4131_v8 = vpop.eup %4130  ;;  %v3158_v37 = vadd.f32 %v3094_v46, %v5520_v5  ;;  %v3095_v52 = vmul.f32 0.1, %v4129_v9  ;;  %4150 = vtanh.f32 %v2968_v15  ;;  %3349 = vst [vmem:[%s5791_s27 + $0x38] sm:$0xff] %v3157_v60  ;;  %v2862_v39 = vpop.f32.mrb[109].mxu0  ;;  %v2974_v35 = vadd.f32 %v2973_v49, %v2701_v59 }
 0x4e5   : > { %v4133_v22 = vpop.eup %4132  ;;  %v3160_v23 = vadd.f32 %v3096_v47, %v5525_v62  ;;  %v3097_v63 = vmul.f32 0.1, %v4131_v8  ;;  %4152 = vtanh.f32 %v2857_v20  ;;  %v2975_v0 = vpop.f32.mrb[109].mxu1  ;;  %v2863_v31 = vadd.f32 %v2862_v39, %v2701_v59 }
 0x4e6   : > { %v4135_v6 = vpop.eup %4134  ;;  %3350 = vst [vmem:[%s5791_s27 + $0x40] sm:$0xff] %v3158_v37  ;;  %v3159_v27 = vadd.f32 %v3095_v52, %v5528_v32  ;;  %v3098_v5 = vmul.f32 0.1, %v4133_v22  ;;  %4154 = vtanh.f32 %v2970_v61  ;;  %v2864_v16 = vpop.f32.mrb[110].mxu0  ;;  %v2976_v47 = vadd.f32 %v2975_v0, %v2701_v59 }
 0x4e7   : > { %v4137_v13 = vpop.eup %4136  ;;  %3352 = vst [vmem:[%s5791_s27 + $0x50] sm:$0xff] %v3160_v23  ;;  %v3161_v62 = vadd.f32 %v3097_v63, %v5535_v26  ;;  %v3100_v2 = vmul.f32 0.1, %v4135_v6  ;;  %4156 = vtanh.f32 %v2861_v38  ;;  %v2977_v46 = vpop.f32.mrb[110].mxu1 }
 0x4e8   : > { %v2866_v15 = vpop.f32.mrb[111].mxu0  ;;  %v4139_v9 = vpop.eup %4138  ;;  %3351 = vst [vmem:[%s5791_s27 + $0x48] sm:$0xff] %v3159_v27  ;;  %v3162_v32 = vadd.f32 %v3098_v5, %v5544_v41  ;;  %v3099_v60 = vmul.f32 0.1, %v4137_v13  ;;  %4158 = vtanh.f32 %v2974_v35 }
 0x4e9   : > { %v2706_v21 = vpop.permute.xlu1 %2705  ;;  %v2979_v20 = vpop.f32.mrb[111].mxu1  ;;  %3353 = vst [vmem:[%s5791_s27 + $0x58] sm:$0xff] %v3161_v62  ;;  %v3164_v26 = vadd.f32 %v3100_v2, %v5547_v18  ;;  %v3101_v37 = vmul.f32 0.1, %v4139_v9  ;;  %4160 = vtanh.f32 %v2863_v31  ;;  %v6200_v2 = vld [vmem:[#allocation33_spill] sm:$0xff] }
 0x4ea   : > { %v4141_v8 = vpop.eup %4140  ;;  %v2865_v52 = vadd.f32 %v2864_v16, %v2706_v21  ;;  %3354 = vst [vmem:[%s5791_s27 + $0x60] sm:$0xff] %v3162_v32  ;;  %v3163_v10 = vadd.f32 %v3099_v60, %v5538_v24  ;;  %4162 = vtanh.f32 %v2976_v47  ;;  %v2978_v41 = vadd.f32 %v2977_v46, %v2706_v21  ;;  %v2711_v49 = vpop.permute.xlu0 %2710  ;;  %v6201_v32 = vld [vmem:[#allocation36_spill] sm:$0xff] }
 0x4eb   : > { %v4143_v61 = vpop.eup %4142  ;;  %v3102_v22 = vmul.f32 0.1, %v4141_v8  ;;  %3356 = vst [vmem:[%s5791_s27 + $0x70] sm:$0xff] %v3164_v26  ;;  %v3165_v59 = vadd.f32 %v3101_v37, %v5541_v44  ;;  %v2867_v38 = vadd.f32 %v2866_v15, %v2706_v21  ;;  %v2980_v24 = vadd.f32 %v2979_v20, %v2706_v21  ;;  %v2870_v27 = vpop.f32.mrb[112].mxu0 }
 0x4ec   : > { %v4145_v23 = vpop.eup %4144  ;;  %v3104_v63 = vmul.f32 0.1, %v4143_v61  ;;  %4164 = vtanh.f32 %v2865_v52  ;;  %3355 = vst [vmem:[%s5791_s27 + $0x68] sm:$0xff] %v3163_v10  ;;  %v2871_v44 = vadd.f32 %v2870_v27, %v2711_v49  ;;  %v2983_v16 = vpop.f32.mrb[112].mxu1  ;;  %v6202_v52 = vld [vmem:[#allocation37_spill] sm:$0xff] }
 0x4ed   : > { %v4147_v18 = vpop.eup %4146  ;;  %v3166_v39 = vadd.f32 %v3102_v22, %v5550_v57  ;;  %v3103_v6 = vmul.f32 0.1, %v4145_v23  ;;  %4166 = vtanh.f32 %v2978_v41  ;;  %3357 = vst [vmem:[%s5791_s27 + $0x78] sm:$0xff] %v3165_v59  ;;  %v2872_v13 = vpop.f32.mrb[113].mxu0  ;;  %v2984_v46 = vadd.f32 %v2983_v16, %v2711_v49  ;;  %v6203_v59 = vld [vmem:[#allocation38_spill] sm:$0xff] }
 0x4ee   : > { %v4149_v5 = vpop.eup %4148  ;;  %v3168_v35 = vadd.f32 %v3104_v63, %v5553_v7  ;;  %v3105_v0 = vmul.f32 0.1, %v4147_v18  ;;  %4168 = vtanh.f32 %v2867_v38  ;;  %v2985_v15 = vpop.f32.mrb[113].mxu1  ;;  %v2873_v47 = vadd.f32 %v2872_v13, %v2711_v49 }
 0x4ef   : > { %v4151_v62 = vpop.eup %4150  ;;  %3358 = vst [vmem:[%s5791_s27 + $0x80] sm:$0xff] %v3166_v39  ;;  %v3167_v31 = vadd.f32 %v3103_v6, %v6200_v2  ;;  %v3106_v57 = vmul.f32 0.1, %v4149_v5  ;;  %4170 = vtanh.f32 %v2980_v24  ;;  %v2874_v9 = vpop.f32.mrb[114].mxu0  ;;  %v2986_v22 = vadd.f32 %v2985_v15, %v2711_v49  ;;  %v6204_v6 = vld [vmem:[#allocation34_spill] sm:$0xff]  ;;  %v6205_v49 = vld [vmem:[#allocation35_spill] sm:$0xff] }
 0x4f0   : > { %v4153_v21 = vpop.eup %4152  ;;  %3360 = vst [vmem:[%s5791_s27 + $0x90] sm:$0xff] %v3168_v35  ;;  %v3169_v7 = vadd.f32 %v3105_v0, %v6201_v32  ;;  %v3108_v60 = vmul.f32 0.1, %v4151_v62  ;;  %4172 = vtanh.f32 %v2871_v44  ;;  %v2987_v20 = vpop.f32.mrb[114].mxu1 }
 0x4f1   : > { %v2876_v8 = vpop.f32.mrb[115].mxu0  ;;  %v4155_v26 = vpop.eup %4154  ;;  %3359 = vst [vmem:[%s5791_s27 + $0x88] sm:$0xff] %v3167_v31  ;;  %v3170_v61 = vadd.f32 %v3106_v57, %v6202_v52  ;;  %v3107_v10 = vmul.f32 0.1, %v4153_v21  ;;  %4174 = vtanh.f32 %v2984_v46 }
 0x4f2   : > { %v2716_v37 = vpop.permute.xlu1 %2715  ;;  %v2989_v41 = vpop.f32.mrb[115].mxu1  ;;  %3361 = vst [vmem:[%s5791_s27 + $0x98] sm:$0xff] %v3169_v7  ;;  %v3172_v63 = vadd.f32 %v3108_v60, %v6203_v59  ;;  %v3109_v38 = vmul.f32 0.1, %v4155_v26  ;;  %4176 = vtanh.f32 %v2873_v47 }
 0x4f3   : > { %v4157_v23 = vpop.eup %4156  ;;  %v2875_v18 = vadd.f32 %v2874_v9, %v2716_v37  ;;  %3362 = vst [vmem:[%s5791_s27 + $0xa0] sm:$0xff] %v3170_v61  ;;  %v3171_v24 = vadd.f32 %v3107_v10, %v6204_v6  ;;  %4178 = vtanh.f32 %v2986_v22  ;;  %v2988_v5 = vadd.f32 %v2987_v20, %v2716_v37  ;;  %v2721_v62 = vpop.permute.xlu0 %2720  ;;  %v6206_v61 = vld [vmem:[#allocation39_spill] sm:$0xff] }
 0x4f4   : > { %v4159_v39 = vpop.eup %4158  ;;  %v3110_v27 = vmul.f32 0.1, %v4157_v23  ;;  %3364 = vst [vmem:[%s5791_s27 + $0xb0] sm:$0xff] %v3172_v63  ;;  %v3173_v0 = vadd.f32 %v3109_v38, %v6205_v49  ;;  %v2877_v16 = vadd.f32 %v2876_v8, %v2716_v37  ;;  %v2990_v57 = vadd.f32 %v2989_v41, %v2716_v37  ;;  %v2880_v46 = vpop.f32.mrb[116].mxu0 }
 0x4f5   : > { %v4161_v35 = vpop.eup %4160  ;;  %v3112_v44 = vmul.f32 0.1, %v4159_v39  ;;  %4180 = vtanh.f32 %v2875_v18  ;;  %3363 = vst [vmem:[%s5791_s27 + $0xa8] sm:$0xff] %v3171_v24  ;;  %v2881_v32 = vadd.f32 %v2880_v46, %v2721_v62  ;;  %v2993_v7 = vpop.f32.mrb[116].mxu1 }
 0x4f6   : > { %v4163_v13 = vpop.eup %4162  ;;  %v3174_v2 = vadd.f32 %v3110_v27, %v5610_v4  ;;  %v3111_v31 = vmul.f32 0.1, %v4161_v35  ;;  %4182 = vtanh.f32 %v2988_v5  ;;  %3365 = vst [vmem:[%s5791_s27 + $0xb8] sm:$0xff] %v3173_v0  ;;  %v2882_v60 = vpop.f32.mrb[117].mxu0  ;;  %v2994_v8 = vadd.f32 %v2993_v7, %v2721_v62  ;;  %v6208_v27 = vld [vmem:[#allocation9_spill] sm:$0xff] }
 0x4f7   : > { %v4165_v15 = vpop.eup %4164  ;;  %v3176_v9 = vadd.f32 %v3112_v44, %v5615_v17  ;;  %v3113_v21 = vmul.f32 0.1, %v4163_v13  ;;  %4184 = vtanh.f32 %v2877_v16  ;;  %v2995_v26 = vpop.f32.mrb[117].mxu1  ;;  %v2883_v22 = vadd.f32 %v2882_v60, %v2721_v62  ;;  %v6209_v44 = vld [vmem:[#allocation41_spill] sm:$0xff] }
 0x4f8   : > { %v4167_v47 = vpop.eup %4166  ;;  %3366 = vst [vmem:[%s5791_s27 + $0xc0] sm:$0xff] %v3174_v2  ;;  %v3175_v20 = vadd.f32 %v3111_v31, %v5586_v58  ;;  %v3114_v4 = vmul.f32 0.1, %v4165_v15  ;;  %4186 = vtanh.f32 %v2990_v57  ;;  %v2884_v37 = vpop.f32.mrb[118].mxu0  ;;  %v6207_v58 = vld [vmem:[#allocation40_spill] sm:$0xff]  ;;  %v2996_v39 = vadd.f32 %v2995_v26, %v2721_v62  ;;  %v6210_v62 = vld [vmem:[#allocation42_spill] sm:$0xff] }
 0x4f9   : > { %v4169_v52 = vpop.eup %4168  ;;  %3368 = vst [vmem:[%s5791_s27 + $0xd0] sm:$0xff] %v3176_v9  ;;  %v3177_v17 = vadd.f32 %v3113_v21, %v6206_v61  ;;  %v3116_v10 = vmul.f32 0.1, %v4167_v47  ;;  %4188 = vtanh.f32 %v2881_v32  ;;  %v2997_v41 = vpop.f32.mrb[118].mxu1 }
 0x4fa   : > { %v2886_v23 = vpop.f32.mrb[119].mxu0  ;;  %v4171_v59 = vpop.eup %4170  ;;  %3367 = vst [vmem:[%s5791_s27 + $0xc8] sm:$0xff] %v3175_v20  ;;  %v3178_v38 = vadd.f32 %v3114_v4, %v6207_v58  ;;  %v3115_v18 = vmul.f32 0.1, %v4169_v52  ;;  %4190 = vtanh.f32 %v2994_v8 }
 0x4fb   : > { %v2726_v63 = vpop.permute.xlu1 %2725  ;;  %v2999_v6 = vpop.f32.mrb[119].mxu1  ;;  %3369 = vst [vmem:[%s5791_s27 + $0xd8] sm:$0xff] %v3177_v17  ;;  %v3180_v5 = vadd.f32 %v3116_v10, %v6208_v27  ;;  %v3117_v35 = vmul.f32 0.1, %v4171_v59  ;;  %4192 = vtanh.f32 %v2883_v22 }
 0x4fc   : > { %v4173_v24 = vpop.eup %4172  ;;  %v2885_v49 = vadd.f32 %v2884_v37, %v2726_v63  ;;  %3370 = vst [vmem:[%s5791_s27 + $0xe0] sm:$0xff] %v3178_v38  ;;  %v3179_v16 = vadd.f32 %v3115_v18, %v6209_v44  ;;  %4194 = vtanh.f32 %v2996_v39  ;;  %v2998_v2 = vadd.f32 %v2997_v41, %v2726_v63  ;;  %v2731_v21 = vpop.permute.xlu0 %2730 }
 0x4fd   : > { %v4175_v0 = vpop.eup %4174  ;;  %v3118_v13 = vmul.f32 0.1, %v4173_v24  ;;  %3372 = vst [vmem:[%s5791_s27 + $0xf0] sm:$0xff] %v3180_v5  ;;  %v3181_v57 = vadd.f32 %v3117_v35, %v6210_v62  ;;  %v2887_v15 = vadd.f32 %v2886_v23, %v2726_v63  ;;  %v3000_v60 = vadd.f32 %v2999_v6, %v2726_v63  ;;  %v2890_v47 = vpop.f32.mrb[120].mxu0 }
 0x4fe   : > { %v4177_v31 = vpop.eup %4176  ;;  %v3120_v46 = vmul.f32 0.1, %v4175_v0  ;;  %4196 = vtanh.f32 %v2885_v49  ;;  %3371 = vst [vmem:[%s5791_s27 + $0xe8] sm:$0xff] %v3179_v16  ;;  %v2891_v26 = vadd.f32 %v2890_v47, %v2731_v21  ;;  %v3003_v37 = vpop.f32.mrb[120].mxu1 }
 0x4ff   : > { %v4179_v9 = vpop.eup %4178  ;;  %v3182_v32 = vadd.f32 %v3118_v13, %v5640_v29  ;;  %v3119_v7 = vmul.f32 0.1, %v4177_v31  ;;  %4198 = vtanh.f32 %v2998_v2  ;;  %3373 = vst [vmem:[%s5791_s27 + $0xf8] sm:$0xff] %v3181_v57  ;;  %v2892_v52 = vpop.f32.mrb[121].mxu0  ;;  %v3004_v10 = vadd.f32 %v3003_v37, %v2731_v21 }
 0x500   : > { %v4181_v20 = vpop.eup %4180  ;;  %v3184_v4 = vadd.f32 %v3120_v46, %v5643_v3  ;;  %v3121_v8 = vmul.f32 0.1, %v4179_v9  ;;  %4200 = vtanh.f32 %v2887_v15  ;;  %v3005_v22 = vpop.f32.mrb[121].mxu1  ;;  %v2893_v63 = vadd.f32 %v2892_v52, %v2731_v21 }
 0x501   : > { %v4183_v61 = vpop.eup %4182  ;;  %3374 = vst [vmem:[%s5791_s27 + $0x100] sm:$0xff] %v3182_v32  ;;  %v3183_v17 = vadd.f32 %v3119_v7, %v5622_v43  ;;  %v3122_v29 = vmul.f32 0.1, %v4181_v20  ;;  %4202 = vtanh.f32 %v3000_v60  ;;  %v2894_v41 = vpop.f32.mrb[122].mxu0  ;;  %v3006_v24 = vadd.f32 %v3005_v22, %v2731_v21 }
 0x502   : > { %v4185_v23 = vpop.eup %4184  ;;  %3376 = vst [vmem:[%s5791_s27 + $0x110] sm:$0xff] %v3184_v4  ;;  %v3185_v3 = vadd.f32 %v3121_v8, %v5625_v45  ;;  %v3124_v59 = vmul.f32 0.1, %v4183_v61  ;;  %4204 = vtanh.f32 %v2891_v26  ;;  %v3007_v58 = vpop.f32.mrb[122].mxu1 }
 0x503   : > { %v2896_v38 = vpop.f32.mrb[123].mxu0  ;;  %v4187_v18 = vpop.eup %4186  ;;  %3375 = vst [vmem:[%s5791_s27 + $0x108] sm:$0xff] %v3183_v17  ;;  %v3186_v43 = vadd.f32 %v3122_v29, %v5634_v51  ;;  %v3123_v6 = vmul.f32 0.1, %v4185_v23  ;;  %4206 = vtanh.f32 %v3004_v10 }
 0x504   : > { %v2736_v39 = vpop.permute.xlu1 %2735  ;;  %v3009_v27 = vpop.f32.mrb[123].mxu1  ;;  %3377 = vst [vmem:[%s5791_s27 + $0x118] sm:$0xff] %v3185_v3  ;;  %v3188_v45 = vadd.f32 %v3124_v59, %v5637_v12  ;;  %v3125_v35 = vmul.f32 0.1, %v4187_v18  ;;  %4208 = vtanh.f32 %v2893_v63 }
 0x505   : > { %v4189_v5 = vpop.eup %4188  ;;  %v2895_v49 = vadd.f32 %v2894_v41, %v2736_v39  ;;  %3378 = vst [vmem:[%s5791_s27 + $0x120] sm:$0xff] %v3186_v43  ;;  %v3187_v44 = vadd.f32 %v3123_v6, %v5628_v34  ;;  %4210 = vtanh.f32 %v3006_v24  ;;  %v3008_v51 = vadd.f32 %v3007_v58, %v2736_v39  ;;  %v2741_v57 = vpop.permute.xlu0 %2740 }
 0x506   : > { %v4191_v0 = vpop.eup %4190  ;;  %v3126_v16 = vmul.f32 0.1, %v4189_v5  ;;  %3380 = vst [vmem:[%s5791_s27 + $0x130] sm:$0xff] %v3188_v45  ;;  %v3189_v2 = vadd.f32 %v3125_v35, %v5631_v1  ;;  %v2897_v62 = vadd.f32 %v2896_v38, %v2736_v39  ;;  %v3010_v34 = vadd.f32 %v3009_v27, %v2736_v39  ;;  %v2900_v9 = vpop.f32.mrb[124].mxu0 }
 0x507   : > { %v4193_v13 = vpop.eup %4192  ;;  %v3128_v31 = vmul.f32 0.1, %v4191_v0  ;;  %4212 = vtanh.f32 %v2895_v49  ;;  %3379 = vst [vmem:[%s5791_s27 + $0x128] sm:$0xff] %v3187_v44  ;;  %v2901_v1 = vadd.f32 %v2900_v9, %v2741_v57  ;;  %v3013_v60 = vpop.f32.mrb[124].mxu1 }
 0x508   : > { %v4195_v12 = vpop.eup %4194  ;;  %v3190_v46 = vadd.f32 %v3126_v16, %v5650_v55  ;;  %v3127_v15 = vmul.f32 0.1, %v4193_v13  ;;  %4214 = vtanh.f32 %v3008_v51  ;;  %3381 = vst [vmem:[%s5791_s27 + $0x138] sm:$0xff] %v3189_v2  ;;  %v2902_v47 = vpop.f32.mrb[125].mxu0  ;;  %v3014_v8 = vadd.f32 %v3013_v60, %v2741_v57  ;;  %v6212_v60 = vld [vmem:[#allocation17_spill] sm:$0xff] }
 0x509   : > { %v4197_v21 = vpop.eup %4196  ;;  %v3192_v32 = vadd.f32 %v3128_v31, %v5657_v30  ;;  %v3129_v7 = vmul.f32 0.1, %v4195_v12  ;;  %4216 = vtanh.f32 %v2897_v62  ;;  %v3015_v26 = vpop.f32.mrb[125].mxu1  ;;  %v2903_v17 = vadd.f32 %v2902_v47, %v2741_v57 }
 0x50a   : > { %v4199_v20 = vpop.eup %4198  ;;  %3382 = vst [vmem:[%s5791_s27 + $0x140] sm:$0xff] %v3190_v46  ;;  %v3191_v4 = vadd.f32 %v3127_v15, %v5660_v14  ;;  %v3130_v55 = vmul.f32 0.1, %v4197_v21  ;;  %4218 = vtanh.f32 %v3010_v34  ;;  %v2904_v37 = vpop.f32.mrb[126].mxu0  ;;  %v3016_v3 = vadd.f32 %v3015_v26, %v2741_v57  ;;  %v6214_v26 = vld [vmem:[#allocation15_spill] sm:$0xff] }
 0x50b   : > { %v4201_v52 = vpop.eup %4200  ;;  %3384 = vst [vmem:[%s5791_s27 + $0x150] sm:$0xff] %v3192_v32  ;;  %v3193_v30 = vadd.f32 %v3129_v7, %v5663_v11  ;;  %v3132_v61 = vmul.f32 0.1, %v4199_v20  ;;  %4220 = vtanh.f32 %v2901_v1  ;;  %v3017_v29 = vpop.f32.mrb[126].mxu1  ;;  %v6211_v32 = vld [vmem:[#allocation14_spill] sm:$0xff] }
 0x50c   : > { %v2906_v10 = vpop.f32.mrb[127].mxu0  ;;  %v4203_v22 = vpop.eup %4202  ;;  %3383 = vst [vmem:[%s5791_s27 + $0x148] sm:$0xff] %v3191_v4  ;;  %v3194_v14 = vadd.f32 %v3130_v55, %v5669_v40  ;;  %v3131_v23 = vmul.f32 0.1, %v4201_v52  ;;  %4222 = vtanh.f32 %v3014_v8  ;;  %v6213_v4 = vld [vmem:[#allocation11_spill] sm:$0xff] }
 0x50d   : > { %v2746_v41 = vpop.permute.xlu1 %2745  ;;  %v3019_v59 = vpop.f32.mrb[127].mxu1  ;;  %3385 = vst [vmem:[%s5791_s27 + $0x158] sm:$0xff] %v3193_v30  ;;  %v3196_v11 = vadd.f32 %v3132_v61, %v5675_v19  ;;  %v3133_v58 = vmul.f32 0.1, %v4203_v22  ;;  %4224 = vtanh.f32 %v2903_v17  ;;  %v6215_v61 = vld [vmem:[#allocation10_spill] sm:$0xff] }
 0x50e   : > { %v4205_v63 = vpop.eup %4204  ;;  %v2905_v38 = vadd.f32 %v2904_v37, %v2746_v41  ;;  %3386 = vst [vmem:[%s5791_s27 + $0x160] sm:$0xff] %v3194_v14  ;;  %v3195_v39 = vadd.f32 %v3131_v23, %v5666_v54  ;;  %4226 = vtanh.f32 %v3016_v3  ;;  %v3018_v40 = vadd.f32 %v3017_v29, %v2746_v41  ;;  %v6217_v14 = vld [vmem:[#allocation13_spill] sm:$0xff]  ;;  %v6218_v3 = vld [vmem:[#allocation16_spill] sm:$0xff] }
 0x50f   : > { %v4207_v18 = vpop.eup %4206  ;;  %v3134_v43 = vmul.f32 0.1, %v4205_v63  ;;  %3388 = vst [vmem:[%s5791_s27 + $0x170] sm:$0xff] %v3196_v11  ;;  %v3197_v24 = vadd.f32 %v3133_v58, %v5672_v42  ;;  %v2907_v19 = vadd.f32 %v2906_v10, %v2746_v41  ;;  %v3020_v54 = vadd.f32 %v3019_v59, %v2746_v41  ;;  %v6216_v10 = vld [vmem:[#allocation12_spill] sm:$0xff] }
 0x510   : > { %v4209_v6 = vpop.eup %4208  ;;  %v3136_v27 = vmul.f32 0.1, %v4207_v18  ;;  %4228 = vtanh.f32 %v2905_v38  ;;  %3387 = vst [vmem:[%s5791_s27 + $0x168] sm:$0xff] %v3195_v39 }
 0x511   : > { %v4211_v5 = vpop.eup %4210  ;;  %v3198_v45 = vadd.f32 %v3134_v43, %v5698_v53  ;;  %v3135_v35 = vmul.f32 0.1, %v4209_v6  ;;  %4230 = vtanh.f32 %v3018_v40  ;;  %3389 = vst [vmem:[%s5791_s27 + $0x178] sm:$0xff] %v3197_v24 }
 0x512   : > { %v4213_v49 = vpop.eup %4212  ;;  %v3200_v0 = vadd.f32 %v3136_v27, %v5707_v25  ;;  %v3137_v44 = vmul.f32 0.1, %v4211_v5  ;;  %4232 = vtanh.f32 %v2907_v19 }
 0x513   : > { %v4215_v42 = vpop.eup %4214  ;;  %3390 = vst [vmem:[%s5791_s27 + $0x180] sm:$0xff] %v3198_v45  ;;  %v3199_v16 = vadd.f32 %v3135_v35, %v5689_v50  ;;  %v3138_v51 = vmul.f32 0.1, %v4213_v49  ;;  %4234 = vtanh.f32 %v3020_v54 }
 0x514   : > { %v4217_v13 = vpop.eup %4216  ;;  %3392 = vst [vmem:[%s5791_s27 + $0x190] sm:$0xff] %v3200_v0  ;;  %v3201_v53 = vadd.f32 %v3137_v44, %v5701_v36  ;;  %v3140_v2 = vmul.f32 0.1, %v4215_v42 }
 0x515   : > { %v4219_v31 = vpop.eup %4218  ;;  %3391 = vst [vmem:[%s5791_s27 + $0x188] sm:$0xff] %v3199_v16  ;;  %v3202_v25 = vadd.f32 %v3138_v51, %v5682_v48  ;;  %v3139_v62 = vmul.f32 0.1, %v4217_v13 }
 0x516   : > { %v4221_v12 = vpop.eup %4220  ;;  %3393 = vst [vmem:[%s5791_s27 + $0x198] sm:$0xff] %v3201_v53  ;;  %v3204_v50 = vadd.f32 %v3140_v2, %v5692_v56  ;;  %v3141_v57 = vmul.f32 0.1, %v4219_v31 }
 0x517   : > { %v4223_v46 = vpop.eup %4222  ;;  %3394 = vst [vmem:[%s5791_s27 + $0x1a0] sm:$0xff] %v3202_v25  ;;  %v3203_v15 = vadd.f32 %v3139_v62, %v5695_v28  ;;  %v3142_v34 = vmul.f32 0.1, %v4221_v12 }
 0x518   : > { %v4225_v36 = vpop.eup %4224  ;;  %3396 = vst [vmem:[%s5791_s27 + $0x1b0] sm:$0xff] %v3204_v50  ;;  %v3205_v9 = vadd.f32 %v3141_v57, %v5704_v33  ;;  %v3144_v48 = vmul.f32 0.1, %v4223_v46 }
 0x519   : > { %v4227_v21 = vpop.eup %4226  ;;  %3395 = vst [vmem:[%s5791_s27 + $0x1a8] sm:$0xff] %v3203_v15  ;;  %v3206_v7 = vadd.f32 %v3142_v34, %v6211_v32  ;;  %v3143_v56 = vmul.f32 0.1, %v4225_v36 }
 0x51a   : > { %v4229_v1 = vpop.eup %4228  ;;  %3397 = vst [vmem:[%s5791_s27 + $0x1b8] sm:$0xff] %v3205_v9  ;;  %v3208_v47 = vadd.f32 %v3144_v48, %v6212_v60  ;;  %v3145_v28 = vmul.f32 0.1, %v4227_v21 }
 0x51b   : > { %v4231_v20 = vpop.eup %4230  ;;  %3398 = vst [vmem:[%s5791_s27 + $0x1c0] sm:$0xff] %v3206_v7  ;;  %v3207_v55 = vadd.f32 %v3143_v56, %v6213_v4  ;;  %v3146_v33 = vmul.f32 0.1, %v4229_v1 }
 0x51c   : > { %v4233_v8 = vpop.eup %4232  ;;  %3400 = vst [vmem:[%s5791_s27 + $0x1d0] sm:$0xff] %v3208_v47  ;;  %v3209_v37 = vadd.f32 %v3145_v28, %v6214_v26  ;;  %v3148_v52 = vmul.f32 0.1, %v4231_v20 }
 0x51d   : > { %v4235_v30 = vpop.eup %4234  ;;  %3399 = vst [vmem:[%s5791_s27 + $0x1c8] sm:$0xff] %v3207_v55  ;;  %v3210_v17 = vadd.f32 %v3146_v33, %v6215_v61  ;;  %v3147_v29 = vmul.f32 0.1, %v4233_v8 }
 0x51e   : > { %3401 = vst [vmem:[%s5791_s27 + $0x1d8] sm:$0xff] %v3209_v37  ;;  %v3212_v22 = vadd.f32 %v3148_v52, %v6216_v10  ;;  %v3149_v41 = vmul.f32 0.1, %v4235_v30 }
 0x51f   : > { %3402 = vst [vmem:[%s5791_s27 + $0x1e0] sm:$0xff] %v3210_v17  ;;  %v3211_v23 = vadd.f32 %v3147_v29, %v6217_v14 }
 0x520   : > { %3404 = vst [vmem:[%s5791_s27 + $0x1f0] sm:$0xff] %v3212_v22  ;;  %v3213_v59 = vadd.f32 %v3149_v41, %v6218_v3 }
 0x521   : > { %3403 = vst [vmem:[%s5791_s27 + $0x1e8] sm:$0xff] %v3211_v23 }
 0x522   : > { %3405 = vst [vmem:[%s5791_s27 + $0x1f8] sm:$0xff] %v3213_v59 }
 0x523   : > { %4324 = shalt.err (!%p4321_p3)
}
 0x524   : > { %s4325_s6 = scalar_lea.hbm %s5918_s29, 8192  ;;  %s4329_s19 = scalar_lea.hbm %s5973_s3, 16384 }
 0x525   : > { %p4326_p5 = scmp.ne.s32.totalorder %s5918_s29, %s4325_s6  ;;  %p4330_p9 = scmp.lt.u32.totalorder %s5918_s29, %s5973_s3 }
 0x526   : > { %p4331_p0 = scmp.lt.u32.totalorder %s4329_s19, %s4325_s6  ;;  %p4333_p6 = scmp.lt.u32.totalorder %s4325_s6, %s5918_s29 }
 0x527   : > { %p4327_p7 = pnand %p4326_p5, %p6219_p11 }
 0x528   : > { %p4332_p2 = por %p4331_p0, %p4330_p9 }
 0x529   : > { %p4328_p8 = pneg %p4327_p7 }
 0x52a   : > { %p4334_p12 = por %p4333_p6, %p4332_p2 }
 0x52c   : > { %p4335_p13 = pnand %p4334_p12, %p4328_p8 }
 0x52e   : > { %4338 = shalt.err (!%p4335_p13)
}
 0x52f   : > { %s4385_s26 = smov 512   ;;  %s4386_s27 = smov 1024  }
 0x530   : > { %s4387_s10 = smov 32  }
 0x531   : > { %3639 = dma.vmem_to_hbm [thread:$0]  (%p6219_p11), %s5922_s28, 8192, %s5918_s29, %s3407_s30, %s4385_s26, %s4386_s27, %s4387_s10  }
 0x532 PF: > { %s3435_s16 = sand.u32 1, %s4365_s12   ;;  %p6220_p4 = scmp.ne.s32.totalorder %s6059_s25, 0 }
 0x533   : > { %p6221_p10 = scmp.ge.s32.totalorder %s4377_s15, 2  ;;  %s3436_s17 = scalar_lea.sflag [#allocation5], %s3435_s16 }
 0x535   : > { %p3646_p1 = pnand %p6221_p10, %p6220_p4 }
 0x537   : > { %4360 = dma.done.wait (!%p3646_p1), %s3436_s17, 8192  }
 0x538   : > { %4362 = vsyncadd (!%p3646_p1), %s3436_s17, 4294959104  ;;  %p16_p3 = scmp.ge.s32.totalorder %s4433_s18, 4   ;;  %s6222_s12 = smov %s4369_s13 }
 0x539   : > { %s6223_s13 = smov %s4373_s14  ;;  %s6224_s14 = smov %s4445_s21 }
 0x53a   : > { %s6225_s15 = smov %s4433_s18  ;;  %18 = sbr.rel (!%p16_p3) target bundleno = 5 (0x5), region = 83 }
 0x541   :  { %3441 = vsyncpa [#allocation4], 1 }
 0x542   :  { %3443 = vsyncpa [#allocation4 + $0x1], 1 }
 0x543   :  { %3444 = vsyncpa [#allocation5], 1 }
 0x544   :  { %3446 = vsyncpa [#allocation5 + $0x1], 1 }

</bundles_post_ra>
